<compile_context>
chip_gen: v6e
topology: v6e:2x2x1
jax: 0.10.0
libtpu: 0.0.40
codegen_flags: <defaults>
</compile_context>

<pallas_src>
import functools
import math

import jax
import jax.numpy as jnp
from jax.experimental import pallas as pl
from jax.experimental.pallas import tpu as pltpu

EPS = 1e-12
LANES = 128
STAT_ROWS = 8          # per-core stats block rows (rows 0..2 used, padded to a sublane tile)


# ----------------------------- small helpers ---------------------------------
def _round_up(x, m):
    return (x + m - 1) // m * m


@functools.lru_cache(maxsize=None)
def _chip_config():
    """Generation-aware VMEM budget / block sizing / conv strategy."""
    vmem_cap = 128 * 1024 * 1024
    try:
        vmem_cap = int(getattr(pltpu.get_tpu_info(), "vmem_capacity_bytes", vmem_cap))
    except Exception:
        pass
    if vmem_cap <= 96 * 1024 * 1024:
        # v7x-class: 64 MiB per TensorCore -> smaller blocks, tighter limit,
        # per-tap accumulating matmuls (no im2col slab copies / scratch).
        return {"vmem_limit": min(44 * 1024 * 1024, int(0.7 * vmem_cap)),
                "target_m": 768, "per_tap": True}
    # v5e / v6e: 128 MiB VMEM -> big blocks, deep-K im2col slab.
    return {"vmem_limit": min(100 * 1024 * 1024, int(0.75 * vmem_cap)),
            "target_m": 1536, "per_tap": False}


def _pick_batch_block(n, hw, target_m, row_bytes, vmem_limit):
    bn = max(1, min(n, target_m // max(hw, 1)))
    while bn > 1 and bn * hw * row_bytes > vmem_limit // 3:
        bn -= 1
    while n % bn:
        bn -= 1
    return max(bn, 1)


def _erf(x):
    # Abramowitz & Stegun 7.1.26 polynomial (|abs err| < 1.5e-7); lowers to
    # EUP exp + VPU ops only.
    a1, a2, a3, a4, a5 = 0.254829592, -0.284496736, 1.421413741, -1.453152027, 1.061405429
    p = 0.3275911
    ax = jnp.abs(x)
    t = 1.0 / (1.0 + p * ax)
    poly = ((((a5 * t + a4) * t + a3) * t + a2) * t + a1) * t
    y = 1.0 - poly * jnp.exp(-ax * ax)
    return jnp.where(x >= 0, y, -y)


def _gelu(x):
    # PyTorch nn.GELU() default (approximate='none'): 0.5*x*(1+erf(x/sqrt(2)))
    return 0.5 * x * (1.0 + _erf(x * (1.0 / math.sqrt(2.0))))


def _acc_stats(stats_ref, x2, first):
    """One-pass, per-core, shifted BN statistics.

    stats_ref: (STAT_ROWS, C) f32, revisited across this core's grid steps.
      row 0: sum(x - K), row 1: sum((x - K)^2), row 2: K (this core's shift =
      per-channel mean of its first block).  Shifting by K removes the
      catastrophic cancellation of the plain E[x^2] - E[x]^2 form.
    x2: (M, C) f32 value for the current block.
    """
    m = x2.shape[0]

    @pl.when(first)
    def _init():
        stats_ref[...] = jnp.zeros_like(stats_ref)
        stats_ref[2:3, :] = jnp.sum(x2, axis=0, keepdims=True) * (1.0 / m)

    k = stats_ref[2:3, :]
    xc = x2 - k
    stats_ref[0:1, :] += jnp.sum(xc, axis=0, keepdims=True)
    stats_ref[1:2, :] += jnp.sum(xc * xc, axis=0, keepdims=True)


# --------------------------------- kernels ------------------------------------
def _conv1_pool_packed_kernel(xc_ref, w1_ref, pool_ref, stats_ref):
    # Small-Cin form.  xc_ref: (bn, 4, Hh, Wh, Kp) — per-quadrant im2col built
    # HBM-side with (tap, cin) packed into the contraction dim.
    bn, _, Hh, Wh, Kp = xc_ref.shape
    Co = pool_ref.shape[-1]
    M = bn * Hh * Wh

    pmax = None
    for quad in range(4):
        q = jnp.dot(xc_ref[:, quad, :, :, :].reshape(M, Kp), w1_ref[...],
                    preferred_element_type=jnp.float32)
        pmax = q if quad == 0 else jnp.maximum(pmax, q)

    pool_ref[...] = pmax.reshape(bn, Hh, Wh, Co).astype(pool_ref.dtype)
    _acc_stats(stats_ref, pmax, pl.program_id(1) == 0)


def _conv1_pool_kernel(per_tap, xp4_ref, w1_ref, pool_ref, stats_ref, *slab):
    # General form.  xp4_ref: (bn, 4, Hh+1, Wh+1, Ci) parity-split padded input
    #   xp4[n, 2*pr+pc, a, b, :] == xpad[n, 2a+pr, 2b+pc, :]
    # w1_ref: (9*Ci, Co), rows ordered (dy, dx, cin).
    bn = xp4_ref.shape[0]
    Ci = xp4_ref.shape[-1]
    Hh, Wh = xp4_ref.shape[2] - 1, xp4_ref.shape[3] - 1
    Co = pool_ref.shape[-1]
    M = bn * Hh * Wh

    pmax = None
    for py in range(2):                 # pool quadrant row offset
        for px in range(2):             # pool quadrant col offset
            if per_tap:
                # v7x: 9 accumulating per-tap matmuls (no slab copies/scratch).
                q = None
                for dy in range(3):
                    for dx in range(3):
                        r, c = py + dy, px + dx
                        par = (r % 2) * 2 + (c % 2)
                        a, b = r // 2, c // 2
                        tap = xp4_ref[:, par, a:a + Hh, b:b + Wh, :].reshape(M, Ci)
                        t = dy * 3 + dx
                        part = jnp.dot(tap, w1_ref[t * Ci:(t + 1) * Ci, :],
                                       preferred_element_type=jnp.float32)
                        q = part if q is None else q + part
            else:
                # v5e/v6e: deep-K im2col slab, one matmul per quadrant.
                slab_ref = slab[0]
                for dy in range(3):
                    for dx in range(3):
                        r, c = py + dy, px + dx
                        par = (r % 2) * 2 + (c % 2)
                        a, b = r // 2, c // 2
                        tap = xp4_ref[:, par, a:a + Hh, b:b + Wh, :]
                        t = dy * 3 + dx
                        slab_ref[:, t * Ci:(t + 1) * Ci] = (
                            tap.reshape(M, Ci).astype(slab_ref.dtype))
                q = jnp.dot(slab_ref[...], w1_ref[...],
                            preferred_element_type=jnp.float32)
            # Fused 2x2 maxpool: running max held in a value, stored once.
            pmax = q if (py == 0 and px == 0) else jnp.maximum(pmax, q)

    pool_ref[...] = pmax.reshape(bn, Hh, Wh, Co).astype(pool_ref.dtype)
    _acc_stats(stats_ref, pmax, pl.program_id(1) == 0)


def _bn1_gelu_conv2_kernel(per_tap, p_ref, sc1_ref, w2_ref, y_ref, stats_ref,
                           pad_ref, *slab):
    # p_ref: (bn, Hh, Wh, Co) pooled conv1 output | sc1_ref: (2, Co) scale/shift
    # w2_ref: (9*Co, Co) | y_ref: (bn, Hh, Wh, Co) conv2 output (pre-BN2)
    # pad_ref: (bn, Hh+2, Wh+2, Co) f32 'same' halo scratch (persistent per core)
    bn, Hh, Wh, Co = p_ref.shape
    M = bn * Hh * Wh
    first = pl.program_id(1) == 0

    @pl.when(first)
    def _init():
        # The halo only ever needs to be zero; the interior is fully rewritten
        # every step and the scratch persists across this core's grid steps.
        pad_ref[...] = jnp.zeros_like(pad_ref)

    scale = sc1_ref[0:1, :].reshape(1, 1, 1, Co)
    shift = sc1_ref[1:2, :].reshape(1, 1, 1, Co)
    a1 = _gelu(p_ref[...].astype(jnp.float32) * scale + shift)
    pad_ref[:, 1:Hh + 1, 1:Wh + 1, :] = a1

    if per_tap:
        y2 = None
        for dy in range(3):
            for dx in range(3):
                t = dy * 3 + dx
                tap = pad_ref[:, dy:dy + Hh, dx:dx + Wh, :].reshape(M, Co)
                part = jnp.dot(tap.astype(w2_ref.dtype),
                               w2_ref[t * Co:(t + 1) * Co, :],
                               preferred_element_type=jnp.float32)
                y2 = part if y2 is None else y2 + part
    else:
        slab_ref = slab[0]
        for dy in range(3):
            for dx in range(3):
                t = dy * 3 + dx
                tap = pad_ref[:, dy:dy + Hh, dx:dx + Wh, :]
                slab_ref[:, t * Co:(t + 1) * Co] = (
                    tap.reshape(M, Co).astype(slab_ref.dtype))
        y2 = jnp.dot(slab_ref[...], w2_ref[...], preferred_element_type=jnp.float32)

    y_ref[...] = y2.reshape(bn, Hh, Wh, Co).astype(y_ref.dtype)
    _acc_stats(stats_ref, y2, first)


def _bn2_gelu_kernel(y_ref, sc2_ref, o_ref):
    Co = y_ref.shape[-1]
    scale = sc2_ref[0:1, :].reshape(1, 1, 1, Co)
    shift = sc2_ref[1:2, :].reshape(1, 1, 1, Co)
    o_ref[...] = _gelu(y_ref[...].astype(jnp.float32) * scale + shift).astype(o_ref.dtype)


# ----------------------------- wrapper plumbing --------------------------------
def _prep_weight(w, cin_p, cout_p, dtype):
    # OIHW -> (9*Cin_p, Cout_p), rows ordered (dy, dx, cin), zero-padded channels.
    cout, cin, kh, kw = w.shape
    w = jnp.transpose(w, (2, 3, 1, 0)).astype(jnp.float32)        # (3,3,Cin,Cout)
    w = jnp.pad(w, ((0, 0), (0, 0), (0, cin_p - cin), (0, cout_p - cout)))
    return w.reshape(kh * kw * cin_p, cout_p).astype(dtype)


def _prep_weight_packed(w, k_p, cout_p, dtype):
    # OIHW -> (round_up(9*Cin,128), Cout_p), rows ordered (dy, dx, cin) with the
    # zero padding only at the end of the contraction dim (small-Cin form).
    cout, cin, kh, kw = w.shape
    w = jnp.transpose(w, (2, 3, 1, 0)).astype(jnp.float32).reshape(kh * kw * cin, cout)
    w = jnp.pad(w, ((0, k_p - kh * kw * cin), (0, cout_p - cout)))
    return w.astype(dtype)


def _pad_vec(v, cp, fill):
    c = v.shape[0]
    return jnp.pad(v.astype(jnp.float32), (0, cp - c), constant_values=fill)


def _finalize_bn(stats, gamma, beta, n_per_core):
    # stats: (nc*STAT_ROWS, C) per-core shifted sums; merge via law of total
    # variance (per-core counts are equal by construction).
    c = stats.shape[-1]
    s = stats.reshape(-1, STAT_ROWS, c)
    s1, s2, k = s[:, 0, :], s[:, 1, :], s[:, 2, :]
    mean_c = k + s1 / n_per_core
    var_c = jnp.maximum(s2 / n_per_core - (s1 / n_per_core) ** 2, 0.0)
    mean = jnp.mean(mean_c, axis=0)
    var = jnp.mean(var_c, axis=0) + jnp.mean((mean_c - mean) ** 2, axis=0)
    inv = jax.lax.rsqrt(var + EPS)
    scale = gamma * inv
    shift = beta - mean * scale
    return jnp.stack([scale, shift], axis=0)                      # (2, C)


@functools.partial(jax.jit, static_argnames=("mxu_dtype", "block_rows"))
def conv_group_forward(x_nchw, w1, g1, b1, w2, g2, b2,
                       mxu_dtype=jnp.bfloat16, block_rows=None):
    """x_nchw: (N, Cin, H, W); w*: OIHW like PyTorch.  bf16 MXU operands by
    default (f32 accumulation / BN / GELU); pass mxu_dtype=jnp.float32 for a
    full-precision path.  block_rows optionally overrides the per-step M."""
    N, Cin, H, W = x_nchw.shape
    Cout = w1.shape[0]
    assert H % 2 == 0 and W % 2 == 0, "MaxPool2d(2) needs even spatial dims"
    Hh, Wh = H // 2, W // 2
    hw = Hh * Wh
    Cop = _round_up(Cout, LANES)

    cfg = _chip_config()
    per_tap = cfg["per_tap"]
    vmem_limit = cfg["vmem_limit"]
    itemsize = jnp.dtype(mxu_dtype).itemsize

    packed = 9 * Cin <= 2 * LANES                        # small-Cin first-block form
    Kp = _round_up(9 * Cin, LANES) if packed else None
    Cip = None if packed else _round_up(Cin, LANES)

    k1 = Kp if packed else Cip
    row_bytes = (4 * k1 + (0 if per_tap else 9 * Cop) + 10 * Cop) * itemsize
    target_m = block_rows if block_rows is not None else cfg["target_m"]
    bn = _pick_batch_block(N, hw, target_m, row_bytes, vmem_limit)
    steps = N // bn
    nc = 2 if steps % 2 == 0 else 1                      # per-core stats partials
    inner = steps // nc
    n_per_core = float(inner * bn * hw)

    params = pltpu.CompilerParams(dimension_semantics=("parallel", "arbitrary"),
                                  vmem_limit_bytes=vmem_limit)
    params3 = pltpu.CompilerParams(dimension_semantics=("parallel",),
                                   vmem_limit_bytes=vmem_limit)

    # --- HBM-side layout plumbing (one-shot, done by XLA) ---
    x = jnp.transpose(x_nchw, (0, 2, 3, 1))                        # NHWC
    if packed:
        xpad = jnp.pad(x, ((0, 0), (1, 1), (1, 1), (0, 0)))
        quads = []
        for py in range(2):
            for px in range(2):
                taps = [xpad[:, py + dy: py + dy + 2 * Hh: 2,
                               px + dx: px + dx + 2 * Wh: 2, :]
                        for dy in range(3) for dx in range(3)]
                quads.append(jnp.concatenate(taps, axis=-1))       # (N,Hh,Wh,9*Cin)
        xin = jnp.stack(quads, axis=1)                              # (N,4,Hh,Wh,9*Cin)
        xin = jnp.pad(xin, ((0, 0), (0, 0), (0, 0), (0, 0), (0, Kp - 9 * Cin)))
        xin = xin.astype(mxu_dtype)
        w1r = _prep_weight_packed(w1, Kp, Cop, mxu_dtype)
        in_spec1 = pl.BlockSpec((bn, 4, Hh, Wh, Kp),
                                lambda c, i: (c * inner + i, 0, 0, 0, 0))
        kernel1 = _conv1_pool_packed_kernel
        scratch1 = []
    else:
        # parity split: xp4[n, 2*pr+pc, a, b, :] = xpad[n, 2a+pr, 2b+pc, :]
        xpad = jnp.pad(x, ((0, 0), (1, 1), (1, 1), (0, Cip - Cin))).astype(mxu_dtype)
        xin = (xpad.reshape(N, Hh + 1, 2, Wh + 1, 2, Cip)
               .transpose(0, 2, 4, 1, 3, 5)
               .reshape(N, 4, Hh + 1, Wh + 1, Cip))
        w1r = _prep_weight(w1, Cip, Cop, mxu_dtype)
        in_spec1 = pl.BlockSpec((bn, 4, Hh + 1, Wh + 1, Cip),
                                lambda c, i: (c * inner + i, 0, 0, 0, 0))
        kernel1 = functools.partial(_conv1_pool_kernel, per_tap)
        scratch1 = [] if per_tap else [pltpu.VMEM((bn * hw, 9 * Cip), mxu_dtype)]

    w2r = _prep_weight(w2, Cop, Cop, mxu_dtype)
    g1p, b1p = _pad_vec(g1, Cop, 1.0), _pad_vec(b1, Cop, 0.0)
    g2p, b2p = _pad_vec(g2, Cop, 1.0), _pad_vec(b2, Cop, 0.0)

    # NOTE: the constant-index weight/scale blocks (< 1 MiB) could be marked
    # pipeline_mode=pl.Buffered(1); left default-double-buffered for conservative
    # lowering.

    # ---- stage 1: conv1 (3x3 'same') fused with 2x2 maxpool + BN1 partial stats ----
    pooled, stats1 = pl.pallas_call(
        kernel1,
        grid=(nc, inner),
        in_specs=[in_spec1,
                  pl.BlockSpec(w1r.shape, lambda c, i: (0, 0))],
        out_specs=[pl.BlockSpec((bn, Hh, Wh, Cop), lambda c, i: (c * inner + i, 0, 0, 0)),
                   pl.BlockSpec((STAT_ROWS, Cop), lambda c, i: (c, 0))],
        out_shape=[jax.ShapeDtypeStruct((N, Hh, Wh, Cop), mxu_dtype),
                   jax.ShapeDtypeStruct((nc * STAT_ROWS, Cop), jnp.float32)],
        scratch_shapes=scratch1,
        compiler_params=params,
    )(xin, w1r)

    sc1 = _finalize_bn(stats1, g1p, b1p, n_per_core)

    # ---- stage 2: BN1 + GELU + conv2 (3x3 'same') + BN2 partial stats ----
    scratch2 = [pltpu.VMEM((bn, Hh + 2, Wh + 2, Cop), jnp.float32)]
    if not per_tap:
        scratch2.append(pltpu.VMEM((bn * hw, 9 * Cop), mxu_dtype))
    y2, stats2 = pl.pallas_call(
        functools.partial(_bn1_gelu_conv2_kernel, per_tap),
        grid=(nc, inner),
        in_specs=[pl.BlockSpec((bn, Hh, Wh, Cop), lambda c, i: (c * inner + i, 0, 0, 0)),
                  pl.BlockSpec((2, Cop), lambda c, i: (0, 0)),
                  pl.BlockSpec((9 * Cop, Cop), lambda c, i: (0, 0))],
        out_specs=[pl.BlockSpec((bn, Hh, Wh, Cop), lambda c, i: (c * inner + i, 0, 0, 0)),
                   pl.BlockSpec((STAT_ROWS, Cop), lambda c, i: (c, 0))],
        out_shape=[jax.ShapeDtypeStruct((N, Hh, Wh, Cop), mxu_dtype),
                   jax.ShapeDtypeStruct((nc * STAT_ROWS, Cop), jnp.float32)],
        scratch_shapes=scratch2,
        compiler_params=params,
    )(pooled, sc1, w2r)

    sc2 = _finalize_bn(stats2, g2p, b2p, n_per_core)

    # ---- stage 3: BN2 + GELU (elementwise, HBM-bound, megacore 'parallel') ----
    out = pl.pallas_call(
        _bn2_gelu_kernel,
        grid=(steps,),
        in_specs=[pl.BlockSpec((bn, Hh, Wh, Cop), lambda i: (i, 0, 0, 0)),
                  pl.BlockSpec((2, Cop), lambda i: (0, 0))],
        out_specs=pl.BlockSpec((bn, Hh, Wh, Cop), lambda i: (i, 0, 0, 0)),
        out_shape=jax.ShapeDtypeStruct((N, Hh, Wh, Cop), jnp.float32),
        compiler_params=params3,
    )(y2, sc2)

    # Back to the PyTorch-facing NCHW layout, dropping lane padding.
    # TODO(synk): consumers that accept padded NHWC can take `out` directly and
    # skip this final HBM pass.
    return jnp.transpose(out[..., :Cout], (0, 3, 1, 2))


# --------------------------- pure-JAX reference -------------------------------
def ref_forward(x, w1, w2, g1, b1, g2, b2):
    def conv(z, w):
        return jax.lax.conv_general_dilated(
            z, w, (1, 1), 'SAME', dimension_numbers=('NCHW', 'OIHW', 'NCHW'))

    def bn(z, g, b):
        mean = z.mean(axis=(0, 2, 3), keepdims=True)
        var = ((z - mean) ** 2).mean(axis=(0, 2, 3), keepdims=True)
        return (z - mean) / jnp.sqrt(var + EPS) * g.reshape(1, -1, 1, 1) + b.reshape(1, -1, 1, 1)

    z = conv(x, w1)
    z = jax.lax.reduce_window(z, -jnp.inf, jax.lax.max, (1, 1, 2, 2), (1, 1, 2, 2), 'VALID')
    z = jax.nn.gelu(bn(z, g1, b1), approximate=False)
    z = conv(z, w2)
    z = jax.nn.gelu(bn(z, g2, b2), approximate=False)
    return z


if __name__ == "__main__":
    def make_conv_weight(k, cout, cin):
        # Conv.reset_parameters: kaiming-uniform-ish init, then dirac_ on the
        # first `cin` filters (identity kernels), as in the PyTorch module.
        bound = 1.0 / math.sqrt(cin * 9)
        w = jax.random.uniform(k, (cout, cin, 3, 3), jnp.float32, -bound, bound)
        n = min(cout, cin)
        idx = jnp.arange(n)
        dirac = jnp.zeros((n, cin, 3, 3), jnp.float32).at[idx, idx, 1, 1].set(1.0)
        return w.at[:n].set(dirac)

    def run_case(key, n, cin, cout, h, w, mxu_dtype, block_rows, tol):
        kx, k1, k2 = jax.random.split(key, 3)
        x = jax.random.normal(kx, (n, cin, h, w), jnp.float32)
        w1 = make_conv_weight(k1, cout, cin)
        w2 = make_conv_weight(k2, cout, cout)
        g1 = jnp.ones((cout,), jnp.float32)
        b1 = jnp.zeros((cout,), jnp.float32)
        g2 = jnp.ones((cout,), jnp.float32)
        b2 = jnp.zeros((cout,), jnp.float32)
        out = conv_group_forward(x, w1, g1, b1, w2, g2, b2,
                                 mxu_dtype=mxu_dtype, block_rows=block_rows)
        out = jax.block_until_ready(out)
        ref = ref_forward(x, w1, w2, g1, b1, g2, b2)
        assert out.shape == ref.shape == (n, cout, h // 2, w // 2)
        err = float(jnp.max(jnp.abs(out - ref)))
        assert err < tol, f"max abs err {err} (tol {tol})"
        return err

    key = jax.random.PRNGKey(0)
    ka, kb, kc = jax.random.split(key, 3)
    # 1) small-Cin packed stage-1 path, f32 MXU operands (strict-precision check)
    run_case(ka, 2, 4, 8, 16, 16, jnp.float32, None, 1e-3)
    # 2) same path with the default bf16 MXU operands / bf16 intermediates,
    #    forced multi-step grid + per-core stats partials
    run_case(kb, 2, 4, 8, 16, 16, jnp.bfloat16, 64, 6e-2)
    # 3) general (parity-split) stage-1 path, multi-step grid, per-core partials
    run_case(kc, 4, 32, 8, 16, 16, jnp.bfloat16, 64, 6e-2)
    print("KERNEL_OK")
</pallas_src>

<mosaic_0001>
module attributes {stable_mosaic.version = 11 : i64} {
  func.func @_conv1_pool_packed_kernel(%arg0: i32, %arg1: i32, %arg2: memref<2x4x8x8x128xf32, #tpu.memory_space<vmem>>, %arg3: memref<128x128xf32, #tpu.memory_space<vmem>>, %arg4: memref<2x8x8x128xf32, #tpu.memory_space<vmem>>, %arg5: memref<8x128xf32, #tpu.memory_space<vmem>>) attributes {dimension_semantics = [#tpu.dimension_semantics<parallel>, #tpu.dimension_semantics<arbitrary>], iteration_bounds = array<i64: 1, 1>, scalar_prefetch = 0 : i64, scratch_operands = 0 : i64, tpu.core_type = #tpu.core_type<tc>, window_params = [{transform_indices = @transform_0, window_bounds = array<i64: 2, 4, 8, 8, 128>}, {pipeline_mode = #tpu.pipeline_mode<synchronous>, transform_indices = @transform_1, window_bounds = array<i64: 128, 128>}, {transform_indices = @transform_2, window_bounds = array<i64: 2, 8, 8, 128>}, {transform_indices = @transform_3, window_bounds = array<i64: 8, 128>}]} {
    %c0 = arith.constant 0 : index
    %c0_0 = arith.constant 0 : index
    %c0_1 = arith.constant 0 : index
    %c0_2 = arith.constant 0 : index
    %c0_3 = arith.constant 0 : index
    %0 = vector.load %arg2[%c0, %c0_0, %c0_1, %c0_2, %c0_3] : memref<2x4x8x8x128xf32, #tpu.memory_space<vmem>>, vector<2x1x8x8x128xf32>
    %1 = vector.shape_cast %0 : vector<2x1x8x8x128xf32> to vector<2x8x8x128xf32>
    %2 = vector.shape_cast %1 : vector<2x8x8x128xf32> to vector<128x128xf32>
    %c0_4 = arith.constant 0 : index
    %c0_5 = arith.constant 0 : index
    %3 = vector.load %arg3[%c0_4, %c0_5] : memref<128x128xf32, #tpu.memory_space<vmem>>, vector<128x128xf32>
    %cst = arith.constant dense<0.000000e+00> : vector<128x128xf32>
    %4 = tpu.matmul %2, %3, %cst {dimension_numbers = #tpu.dot_dimension_numbers<[1], [0], [0], [1], [0, 0, 1, 1], [], []>} : vector<128x128xf32>, vector<128x128xf32>, vector<128x128xf32> -> vector<128x128xf32>
    %c0_6 = arith.constant 0 : index
    %c1 = arith.constant 1 : index
    %c0_7 = arith.constant 0 : index
    %c0_8 = arith.constant 0 : index
    %c0_9 = arith.constant 0 : index
    %5 = vector.load %arg2[%c0_6, %c1, %c0_7, %c0_8, %c0_9] : memref<2x4x8x8x128xf32, #tpu.memory_space<vmem>>, vector<2x1x8x8x128xf32>
    %6 = vector.shape_cast %5 : vector<2x1x8x8x128xf32> to vector<2x8x8x128xf32>
    %7 = vector.shape_cast %6 : vector<2x8x8x128xf32> to vector<128x128xf32>
    %c0_10 = arith.constant 0 : index
    %c0_11 = arith.constant 0 : index
    %8 = vector.load %arg3[%c0_10, %c0_11] : memref<128x128xf32, #tpu.memory_space<vmem>>, vector<128x128xf32>
    %cst_12 = arith.constant dense<0.000000e+00> : vector<128x128xf32>
    %9 = tpu.matmul %7, %8, %cst_12 {dimension_numbers = #tpu.dot_dimension_numbers<[1], [0], [0], [1], [0, 0, 1, 1], [], []>} : vector<128x128xf32>, vector<128x128xf32>, vector<128x128xf32> -> vector<128x128xf32>
    %10 = arith.maximumf %4, %9 : vector<128x128xf32>
    %c0_13 = arith.constant 0 : index
    %c2 = arith.constant 2 : index
    %c0_14 = arith.constant 0 : index
    %c0_15 = arith.constant 0 : index
    %c0_16 = arith.constant 0 : index
    %11 = vector.load %arg2[%c0_13, %c2, %c0_14, %c0_15, %c0_16] : memref<2x4x8x8x128xf32, #tpu.memory_space<vmem>>, vector<2x1x8x8x128xf32>
    %12 = vector.shape_cast %11 : vector<2x1x8x8x128xf32> to vector<2x8x8x128xf32>
    %13 = vector.shape_cast %12 : vector<2x8x8x128xf32> to vector<128x128xf32>
    %c0_17 = arith.constant 0 : index
    %c0_18 = arith.constant 0 : index
    %14 = vector.load %arg3[%c0_17, %c0_18] : memref<128x128xf32, #tpu.memory_space<vmem>>, vector<128x128xf32>
    %cst_19 = arith.constant dense<0.000000e+00> : vector<128x128xf32>
    %15 = tpu.matmul %13, %14, %cst_19 {dimension_numbers = #tpu.dot_dimension_numbers<[1], [0], [0], [1], [0, 0, 1, 1], [], []>} : vector<128x128xf32>, vector<128x128xf32>, vector<128x128xf32> -> vector<128x128xf32>
    %16 = arith.maximumf %10, %15 : vector<128x128xf32>
    %c0_20 = arith.constant 0 : index
    %c3 = arith.constant 3 : index
    %c0_21 = arith.constant 0 : index
    %c0_22 = arith.constant 0 : index
    %c0_23 = arith.constant 0 : index
    %17 = vector.load %arg2[%c0_20, %c3, %c0_21, %c0_22, %c0_23] : memref<2x4x8x8x128xf32, #tpu.memory_space<vmem>>, vector<2x1x8x8x128xf32>
    %18 = vector.shape_cast %17 : vector<2x1x8x8x128xf32> to vector<2x8x8x128xf32>
    %19 = vector.shape_cast %18 : vector<2x8x8x128xf32> to vector<128x128xf32>
    %c0_24 = arith.constant 0 : index
    %c0_25 = arith.constant 0 : index
    %20 = vector.load %arg3[%c0_24, %c0_25] : memref<128x128xf32, #tpu.memory_space<vmem>>, vector<128x128xf32>
    %cst_26 = arith.constant dense<0.000000e+00> : vector<128x128xf32>
    %21 = tpu.matmul %19, %20, %cst_26 {dimension_numbers = #tpu.dot_dimension_numbers<[1], [0], [0], [1], [0, 0, 1, 1], [], []>} : vector<128x128xf32>, vector<128x128xf32>, vector<128x128xf32> -> vector<128x128xf32>
    %22 = arith.maximumf %16, %21 : vector<128x128xf32>
    %23 = vector.shape_cast %22 : vector<128x128xf32> to vector<2x8x8x128xf32>
    %c0_27 = arith.constant 0 : index
    %c0_28 = arith.constant 0 : index
    %c0_29 = arith.constant 0 : index
    %c0_30 = arith.constant 0 : index
    %24 = vector.load %arg4[%c0_27, %c0_28, %c0_29, %c0_30] : memref<2x8x8x128xf32, #tpu.memory_space<vmem>>, vector<2x8x8x128xf32>
    tpu.vector_store %arg4[%c0_27, %c0_28, %c0_29, %c0_30], %23 {strides = array<i32>} : memref<2x8x8x128xf32, #tpu.memory_space<vmem>>, vector<2x8x8x128xf32>,
    %c0_i32 = arith.constant 0 : i32
    %25 = arith.cmpi eq, %arg1, %c0_i32 : i32
    %26 = arith.extui %25 : i1 to i32
    %c0_i32_31 = arith.constant 0 : i32
    %27 = arith.cmpi ne, %26, %c0_i32_31 : i32
    scf.if %27 {
      %cst_44 = arith.constant 0.000000e+00 : f32
      %42 = vector.broadcast %cst_44 : f32 to vector<8x128xf32>
      %c0_45 = arith.constant 0 : index
      %c0_46 = arith.constant 0 : index
      %43 = vector.load %arg5[%c0_45, %c0_46] : memref<8x128xf32, #tpu.memory_space<vmem>>, vector<8x128xf32>
      tpu.vector_store %arg5[%c0_45, %c0_46], %42 {strides = array<i32>} : memref<8x128xf32, #tpu.memory_space<vmem>>, vector<8x128xf32>,
      %cst_47 = arith.constant dense<0.000000e+00> : vector<128xf32>
      %44 = vector.multi_reduction <add>, %22, %cst_47 [0] : vector<128x128xf32> to vector<128xf32>
      %45 = vector.shape_cast %44 : vector<128xf32> to vector<1x128xf32>
      %cst_48 = arith.constant 7.812500e-03 : f32
      %46 = vector.broadcast %cst_48 : f32 to vector<1x128xf32>
      %47 = arith.mulf %45, %46 : vector<1x128xf32>
      %c2_49 = arith.constant 2 : index
      %c0_50 = arith.constant 0 : index
      %48 = vector.load %arg5[%c2_49, %c0_50] : memref<8x128xf32, #tpu.memory_space<vmem>>, vector<1x128xf32>
      tpu.vector_store %arg5[%c2_49, %c0_50], %47 {strides = array<i32>} : memref<8x128xf32, #tpu.memory_space<vmem>>, vector<1x128xf32>,
    } else {
    }
    %c2_32 = arith.constant 2 : index
    %c0_33 = arith.constant 0 : index
    %28 = vector.load %arg5[%c2_32, %c0_33] : memref<8x128xf32, #tpu.memory_space<vmem>>, vector<1x128xf32>
    %29 = vector.broadcast %28 : vector<1x128xf32> to vector<128x128xf32>
    %30 = arith.subf %22, %29 : vector<128x128xf32>
    %c0_34 = arith.constant 0 : index
    %c0_35 = arith.constant 0 : index
    %31 = vector.load %arg5[%c0_34, %c0_35] : memref<8x128xf32, #tpu.memory_space<vmem>>, vector<1x128xf32>
    %cst_36 = arith.constant dense<0.000000e+00> : vector<128xf32>
    %32 = vector.multi_reduction <add>, %30, %cst_36 [0] : vector<128x128xf32> to vector<128xf32>
    %33 = vector.shape_cast %32 : vector<128xf32> to vector<1x128xf32>
    %34 = arith.addf %31, %33 : vector<1x128xf32>
    %c0_37 = arith.constant 0 : index
    %c0_38 = arith.constant 0 : index
    %35 = vector.load %arg5[%c0_37, %c0_38] : memref<8x128xf32, #tpu.memory_space<vmem>>, vector<1x128xf32>
    tpu.vector_store %arg5[%c0_37, %c0_38], %34 {strides = array<i32>} : memref<8x128xf32, #tpu.memory_space<vmem>>, vector<1x128xf32>,
    %c1_39 = arith.constant 1 : index
    %c0_40 = arith.constant 0 : index
    %36 = vector.load %arg5[%c1_39, %c0_40] : memref<8x128xf32, #tpu.memory_space<vmem>>, vector<1x128xf32>
    %37 = arith.mulf %30, %30 : vector<128x128xf32>
    %cst_41 = arith.constant dense<0.000000e+00> : vector<128xf32>
    %38 = vector.multi_reduction <add>, %37, %cst_41 [0] : vector<128x128xf32> to vector<128xf32>
    %39 = vector.shape_cast %38 : vector<128xf32> to vector<1x128xf32>
    %40 = arith.addf %36, %39 : vector<1x128xf32>
    %c1_42 = arith.constant 1 : index
    %c0_43 = arith.constant 0 : index
    %41 = vector.load %arg5[%c1_42, %c0_43] : memref<8x128xf32, #tpu.memory_space<vmem>>, vector<1x128xf32>
    tpu.vector_store %arg5[%c1_42, %c0_43], %40 {strides = array<i32>} : memref<8x128xf32, #tpu.memory_space<vmem>>, vector<1x128xf32>,
    return
  }
  func.func @transform_0(%arg0: i32, %arg1: i32) -> (i32, i32, i32, i32, i32) {
    %c1_i32 = arith.constant 1 : i32
    %0 = arith.muli %arg0, %c1_i32 : i32
    %1 = arith.addi %0, %arg1 : i32
    %c0_i32 = arith.constant 0 : i32
    %c0_i32_0 = arith.constant 0 : i32
    %c0_i32_1 = arith.constant 0 : i32
    %c0_i32_2 = arith.constant 0 : i32
    %c0_i32_3 = arith.constant 0 : i32
    return %1, %c0_i32, %c0_i32_0, %c0_i32_1, %c0_i32_2 : i32, i32, i32, i32, i32
  }
  func.func @transform_1(%arg0: i32, %arg1: i32) -> (i32, i32) {
    %c0_i32 = arith.constant 0 : i32
    %c0_i32_0 = arith.constant 0 : i32
    %c0_i32_1 = arith.constant 0 : i32
    return %c0_i32, %c0_i32_0 : i32, i32
  }
  func.func @transform_2(%arg0: i32, %arg1: i32) -> (i32, i32, i32, i32) {
    %c1_i32 = arith.constant 1 : i32
    %0 = arith.muli %arg0, %c1_i32 : i32
    %1 = arith.addi %0, %arg1 : i32
    %c0_i32 = arith.constant 0 : i32
    %c0_i32_0 = arith.constant 0 : i32
    %c0_i32_1 = arith.constant 0 : i32
    %c0_i32_2 = arith.constant 0 : i32
    return %1, %c0_i32, %c0_i32_0, %c0_i32_1 : i32, i32, i32, i32
  }
  func.func @transform_3(%arg0: i32, %arg1: i32) -> (i32, i32) {
    %c0_i32 = arith.constant 0 : i32
    %c0_i32_0 = arith.constant 0 : i32
    return %arg0, %c0_i32 : i32, i32
  }
}

module attributes {stable_mosaic.version = 11 : i64} {
  func.func @_bn1_gelu_conv2_kernel(%arg0: i32, %arg1: i32, %arg2: memref<2x8x8x128xf32, #tpu.memory_space<vmem>>, %arg3: memref<2x128xf32, #tpu.memory_space<vmem>>, %arg4: memref<1152x128xf32, #tpu.memory_space<vmem>>, %arg5: memref<2x8x8x128xf32, #tpu.memory_space<vmem>>, %arg6: memref<8x128xf32, #tpu.memory_space<vmem>>, %arg7: memref<2x10x10x128xf32, #tpu.memory_space<vmem>>, %arg8: memref<128x1152xf32, #tpu.memory_space<vmem>>) attributes {dimension_semantics = [#tpu.dimension_semantics<parallel>, #tpu.dimension_semantics<arbitrary>], iteration_bounds = array<i64: 1, 1>, scalar_prefetch = 0 : i64, scratch_operands = 2 : i64, tpu.core_type = #tpu.core_type<tc>, window_params = [{transform_indices = @transform_0, window_bounds = array<i64: 2, 8, 8, 128>}, {pipeline_mode = #tpu.pipeline_mode<synchronous>, transform_indices = @transform_1, window_bounds = array<i64: 2, 128>}, {pipeline_mode = #tpu.pipeline_mode<synchronous>, transform_indices = @transform_2, window_bounds = array<i64: 1152, 128>}, {transform_indices = @transform_3, window_bounds = array<i64: 2, 8, 8, 128>}, {transform_indices = @transform_4, window_bounds = array<i64: 8, 128>}]} {
    %c0_i32 = arith.constant 0 : i32
    %0 = arith.cmpi eq, %arg1, %c0_i32 : i32
    %1 = arith.extui %0 : i1 to i32
    %c0_i32_0 = arith.constant 0 : i32
    %2 = arith.cmpi ne, %1, %c0_i32_0 : i32
    scf.if %2 {
      %cst_92 = arith.constant 0.000000e+00 : f32
      %101 = vector.broadcast %cst_92 : f32 to vector<2x10x10x128xf32>
      %c0_93 = arith.constant 0 : index
      %c0_94 = arith.constant 0 : index
      %c0_95 = arith.constant 0 : index
      %c0_96 = arith.constant 0 : index
      %102 = vector.load %arg7[%c0_93, %c0_94, %c0_95, %c0_96] : memref<2x10x10x128xf32, #tpu.memory_space<vmem>>, vector<2x10x10x128xf32>
      tpu.vector_store %arg7[%c0_93, %c0_94, %c0_95, %c0_96], %101 {strides = array<i32>} : memref<2x10x10x128xf32, #tpu.memory_space<vmem>>, vector<2x10x10x128xf32>,
    } else {
    }
    %c0 = arith.constant 0 : index
    %c0_1 = arith.constant 0 : index
    %3 = vector.load %arg3[%c0, %c0_1] : memref<2x128xf32, #tpu.memory_space<vmem>>, vector<1x128xf32>
    %4 = vector.shape_cast %3 : vector<1x128xf32> to vector<1x1x1x128xf32>
    %c1 = arith.constant 1 : index
    %c0_2 = arith.constant 0 : index
    %5 = vector.load %arg3[%c1, %c0_2] : memref<2x128xf32, #tpu.memory_space<vmem>>, vector<1x128xf32>
    %6 = vector.shape_cast %5 : vector<1x128xf32> to vector<1x1x1x128xf32>
    %c0_3 = arith.constant 0 : index
    %c0_4 = arith.constant 0 : index
    %c0_5 = arith.constant 0 : index
    %c0_6 = arith.constant 0 : index
    %7 = vector.load %arg2[%c0_3, %c0_4, %c0_5, %c0_6] : memref<2x8x8x128xf32, #tpu.memory_space<vmem>>, vector<2x8x8x128xf32>
    %8 = vector.broadcast %4 : vector<1x1x1x128xf32> to vector<2x8x8x128xf32>
    %9 = arith.mulf %7, %8 : vector<2x8x8x128xf32>
    %10 = vector.broadcast %6 : vector<1x1x1x128xf32> to vector<2x8x8x128xf32>
    %11 = arith.addf %9, %10 : vector<2x8x8x128xf32>
    %cst = arith.constant 5.000000e-01 : f32
    %12 = vector.broadcast %cst : f32 to vector<2x8x8x128xf32>
    %13 = arith.mulf %12, %11 : vector<2x8x8x128xf32>
    %cst_7 = arith.constant 0.707106769 : f32
    %14 = vector.broadcast %cst_7 : f32 to vector<2x8x8x128xf32>
    %15 = arith.mulf %11, %14 : vector<2x8x8x128xf32>
    %16 = math.absf %15 : vector<2x8x8x128xf32>
    %cst_8 = arith.constant 0.327591091 : f32
    %17 = vector.broadcast %cst_8 : f32 to vector<2x8x8x128xf32>
    %18 = arith.mulf %17, %16 : vector<2x8x8x128xf32>
    %cst_9 = arith.constant 1.000000e+00 : f32
    %19 = vector.broadcast %cst_9 : f32 to vector<2x8x8x128xf32>
    %20 = arith.addf %19, %18 : vector<2x8x8x128xf32>
    %cst_10 = arith.constant 1.000000e+00 : f32
    %21 = vector.broadcast %cst_10 : f32 to vector<2x8x8x128xf32>
    %22 = arith.divf %21, %20 : vector<2x8x8x128xf32>
    %cst_11 = arith.constant 1.06140542 : f32
    %23 = vector.broadcast %cst_11 : f32 to vector<2x8x8x128xf32>
    %24 = arith.mulf %23, %22 : vector<2x8x8x128xf32>
    %cst_12 = arith.constant -1.45315206 : f32
    %25 = vector.broadcast %cst_12 : f32 to vector<2x8x8x128xf32>
    %26 = arith.addf %24, %25 : vector<2x8x8x128xf32>
    %27 = arith.mulf %26, %22 : vector<2x8x8x128xf32>
    %cst_13 = arith.constant 1.42141378 : f32
    %28 = vector.broadcast %cst_13 : f32 to vector<2x8x8x128xf32>
    %29 = arith.addf %27, %28 : vector<2x8x8x128xf32>
    %30 = arith.mulf %29, %22 : vector<2x8x8x128xf32>
    %cst_14 = arith.constant -0.284496725 : f32
    %31 = vector.broadcast %cst_14 : f32 to vector<2x8x8x128xf32>
    %32 = arith.addf %30, %31 : vector<2x8x8x128xf32>
    %33 = arith.mulf %32, %22 : vector<2x8x8x128xf32>
    %cst_15 = arith.constant 0.254829586 : f32
    %34 = vector.broadcast %cst_15 : f32 to vector<2x8x8x128xf32>
    %35 = arith.addf %33, %34 : vector<2x8x8x128xf32>
    %36 = arith.mulf %35, %22 : vector<2x8x8x128xf32>
    %cst_16 = arith.constant 0.000000e+00 : f32
    %37 = vector.broadcast %cst_16 : f32 to vector<2x8x8x128xf32>
    %38 = arith.subf %37, %16 : vector<2x8x8x128xf32>
    %39 = arith.mulf %38, %16 : vector<2x8x8x128xf32>
    %40 = math.exp %39 : vector<2x8x8x128xf32>
    %41 = arith.mulf %36, %40 : vector<2x8x8x128xf32>
    %cst_17 = arith.constant 1.000000e+00 : f32
    %42 = vector.broadcast %cst_17 : f32 to vector<2x8x8x128xf32>
    %43 = arith.subf %42, %41 : vector<2x8x8x128xf32>
    %cst_18 = arith.constant 0.000000e+00 : f32
    %44 = vector.broadcast %cst_18 : f32 to vector<2x8x8x128xf32>
    %45 = arith.cmpf oge, %15, %44 : vector<2x8x8x128xf32>
    %cst_19 = arith.constant 0.000000e+00 : f32
    %46 = vector.broadcast %cst_19 : f32 to vector<2x8x8x128xf32>
    %47 = arith.subf %46, %43 : vector<2x8x8x128xf32>
    %48 = arith.select %45, %43, %47 : vector<2x8x8x128xi1>, vector<2x8x8x128xf32>
    %cst_20 = arith.constant 1.000000e+00 : f32
    %49 = vector.broadcast %cst_20 : f32 to vector<2x8x8x128xf32>
    %50 = arith.addf %49, %48 : vector<2x8x8x128xf32>
    %51 = arith.mulf %13, %50 : vector<2x8x8x128xf32>
    %c0_21 = arith.constant 0 : index
    %c1_22 = arith.constant 1 : index
    %c1_23 = arith.constant 1 : index
    %c0_24 = arith.constant 0 : index
    %52 = vector.load %arg7[%c0_21, %c1_22, %c1_23, %c0_24] : memref<2x10x10x128xf32, #tpu.memory_space<vmem>>, vector<2x8x8x128xf32>
    tpu.vector_store %arg7[%c0_21, %c1_22, %c1_23, %c0_24], %51 {strides = array<i32>} : memref<2x10x10x128xf32, #tpu.memory_space<vmem>>, vector<2x8x8x128xf32>,
    %c0_25 = arith.constant 0 : index
    %c0_26 = arith.constant 0 : index
    %c0_27 = arith.constant 0 : index
    %c0_28 = arith.constant 0 : index
    %53 = vector.load %arg7[%c0_25, %c0_26, %c0_27, %c0_28] : memref<2x10x10x128xf32, #tpu.memory_space<vmem>>, vector<2x8x8x128xf32>
    %54 = vector.shape_cast %53 : vector<2x8x8x128xf32> to vector<128x128xf32>
    %c0_29 = arith.constant 0 : index
    %c0_30 = arith.constant 0 : index
    %55 = vector.load %arg8[%c0_29, %c0_30] : memref<128x1152xf32, #tpu.memory_space<vmem>>, vector<128x128xf32>
    tpu.vector_store %arg8[%c0_29, %c0_30], %54 {strides = array<i32>} : memref<128x1152xf32, #tpu.memory_space<vmem>>, vector<128x128xf32>,
    %c0_31 = arith.constant 0 : index
    %c0_32 = arith.constant 0 : index
    %c1_33 = arith.constant 1 : index
    %c0_34 = arith.constant 0 : index
    %56 = vector.load %arg7[%c0_31, %c0_32, %c1_33, %c0_34] : memref<2x10x10x128xf32, #tpu.memory_space<vmem>>, vector<2x8x8x128xf32>
    %57 = vector.shape_cast %56 : vector<2x8x8x128xf32> to vector<128x128xf32>
    %c0_35 = arith.constant 0 : index
    %c128 = arith.constant 128 : index
    %58 = vector.load %arg8[%c0_35, %c128] : memref<128x1152xf32, #tpu.memory_space<vmem>>, vector<128x128xf32>
    tpu.vector_store %arg8[%c0_35, %c128], %57 {strides = array<i32>} : memref<128x1152xf32, #tpu.memory_space<vmem>>, vector<128x128xf32>,
    %c0_36 = arith.constant 0 : index
    %c0_37 = arith.constant 0 : index
    %c2 = arith.constant 2 : index
    %c0_38 = arith.constant 0 : index
    %59 = vector.load %arg7[%c0_36, %c0_37, %c2, %c0_38] : memref<2x10x10x128xf32, #tpu.memory_space<vmem>>, vector<2x8x8x128xf32>
    %60 = vector.shape_cast %59 : vector<2x8x8x128xf32> to vector<128x128xf32>
    %c0_39 = arith.constant 0 : index
    %c256 = arith.constant 256 : index
    %61 = vector.load %arg8[%c0_39, %c256] : memref<128x1152xf32, #tpu.memory_space<vmem>>, vector<128x128xf32>
    tpu.vector_store %arg8[%c0_39, %c256], %60 {strides = array<i32>} : memref<128x1152xf32, #tpu.memory_space<vmem>>, vector<128x128xf32>,
    %c0_40 = arith.constant 0 : index
    %c1_41 = arith.constant 1 : index
    %c0_42 = arith.constant 0 : index
    %c0_43 = arith.constant 0 : index
    %62 = vector.load %arg7[%c0_40, %c1_41, %c0_42, %c0_43] : memref<2x10x10x128xf32, #tpu.memory_space<vmem>>, vector<2x8x8x128xf32>
    %63 = vector.shape_cast %62 : vector<2x8x8x128xf32> to vector<128x128xf32>
    %c0_44 = arith.constant 0 : index
    %c384 = arith.constant 384 : index
    %64 = vector.load %arg8[%c0_44, %c384] : memref<128x1152xf32, #tpu.memory_space<vmem>>, vector<128x128xf32>
    tpu.vector_store %arg8[%c0_44, %c384], %63 {strides = array<i32>} : memref<128x1152xf32, #tpu.memory_space<vmem>>, vector<128x128xf32>,
    %c0_45 = arith.constant 0 : index
    %c1_46 = arith.constant 1 : index
    %c1_47 = arith.constant 1 : index
    %c0_48 = arith.constant 0 : index
    %65 = vector.load %arg7[%c0_45, %c1_46, %c1_47, %c0_48] : memref<2x10x10x128xf32, #tpu.memory_space<vmem>>, vector<2x8x8x128xf32>
    %66 = vector.shape_cast %65 : vector<2x8x8x128xf32> to vector<128x128xf32>
    %c0_49 = arith.constant 0 : index
    %c512 = arith.constant 512 : index
    %67 = vector.load %arg8[%c0_49, %c512] : memref<128x1152xf32, #tpu.memory_space<vmem>>, vector<128x128xf32>
    tpu.vector_store %arg8[%c0_49, %c512], %66 {strides = array<i32>} : memref<128x1152xf32, #tpu.memory_space<vmem>>, vector<128x128xf32>,
    %c0_50 = arith.constant 0 : index
    %c1_51 = arith.constant 1 : index
    %c2_52 = arith.constant 2 : index
    %c0_53 = arith.constant 0 : index
    %68 = vector.load %arg7[%c0_50, %c1_51, %c2_52, %c0_53] : memref<2x10x10x128xf32, #tpu.memory_space<vmem>>, vector<2x8x8x128xf32>
    %69 = vector.shape_cast %68 : vector<2x8x8x128xf32> to vector<128x128xf32>
    %c0_54 = arith.constant 0 : index
    %c640 = arith.constant 640 : index
    %70 = vector.load %arg8[%c0_54, %c640] : memref<128x1152xf32, #tpu.memory_space<vmem>>, vector<128x128xf32>
    tpu.vector_store %arg8[%c0_54, %c640], %69 {strides = array<i32>} : memref<128x1152xf32, #tpu.memory_space<vmem>>, vector<128x128xf32>,
    %c0_55 = arith.constant 0 : index
    %c2_56 = arith.constant 2 : index
    %c0_57 = arith.constant 0 : index
    %c0_58 = arith.constant 0 : index
    %71 = vector.load %arg7[%c0_55, %c2_56, %c0_57, %c0_58] : memref<2x10x10x128xf32, #tpu.memory_space<vmem>>, vector<2x8x8x128xf32>
    %72 = vector.shape_cast %71 : vector<2x8x8x128xf32> to vector<128x128xf32>
    %c0_59 = arith.constant 0 : index
    %c768 = arith.constant 768 : index
    %73 = vector.load %arg8[%c0_59, %c768] : memref<128x1152xf32, #tpu.memory_space<vmem>>, vector<128x128xf32>
    tpu.vector_store %arg8[%c0_59, %c768], %72 {strides = array<i32>} : memref<128x1152xf32, #tpu.memory_space<vmem>>, vector<128x128xf32>,
    %c0_60 = arith.constant 0 : index
    %c2_61 = arith.constant 2 : index
    %c1_62 = arith.constant 1 : index
    %c0_63 = arith.constant 0 : index
    %74 = vector.load %arg7[%c0_60, %c2_61, %c1_62, %c0_63] : memref<2x10x10x128xf32, #tpu.memory_space<vmem>>, vector<2x8x8x128xf32>
    %75 = vector.shape_cast %74 : vector<2x8x8x128xf32> to vector<128x128xf32>
    %c0_64 = arith.constant 0 : index
    %c896 = arith.constant 896 : index
    %76 = vector.load %arg8[%c0_64, %c896] : memref<128x1152xf32, #tpu.memory_space<vmem>>, vector<128x128xf32>
    tpu.vector_store %arg8[%c0_64, %c896], %75 {strides = array<i32>} : memref<128x1152xf32, #tpu.memory_space<vmem>>, vector<128x128xf32>,
    %c0_65 = arith.constant 0 : index
    %c2_66 = arith.constant 2 : index
    %c2_67 = arith.constant 2 : index
    %c0_68 = arith.constant 0 : index
    %77 = vector.load %arg7[%c0_65, %c2_66, %c2_67, %c0_68] : memref<2x10x10x128xf32, #tpu.memory_space<vmem>>, vector<2x8x8x128xf32>
    %78 = vector.shape_cast %77 : vector<2x8x8x128xf32> to vector<128x128xf32>
    %c0_69 = arith.constant 0 : index
    %c1024 = arith.constant 1024 : index
    %79 = vector.load %arg8[%c0_69, %c1024] : memref<128x1152xf32, #tpu.memory_space<vmem>>, vector<128x128xf32>
    tpu.vector_store %arg8[%c0_69, %c1024], %78 {strides = array<i32>} : memref<128x1152xf32, #tpu.memory_space<vmem>>, vector<128x128xf32>,
    %c0_70 = arith.constant 0 : index
    %c0_71 = arith.constant 0 : index
    %80 = vector.load %arg8[%c0_70, %c0_71] : memref<128x1152xf32, #tpu.memory_space<vmem>>, vector<128x1152xf32>
    %c0_72 = arith.constant 0 : index
    %c0_73 = arith.constant 0 : index
    %81 = vector.load %arg4[%c0_72, %c0_73] : memref<1152x128xf32, #tpu.memory_space<vmem>>, vector<1152x128xf32>
    %cst_74 = arith.constant dense<0.000000e+00> : vector<128x128xf32>
    %82 = tpu.matmul %80, %81, %cst_74 {dimension_numbers = #tpu.dot_dimension_numbers<[1], [0], [0], [1], [0, 0, 1, 1], [], []>} : vector<128x1152xf32>, vector<1152x128xf32>, vector<128x128xf32> -> vector<128x128xf32>
    %83 = vector.shape_cast %82 : vector<128x128xf32> to vector<2x8x8x128xf32>
    %c0_75 = arith.constant 0 : index
    %c0_76 = arith.constant 0 : index
    %c0_77 = arith.constant 0 : index
    %c0_78 = arith.constant 0 : index
    %84 = vector.load %arg5[%c0_75, %c0_76, %c0_77, %c0_78] : memref<2x8x8x128xf32, #tpu.memory_space<vmem>>, vector<2x8x8x128xf32>
    tpu.vector_store %arg5[%c0_75, %c0_76, %c0_77, %c0_78], %83 {strides = array<i32>} : memref<2x8x8x128xf32, #tpu.memory_space<vmem>>, vector<2x8x8x128xf32>,
    %85 = arith.extui %0 : i1 to i32
    %c0_i32_79 = arith.constant 0 : i32
    %86 = arith.cmpi ne, %85, %c0_i32_79 : i32
    scf.if %86 {
      %cst_92 = arith.constant 0.000000e+00 : f32
      %101 = vector.broadcast %cst_92 : f32 to vector<8x128xf32>
      %c0_93 = arith.constant 0 : index
      %c0_94 = arith.constant 0 : index
      %102 = vector.load %arg6[%c0_93, %c0_94] : memref<8x128xf32, #tpu.memory_space<vmem>>, vector<8x128xf32>
      tpu.vector_store %arg6[%c0_93, %c0_94], %101 {strides = array<i32>} : memref<8x128xf32, #tpu.memory_space<vmem>>, vector<8x128xf32>,
      %cst_95 = arith.constant dense<0.000000e+00> : vector<128xf32>
      %103 = vector.multi_reduction <add>, %82, %cst_95 [0] : vector<128x128xf32> to vector<128xf32>
      %104 = vector.shape_cast %103 : vector<128xf32> to vector<1x128xf32>
      %cst_96 = arith.constant 7.812500e-03 : f32
      %105 = vector.broadcast %cst_96 : f32 to vector<1x128xf32>
      %106 = arith.mulf %104, %105 : vector<1x128xf32>
      %c2_97 = arith.constant 2 : index
      %c0_98 = arith.constant 0 : index
      %107 = vector.load %arg6[%c2_97, %c0_98] : memref<8x128xf32, #tpu.memory_space<vmem>>, vector<1x128xf32>
      tpu.vector_store %arg6[%c2_97, %c0_98], %106 {strides = array<i32>} : memref<8x128xf32, #tpu.memory_space<vmem>>, vector<1x128xf32>,
    } else {
    }
    %c2_80 = arith.constant 2 : index
    %c0_81 = arith.constant 0 : index
    %87 = vector.load %arg6[%c2_80, %c0_81] : memref<8x128xf32, #tpu.memory_space<vmem>>, vector<1x128xf32>
    %88 = vector.broadcast %87 : vector<1x128xf32> to vector<128x128xf32>
    %89 = arith.subf %82, %88 : vector<128x128xf32>
    %c0_82 = arith.constant 0 : index
    %c0_83 = arith.constant 0 : index
    %90 = vector.load %arg6[%c0_82, %c0_83] : memref<8x128xf32, #tpu.memory_space<vmem>>, vector<1x128xf32>
    %cst_84 = arith.constant dense<0.000000e+00> : vector<128xf32>
    %91 = vector.multi_reduction <add>, %89, %cst_84 [0] : vector<128x128xf32> to vector<128xf32>
    %92 = vector.shape_cast %91 : vector<128xf32> to vector<1x128xf32>
    %93 = arith.addf %90, %92 : vector<1x128xf32>
    %c0_85 = arith.constant 0 : index
    %c0_86 = arith.constant 0 : index
    %94 = vector.load %arg6[%c0_85, %c0_86] : memref<8x128xf32, #tpu.memory_space<vmem>>, vector<1x128xf32>
    tpu.vector_store %arg6[%c0_85, %c0_86], %93 {strides = array<i32>} : memref<8x128xf32, #tpu.memory_space<vmem>>, vector<1x128xf32>,
    %c1_87 = arith.constant 1 : index
    %c0_88 = arith.constant 0 : index
    %95 = vector.load %arg6[%c1_87, %c0_88] : memref<8x128xf32, #tpu.memory_space<vmem>>, vector<1x128xf32>
    %96 = arith.mulf %89, %89 : vector<128x128xf32>
    %cst_89 = arith.constant dense<0.000000e+00> : vector<128xf32>
    %97 = vector.multi_reduction <add>, %96, %cst_89 [0] : vector<128x128xf32> to vector<128xf32>
    %98 = vector.shape_cast %97 : vector<128xf32> to vector<1x128xf32>
    %99 = arith.addf %95, %98 : vector<1x128xf32>
    %c1_90 = arith.constant 1 : index
    %c0_91 = arith.constant 0 : index
    %100 = vector.load %arg6[%c1_90, %c0_91] : memref<8x128xf32, #tpu.memory_space<vmem>>, vector<1x128xf32>
    tpu.vector_store %arg6[%c1_90, %c0_91], %99 {strides = array<i32>} : memref<8x128xf32, #tpu.memory_space<vmem>>, vector<1x128xf32>,
    return
  }
  func.func @transform_0(%arg0: i32, %arg1: i32) -> (i32, i32, i32, i32) {
    %c1_i32 = arith.constant 1 : i32
    %0 = arith.muli %arg0, %c1_i32 : i32
    %1 = arith.addi %0, %arg1 : i32
    %c0_i32 = arith.constant 0 : i32
    %c0_i32_0 = arith.constant 0 : i32
    %c0_i32_1 = arith.constant 0 : i32
    %c0_i32_2 = arith.constant 0 : i32
    return %1, %c0_i32, %c0_i32_0, %c0_i32_1 : i32, i32, i32, i32
  }
  func.func @transform_1(%arg0: i32, %arg1: i32) -> (i32, i32) {
    %c0_i32 = arith.constant 0 : i32
    %c0_i32_0 = arith.constant 0 : i32
    %c0_i32_1 = arith.constant 0 : i32
    return %c0_i32, %c0_i32_0 : i32, i32
  }
  func.func @transform_2(%arg0: i32, %arg1: i32) -> (i32, i32) {
    %c0_i32 = arith.constant 0 : i32
    %c0_i32_0 = arith.constant 0 : i32
    %c0_i32_1 = arith.constant 0 : i32
    return %c0_i32, %c0_i32_0 : i32, i32
  }
  func.func @transform_3(%arg0: i32, %arg1: i32) -> (i32, i32, i32, i32) {
    %c1_i32 = arith.constant 1 : i32
    %0 = arith.muli %arg0, %c1_i32 : i32
    %1 = arith.addi %0, %arg1 : i32
    %c0_i32 = arith.constant 0 : i32
    %c0_i32_0 = arith.constant 0 : i32
    %c0_i32_1 = arith.constant 0 : i32
    %c0_i32_2 = arith.constant 0 : i32
    return %1, %c0_i32, %c0_i32_0, %c0_i32_1 : i32, i32, i32, i32
  }
  func.func @transform_4(%arg0: i32, %arg1: i32) -> (i32, i32) {
    %c0_i32 = arith.constant 0 : i32
    %c0_i32_0 = arith.constant 0 : i32
    return %arg0, %c0_i32 : i32, i32
  }
}

module attributes {stable_mosaic.version = 11 : i64} {
  func.func @_bn2_gelu_kernel(%arg0: i32, %arg1: memref<2x8x8x128xf32, #tpu.memory_space<vmem>>, %arg2: memref<2x128xf32, #tpu.memory_space<vmem>>, %arg3: memref<2x8x8x128xf32, #tpu.memory_space<vmem>>) attributes {dimension_semantics = [#tpu.dimension_semantics<parallel>], iteration_bounds = array<i64: 1>, scalar_prefetch = 0 : i64, scratch_operands = 0 : i64, tpu.core_type = #tpu.core_type<tc>, window_params = [{transform_indices = @transform_0, window_bounds = array<i64: 2, 8, 8, 128>}, {pipeline_mode = #tpu.pipeline_mode<synchronous>, transform_indices = @transform_1, window_bounds = array<i64: 2, 128>}, {transform_indices = @transform_2, window_bounds = array<i64: 2, 8, 8, 128>}]} {
    %c0 = arith.constant 0 : index
    %c0_0 = arith.constant 0 : index
    %0 = vector.load %arg2[%c0, %c0_0] : memref<2x128xf32, #tpu.memory_space<vmem>>, vector<1x128xf32>
    %1 = vector.shape_cast %0 : vector<1x128xf32> to vector<1x1x1x128xf32>
    %c1 = arith.constant 1 : index
    %c0_1 = arith.constant 0 : index
    %2 = vector.load %arg2[%c1, %c0_1] : memref<2x128xf32, #tpu.memory_space<vmem>>, vector<1x128xf32>
    %3 = vector.shape_cast %2 : vector<1x128xf32> to vector<1x1x1x128xf32>
    %c0_2 = arith.constant 0 : index
    %c0_3 = arith.constant 0 : index
    %c0_4 = arith.constant 0 : index
    %c0_5 = arith.constant 0 : index
    %4 = vector.load %arg1[%c0_2, %c0_3, %c0_4, %c0_5] : memref<2x8x8x128xf32, #tpu.memory_space<vmem>>, vector<2x8x8x128xf32>
    %5 = vector.broadcast %1 : vector<1x1x1x128xf32> to vector<2x8x8x128xf32>
    %6 = arith.mulf %4, %5 : vector<2x8x8x128xf32>
    %7 = vector.broadcast %3 : vector<1x1x1x128xf32> to vector<2x8x8x128xf32>
    %8 = arith.addf %6, %7 : vector<2x8x8x128xf32>
    %cst = arith.constant 5.000000e-01 : f32
    %9 = vector.broadcast %cst : f32 to vector<2x8x8x128xf32>
    %10 = arith.mulf %9, %8 : vector<2x8x8x128xf32>
    %cst_6 = arith.constant 0.707106769 : f32
    %11 = vector.broadcast %cst_6 : f32 to vector<2x8x8x128xf32>
    %12 = arith.mulf %8, %11 : vector<2x8x8x128xf32>
    %13 = math.absf %12 : vector<2x8x8x128xf32>
    %cst_7 = arith.constant 0.327591091 : f32
    %14 = vector.broadcast %cst_7 : f32 to vector<2x8x8x128xf32>
    %15 = arith.mulf %14, %13 : vector<2x8x8x128xf32>
    %cst_8 = arith.constant 1.000000e+00 : f32
    %16 = vector.broadcast %cst_8 : f32 to vector<2x8x8x128xf32>
    %17 = arith.addf %16, %15 : vector<2x8x8x128xf32>
    %cst_9 = arith.constant 1.000000e+00 : f32
    %18 = vector.broadcast %cst_9 : f32 to vector<2x8x8x128xf32>
    %19 = arith.divf %18, %17 : vector<2x8x8x128xf32>
    %cst_10 = arith.constant 1.06140542 : f32
    %20 = vector.broadcast %cst_10 : f32 to vector<2x8x8x128xf32>
    %21 = arith.mulf %20, %19 : vector<2x8x8x128xf32>
    %cst_11 = arith.constant -1.45315206 : f32
    %22 = vector.broadcast %cst_11 : f32 to vector<2x8x8x128xf32>
    %23 = arith.addf %21, %22 : vector<2x8x8x128xf32>
    %24 = arith.mulf %23, %19 : vector<2x8x8x128xf32>
    %cst_12 = arith.constant 1.42141378 : f32
    %25 = vector.broadcast %cst_12 : f32 to vector<2x8x8x128xf32>
    %26 = arith.addf %24, %25 : vector<2x8x8x128xf32>
    %27 = arith.mulf %26, %19 : vector<2x8x8x128xf32>
    %cst_13 = arith.constant -0.284496725 : f32
    %28 = vector.broadcast %cst_13 : f32 to vector<2x8x8x128xf32>
    %29 = arith.addf %27, %28 : vector<2x8x8x128xf32>
    %30 = arith.mulf %29, %19 : vector<2x8x8x128xf32>
    %cst_14 = arith.constant 0.254829586 : f32
    %31 = vector.broadcast %cst_14 : f32 to vector<2x8x8x128xf32>
    %32 = arith.addf %30, %31 : vector<2x8x8x128xf32>
    %33 = arith.mulf %32, %19 : vector<2x8x8x128xf32>
    %cst_15 = arith.constant 0.000000e+00 : f32
    %34 = vector.broadcast %cst_15 : f32 to vector<2x8x8x128xf32>
    %35 = arith.subf %34, %13 : vector<2x8x8x128xf32>
    %36 = arith.mulf %35, %13 : vector<2x8x8x128xf32>
    %37 = math.exp %36 : vector<2x8x8x128xf32>
    %38 = arith.mulf %33, %37 : vector<2x8x8x128xf32>
    %cst_16 = arith.constant 1.000000e+00 : f32
    %39 = vector.broadcast %cst_16 : f32 to vector<2x8x8x128xf32>
    %40 = arith.subf %39, %38 : vector<2x8x8x128xf32>
    %cst_17 = arith.constant 0.000000e+00 : f32
    %41 = vector.broadcast %cst_17 : f32 to vector<2x8x8x128xf32>
    %42 = arith.cmpf oge, %12, %41 : vector<2x8x8x128xf32>
    %cst_18 = arith.constant 0.000000e+00 : f32
    %43 = vector.broadcast %cst_18 : f32 to vector<2x8x8x128xf32>
    %44 = arith.subf %43, %40 : vector<2x8x8x128xf32>
    %45 = arith.select %42, %40, %44 : vector<2x8x8x128xi1>, vector<2x8x8x128xf32>
    %cst_19 = arith.constant 1.000000e+00 : f32
    %46 = vector.broadcast %cst_19 : f32 to vector<2x8x8x128xf32>
    %47 = arith.addf %46, %45 : vector<2x8x8x128xf32>
    %48 = arith.mulf %10, %47 : vector<2x8x8x128xf32>
    %c0_20 = arith.constant 0 : index
    %c0_21 = arith.constant 0 : index
    %c0_22 = arith.constant 0 : index
    %c0_23 = arith.constant 0 : index
    %49 = vector.load %arg3[%c0_20, %c0_21, %c0_22, %c0_23] : memref<2x8x8x128xf32, #tpu.memory_space<vmem>>, vector<2x8x8x128xf32>
    tpu.vector_store %arg3[%c0_20, %c0_21, %c0_22, %c0_23], %48 {strides = array<i32>} : memref<2x8x8x128xf32, #tpu.memory_space<vmem>>, vector<2x8x8x128xf32>,
    return
  }
  func.func @transform_0(%arg0: i32) -> (i32, i32, i32, i32) {
    %c0_i32 = arith.constant 0 : i32
    %c0_i32_0 = arith.constant 0 : i32
    %c0_i32_1 = arith.constant 0 : i32
    %c0_i32_2 = arith.constant 0 : i32
    return %arg0, %c0_i32, %c0_i32_0, %c0_i32_1 : i32, i32, i32, i32
  }
  func.func @transform_1(%arg0: i32) -> (i32, i32) {
    %c0_i32 = arith.constant 0 : i32
    %c0_i32_0 = arith.constant 0 : i32
    %c0_i32_1 = arith.constant 0 : i32
    return %c0_i32, %c0_i32_0 : i32, i32
  }
  func.func @transform_2(%arg0: i32) -> (i32, i32, i32, i32) {
    %c0_i32 = arith.constant 0 : i32
    %c0_i32_0 = arith.constant 0 : i32
    %c0_i32_1 = arith.constant 0 : i32
    %c0_i32_2 = arith.constant 0 : i32
    return %arg0, %c0_i32, %c0_i32_0, %c0_i32_1 : i32, i32, i32, i32
  }
}

</mosaic_0001>

<bundles_post_ra>
// kernel: conv_group_forward.5
= control target key start
LH: loop header
LB: loop body
LE: loop exit
PB: predicated region body
PF: predicated region fallthrough
CT: control target
= control target key end

     0   :  { %s1018_s0 = inlined_call_operand.vmem [shape: f32[2,8,8,128], index: 0, kind: input, shape index: {}]   ;;  %s1019_s1 = inlined_call_operand.vmem [shape: f32[2,128], index: 1, kind: input, shape index: {}]   ;;  %s1020_s2 = inlined_call_operand.vmem [shape: f32[2,8,8,128], index: 2, kind: output, shape index: {}]  }
   0x1   :  { %v605_v0 = vld [vmem:[%s1019_s1] ss:$0 sm:$0xff]  ;;  %v610_v1 = vld [vmem:[%s1019_s1 + $0x1] ss:$0 sm:$0xff]  ;;  %v14_v4 = vld [vmem:[%s1018_s0 + $0x8] sm:$0xff] }
   0x2   :  { %v13_v2 = vld [vmem:[%s1018_s0] sm:$0xff]  ;;  %v15_v5 = vld [vmem:[%s1018_s0 + $0x10] sm:$0xff]  ;;  %v16_v6 = vld [vmem:[%s1018_s0 + $0x18] sm:$0xff]  ;;  %v34_v7 = vmul.f32 %v605_v0, %v14_v4 }
   0x3   :  { %v33_v3 = vmul.f32 %v605_v0, %v13_v2  ;;  %v35_v8 = vmul.f32 %v605_v0, %v15_v5  ;;  %v36_v9 = vmul.f32 %v605_v0, %v16_v6  ;;  %v17_v14 = vld [vmem:[%s1018_s0 + $0x20] sm:$0xff]  ;;  %v18_v16 = vld [vmem:[%s1018_s0 + $0x28] sm:$0xff]  ;;  %v19_v19 = vld [vmem:[%s1018_s0 + $0x30] sm:$0xff] }
   0x4   :  { %v54_v11 = vadd.f32 %v610_v1, %v34_v7  ;;  %v37_v22 = vmul.f32 %v605_v0, %v17_v14  ;;  %v38_v25 = vmul.f32 %v605_v0, %v18_v16  ;;  %v39_v29 = vmul.f32 %v605_v0, %v19_v19  ;;  %v20_v38 = vld [vmem:[%s1018_s0 + $0x38] sm:$0xff]  ;;  %v21_v50 = vld [vmem:[%s1018_s0 + $0x40] sm:$0xff] }
   0x5   :  { %v53_v10 = vadd.f32 %v610_v1, %v33_v3  ;;  %v631_v12 = vadd.f32 %v610_v1, %v35_v8  ;;  %v634_v13 = vadd.f32 %v610_v1, %v36_v9  ;;  %v40_v46 = vmul.f32 %v605_v0, %v20_v38 }
   0x6   :  { %v644_v17 = vmul.f32 0.70710677, %v54_v11  ;;  %v663_v37 = vadd.f32 %v610_v1, %v37_v22  ;;  %v669_v42 = vadd.f32 %v610_v1, %v38_v25  ;;  %v684_v54 = vadd.f32 %v610_v1, %v39_v29 }
   0x7   :  { %v639_v15 = vmul.f32 0.70710677, %v53_v10  ;;  %v647_v18 = vmul.f32 0.70710677, %v631_v12  ;;  %v654_v21 = vmul.f32 0.70710677, %v634_v13  ;;  %v691_v59 = vadd.f32 %v610_v1, %v40_v46 }
   0x8   :  { %v102_v23 = vand.u32 2147483647, %v644_v17  ;;  %v672_v47 = vmul.f32 0.5, %v53_v10  ;;  %v675_v49 = vmul.f32 0.70710677, %v663_v37  ;;  %v686_v55 = vmul.f32 0.5, %v54_v11 }
   0x9   :  { %v101_v20 = vand.u32 2147483647, %v639_v15  ;;  %v103_v24 = vand.u32 2147483647, %v647_v18  ;;  %v104_v28 = vand.u32 2147483647, %v654_v21  ;;  %v41_v60 = vmul.f32 %v605_v0, %v21_v50 }
   0xa   :  { %v118_v30 = vmul.f32 0.3275911, %v102_v23  ;;  %v326_v31 = vsub.f32 0.0, %v102_v23  ;;  %v681_v53 = vmul.f32 0.70710677, %v669_v42  ;;  %v708_v22 = vmul.f32 0.5, %v634_v13 }
   0xb   :  { %v117_v26 = vmul.f32 0.3275911, %v101_v20  ;;  %v325_v27 = vsub.f32 0.0, %v101_v20  ;;  %v119_v32 = vmul.f32 0.3275911, %v103_v24  ;;  %v327_v33 = vsub.f32 0.0, %v103_v24 }
   0xc   :  { %v120_v36 = vmul.f32 0.3275911, %v104_v28  ;;  %v134_v39 = vadd.f32 1.0, %v118_v30  ;;  %v342_v40 = vmul.f32 %v326_v31, %v102_v23  ;;  %v328_v41 = vsub.f32 0.0, %v104_v28 }
   0xd   :  { %v133_v34 = vadd.f32 1.0, %v117_v26  ;;  %v341_v35 = vmul.f32 %v325_v27, %v101_v20  ;;  %v135_v43 = vadd.f32 1.0, %v119_v32  ;;  %v343_v44 = vmul.f32 %v327_v33, %v103_v24  ;;  %v22_v24 = vld [vmem:[%s1018_s0 + $0x48] sm:$0xff] }
   0xe   :  { %v136_v48 = vadd.f32 1.0, %v120_v36  ;;  %v359_v51 = vmul.f32 1.442695, %v342_v40  ;;  %v344_v52 = vmul.f32 %v328_v41, %v104_v28  ;;  %v105_v57 = vand.u32 2147483647, %v675_v49 }
   0xf   :  { %523 = vrcp.f32 %v133_v34  ;;  %v357_v45 = vmul.f32 1.442695, %v341_v35  ;;  %v361_v56 = vmul.f32 1.442695, %v343_v44  ;;  %v106_v58 = vand.u32 2147483647, %v681_v53 }
  0x10   :  { %525 = vrcp.f32 %v134_v39  ;;  %v121_v61 = vmul.f32 0.3275911, %v105_v57  ;;  %v329_v62 = vsub.f32 0.0, %v105_v57  ;;  %v695_v63 = vmul.f32 0.70710677, %v684_v54 }
  0x11   :  { %527 = vrcp.f32 %v135_v43  ;;  %v363_v2 = vmul.f32 1.442695, %v344_v52  ;;  %v122_v3 = vmul.f32 0.3275911, %v106_v58  ;;  %v330_v4 = vsub.f32 0.0, %v106_v58 }
  0x12   :  { %529 = vpow2.f32 %v357_v45  ;;  %v137_v5 = vadd.f32 1.0, %v121_v61  ;;  %v345_v6 = vmul.f32 %v329_v62, %v105_v57  ;;  %v107_v7 = vand.u32 2147483647, %v695_v63 }
  0x13   :  { %531 = vrcp.f32 %v136_v48  ;;  %v138_v8 = vadd.f32 1.0, %v122_v3  ;;  %v346_v9 = vmul.f32 %v330_v4, %v106_v58  ;;  %v699_v10 = vmul.f32 0.70710677, %v691_v59 }
  0x14   :  { %533 = vpow2.f32 %v359_v51  ;;  %v702_v11 = vadd.f32 %v610_v1, %v41_v60  ;;  %v365_v14 = vmul.f32 1.442695, %v345_v6  ;;  %v123_v16 = vmul.f32 0.3275911, %v107_v7  ;;  %v23_v60 = vld [vmem:[%s1018_s0 + $0x50] sm:$0xff] }
  0x15   :  { %535 = vpow2.f32 %v361_v56  ;;  %v331_v19 = vsub.f32 0.0, %v107_v7  ;;  %v705_v20 = vmul.f32 0.5, %v631_v12  ;;  %v108_v23 = vand.u32 2147483647, %v699_v10 }
  0x16   :  { %537 = vrcp.f32 %v137_v5  ;;  %v367_v25 = vmul.f32 1.442695, %v346_v9  ;;  %v139_v26 = vadd.f32 1.0, %v123_v16  ;;  %v717_v30 = vmul.f32 0.70710677, %v702_v11 }
  0x17   :  { %539 = vrcp.f32 %v138_v8  ;;  %v347_v27 = vmul.f32 %v331_v19, %v107_v7  ;;  %v124_v29 = vmul.f32 0.3275911, %v108_v23  ;;  %v332_v12 = vsub.f32 0.0, %v108_v23 }
  0x18   :  { %541 = vpow2.f32 %v363_v2  ;;  %v42_v33 = vmul.f32 %v605_v0, %v22_v24  ;;  %v109_v38 = vand.u32 2147483647, %v717_v30  ;;  %v726_v40 = vmul.f32 0.5, %v663_v37 }
  0x19   :  { %543 = vpow2.f32 %v365_v14  ;;  %v369_v32 = vmul.f32 1.442695, %v347_v27  ;;  %v140_v35 = vadd.f32 1.0, %v124_v29  ;;  %v348_v36 = vmul.f32 %v332_v12, %v108_v23 }
  0x1a   :  { %545 = vrcp.f32 %v139_v26  ;;  %v729_v41 = vadd.f32 %v610_v1, %v42_v33  ;;  %v125_v46 = vmul.f32 0.3275911, %v109_v38  ;;  %v333_v52 = vsub.f32 0.0, %v109_v38 }
  0x1b   :  { %547 = vpow2.f32 %v367_v25  ;;  %v371_v45 = vmul.f32 1.442695, %v348_v36  ;;  %v752_v7 = vmul.f32 0.5, %v669_v42  ;;  %v761_v27 = vmul.f32 %v605_v0, %v23_v60 }
  0x1c   :  { %v714_v28 = vpop.eup %523  ;;  %549 = vrcp.f32 %v140_v35  ;;  %v141_v57 = vadd.f32 1.0, %v125_v46  ;;  %v741_v58 = vmul.f32 0.70710677, %v729_v41  ;;  %v349_v4 = vmul.f32 %v333_v52, %v109_v38 }
  0x1d   :  { %v719_v13 = vpop.eup %525  ;;  %v181_v31 = vmul.f32 1.0614054, %v714_v28  ;;  %551 = vpow2.f32 %v369_v32  ;;  %vm421_vm0 = vcmp.ge.f32.partialorder %v639_v15, 0.0  ;;  %vm422_vm1 = vcmp.ge.f32.partialorder %v644_v17, 0.0 }
  0x1e   :  { %v182_v34 = vmul.f32 1.0614054, %v719_v13  ;;  %v731_v43 = vpop.eup %527  ;;  %553 = vpow2.f32 %v371_v45  ;;  %v110_v8 = vand.u32 2147483647, %v741_v58  ;;  %v373_v19 = vmul.f32 1.442695, %v349_v4 }
  0x1f   :  { %v197_v39 = vadd.f32 -1.4531521, %v181_v31  ;;  %v733_v48 = vpop.eup %529  ;;  %v183_v51 = vmul.f32 1.0614054, %v731_v43  ;;  %555 = vrcp.f32 %v141_v57  ;;  %vm423_vm2 = vcmp.ge.f32.partialorder %v647_v18, 0.0 }
  0x20   :  { %v198_v44 = vadd.f32 -1.4531521, %v182_v34  ;;  %v737_v37 = vpop.eup %531  ;;  %v126_v25 = vmul.f32 0.3275911, %v110_v8  ;;  %v334_v26 = vsub.f32 0.0, %v110_v8  ;;  %557 = vpow2.f32 %v373_v19 }
  0x21   :  { %v213_v50 = vmul.f32 %v714_v28, %v197_v39  ;;  %v746_v61 = vpop.eup %533  ;;  %v199_v2 = vadd.f32 -1.4531521, %v183_v51  ;;  %v184_v3 = vmul.f32 1.0614054, %v737_v37  ;;  %vm424_vm3 = vcmp.ge.f32.partialorder %v654_v21, 0.0 }
  0x22   :  { %v214_v56 = vmul.f32 %v719_v13, %v198_v44  ;;  %v749_v5 = vpop.eup %535  ;;  %v142_v36 = vadd.f32 1.0, %v126_v25  ;;  %vm425_vm4 = vcmp.ge.f32.partialorder %v675_v49, 0.0  ;;  %vm426_vm5 = vcmp.ge.f32.partialorder %v681_v53, 0.0 }
  0x23   :  { %v229_v62 = vadd.f32 1.4214138, %v213_v50  ;;  %v215_v14 = vmul.f32 %v731_v43, %v199_v2  ;;  %v200_v16 = vadd.f32 -1.4531521, %v184_v3  ;;  %v757_v23 = vpop.eup %537  ;;  %vm427_vm6 = vcmp.ge.f32.partialorder %v695_v63, 0.0 }
  0x24   :  { %v230_v6 = vadd.f32 1.4214138, %v214_v56  ;;  %v763_v42 = vpop.eup %539  ;;  %v185_v32 = vmul.f32 1.0614054, %v757_v23  ;;  %559 = vrcp.f32 %v142_v36  ;;  %v350_v56 = vmul.f32 %v334_v26, %v110_v8 }
  0x25   :  { %v245_v9 = vmul.f32 %v714_v28, %v229_v62  ;;  %v231_v12 = vadd.f32 1.4214138, %v215_v14  ;;  %v216_v31 = vmul.f32 %v737_v37, %v200_v16  ;;  %v767_v33 = vpop.eup %541  ;;  %v186_v35 = vmul.f32 1.0614054, %v763_v42 }
  0x26   :  { %v246_v24 = vmul.f32 %v719_v13, %v230_v6  ;;  %v770_v38 = vpop.eup %543  ;;  %v201_v46 = vadd.f32 -1.4531521, %v185_v32  ;;  %v785_v14 = vmul.f32 1.442695, %v350_v56  ;;  %vm428_vm7 = vcmp.ge.f32.partialorder %v699_v10, 0.0 }
  0x27   :  { %v261_v29 = vadd.f32 -0.28449672, %v245_v9  ;;  %v247_v44 = vmul.f32 %v731_v43, %v231_v12  ;;  %v232_v45 = vadd.f32 1.4214138, %v216_v31  ;;  %v774_v50 = vpop.eup %545  ;;  %v202_v52 = vadd.f32 -1.4531521, %v186_v35 }
  0x28   :  { %v262_v34 = vadd.f32 -0.28449672, %v246_v24  ;;  %v217_v2 = vmul.f32 %v757_v23, %v201_v46  ;;  %v781_v3 = vpop.eup %547  ;;  %v187_v9 = vmul.f32 1.0614054, %v774_v50  ;;  %561 = vpow2.f32 %v785_v14 }
  0x29   :  { %v277_v39 = vmul.f32 %v714_v28, %v261_v29  ;;  %v263_v60 = vadd.f32 -0.28449672, %v247_v44  ;;  %v248_v62 = vmul.f32 %v737_v37, %v232_v45  ;;  %v218_v6 = vmul.f32 %v763_v42, %v202_v52  ;;  %v787_v16 = vpop.eup %549 }
  0x2a   :  { %v278_v51 = vmul.f32 %v719_v13, %v262_v34  ;;  %v233_v25 = vadd.f32 1.4214138, %v217_v2  ;;  %v791_v26 = vpop.eup %551  ;;  %v203_v31 = vadd.f32 -1.4531521, %v187_v9  ;;  %v188_v32 = vmul.f32 1.0614054, %v787_v16 }
  0x2b   :  { %v293_v57 = vadd.f32 0.2548296, %v277_v39  ;;  %v279_v19 = vmul.f32 %v731_v43, %v263_v60  ;;  %v264_v24 = vadd.f32 -0.28449672, %v248_v62  ;;  %v234_v12 = vadd.f32 1.4214138, %v218_v6  ;;  %v796_v34 = vpop.eup %553 }
  0x2c   :  { %v294_v4 = vadd.f32 0.2548296, %v278_v51  ;;  %v249_v39 = vmul.f32 %v757_v23, %v233_v25  ;;  %v219_v45 = vmul.f32 %v774_v50, %v203_v31  ;;  %v204_v46 = vadd.f32 -1.4531521, %v188_v32  ;;  %v805_v51 = vpop.eup %555 }
  0x2d   :  { %v309_v8 = vmul.f32 %v714_v28, %v293_v57  ;;  %v295_v36 = vadd.f32 0.2548296, %v279_v19  ;;  %v280_v28 = vmul.f32 %v737_v37, %v264_v24  ;;  %v866_v14 = vadd.f32 %v610_v1, %v761_v27 }
  0x2e   :  { %v310_v29 = vmul.f32 %v719_v13, %v294_v4  ;;  %v250_v13 = vmul.f32 %v763_v42, %v234_v12  ;;  %v265_v57 = vadd.f32 -0.28449672, %v249_v39  ;;  %v235_v2 = vadd.f32 1.4214138, %v219_v45 }
  0x2f   :  { %v389_v35 = vmul.f32 %v733_v48, %v309_v8  ;;  %v311_v56 = vmul.f32 %v731_v43, %v295_v36  ;;  %v296_v48 = vadd.f32 0.2548296, %v280_v28  ;;  %v220_v4 = vmul.f32 %v787_v16, %v204_v46 }
  0x30   :  { %v390_v44 = vmul.f32 %v746_v61, %v310_v29  ;;  %v266_v62 = vadd.f32 -0.28449672, %v250_v13  ;;  %v281_v8 = vmul.f32 %v757_v23, %v265_v57  ;;  %v251_v43 = vmul.f32 %v774_v50, %v235_v2  ;;  %v815_v29 = vpop.eup %557 }
  0x31   :  { %v405_v52 = vsub.f32 1.0, %v389_v35  ;;  %v391_v6 = vmul.f32 %v749_v5, %v311_v56  ;;  %v312_v9 = vmul.f32 %v737_v37, %v296_v48  ;;  %v236_v25 = vadd.f32 1.4214138, %v220_v4  ;;  %v823_v39 = vpop.eup %559 }
  0x32   :  { %v406_v60 = vsub.f32 1.0, %v390_v44  ;;  %v282_v24 = vmul.f32 %v763_v42, %v266_v62  ;;  %v297_v32 = vadd.f32 0.2548296, %v281_v8  ;;  %v267_v28 = vadd.f32 -0.28449672, %v251_v43 }
  0x33   :  { %v437_v61 = vsub.f32 0.0, %v405_v52  ;;  %v407_v31 = vsub.f32 1.0, %v391_v6  ;;  %v392_v5 = vmul.f32 %v767_v33, %v312_v9  ;;  %v252_v56 = vmul.f32 %v787_v16, %v236_v25 }
  0x34   :  { %v438_v19 = vsub.f32 0.0, %v406_v60  ;;  %v298_v36 = vadd.f32 0.2548296, %v282_v24  ;;  %v313_v15 = vmul.f32 %v757_v23, %v297_v32  ;;  %v190_v2 = vmul.f32 1.0614054, %v823_v39 }
  0x35   :  { %v453_v12 = vsel %vm421_vm0, %v405_v52, %v437_v61  ;;  %v439_v13 = vsub.f32 0.0, %v407_v31  ;;  %v408_v45 = vsub.f32 1.0, %v392_v5  ;;  %v283_v52 = vmul.f32 %v774_v50, %v267_v28 }
  0x36   :  { %v469_v37 = vadd.f32 1.0, %v453_v12  ;;  %v454_v35 = vsel %vm422_vm1, %v406_v60, %v438_v19  ;;  %v314_v33 = vmul.f32 %v763_v42, %v298_v36  ;;  %v393_v60 = vmul.f32 %v770_v38, %v313_v15  ;;  %v24_v36 = vld [vmem:[%s1018_s0 + $0x58] sm:$0xff] }
  0x37   :  { %v470_v44 = vadd.f32 1.0, %v454_v35  ;;  %v455_v48 = vsel %vm423_vm2, %v407_v31, %v439_v13  ;;  %v440_v57 = vsub.f32 0.0, %v408_v45  ;;  %v299_v42 = vadd.f32 0.2548296, %v283_v52 }
  0x38   :  { %v485_v46 = vmul.f32 %v469_v37, %v672_v47  ;;  %v471_v47 = vadd.f32 1.0, %v455_v48  ;;  %v394_v23 = vmul.f32 %v781_v3, %v314_v33  ;;  %v268_v62 = vadd.f32 -0.28449672, %v252_v56 }
  0x39   :  { %v486_v17 = vmul.f32 %v470_v44, %v686_v55  ;;  %v456_v18 = vsel %vm424_vm3, %v408_v45, %v440_v57  ;;  %v409_v55 = vsub.f32 1.0, %v393_v60  ;;  %v189_v38 = vmul.f32 1.0614054, %v805_v51 }
  0x3a   :  { %501 = vst [vmem:[%s1020_s2] sm:$0xff] %v485_v46  ;;  %v487_v4 = vmul.f32 %v471_v47, %v705_v20  ;;  %v472_v61 = vadd.f32 1.0, %v456_v18  ;;  %v410_v6 = vsub.f32 1.0, %v394_v23  ;;  %v315_v3 = vmul.f32 %v774_v50, %v299_v42  ;;  %v25_v46 = vld [vmem:[%s1018_s0 + $0x60] sm:$0xff] }
  0x3b   :  { %502 = vst [vmem:[%s1020_s2 + $0x8] sm:$0xff] %v486_v17  ;;  %v441_v9 = vsub.f32 0.0, %v409_v55  ;;  %v284_v8 = vmul.f32 %v787_v16, %v268_v62  ;;  %v205_v19 = vadd.f32 -1.4531521, %v189_v38  ;;  %v206_v24 = vadd.f32 -1.4531521, %v190_v2 }
  0x3c   :  { %503 = vst [vmem:[%s1020_s2 + $0x10] sm:$0xff] %v487_v4  ;;  %v488_v21 = vmul.f32 %v472_v61, %v708_v22  ;;  %v442_v43 = vsub.f32 0.0, %v410_v6  ;;  %v395_v25 = vmul.f32 %v791_v26, %v315_v3  ;;  %v75_v44 = vmul.f32 0.5, %v684_v54 }
  0x3d   :  { %v457_v20 = vsel %vm425_vm4, %v409_v55, %v441_v9  ;;  %v300_v50 = vadd.f32 0.2548296, %v284_v8  ;;  %v221_v12 = vmul.f32 %v805_v51, %v205_v19  ;;  %v222_v31 = vmul.f32 %v823_v39, %v206_v24  ;;  %v27_v8 = vld [vmem:[%s1018_s0 + $0x70] sm:$0xff] }
  0x3e   :  { %504 = vst [vmem:[%s1020_s2 + $0x18] sm:$0xff] %v488_v21  ;;  %v473_v5 = vadd.f32 1.0, %v457_v20  ;;  %v458_v22 = vsel %vm426_vm5, %v410_v6, %v442_v43  ;;  %v411_v32 = vsub.f32 1.0, %v395_v25  ;;  %v875_v13 = vmul.f32 0.70710677, %v866_v14  ;;  %v562_v6 = vpop.eup %561 }
  0x3f   :  { %v474_v49 = vadd.f32 1.0, %v458_v22  ;;  %v316_v26 = vmul.f32 %v787_v16, %v300_v50  ;;  %v237_v37 = vadd.f32 1.4214138, %v221_v12  ;;  %v238_v35 = vadd.f32 1.4214138, %v222_v31 }
  0x40   :  { %v489_v28 = vmul.f32 %v473_v5, %v726_v40  ;;  %v443_v53 = vsub.f32 0.0, %v411_v32  ;;  %v111_v40 = vand.u32 2147483647, %v875_v13  ;;  %v45_v63 = vmul.f32 %v605_v0, %v25_v46 }
  0x41   :  { %v490_v27 = vmul.f32 %v474_v49, %v752_v7  ;;  %v396_v45 = vmul.f32 %v796_v34, %v316_v26  ;;  %v253_v16 = vmul.f32 %v805_v51, %v237_v37  ;;  %v254_v15 = vmul.f32 %v823_v39, %v238_v35 }
  0x42   :  { %505 = vst [vmem:[%s1020_s2 + $0x20] sm:$0xff] %v489_v28  ;;  %v459_v54 = vsel %vm427_vm6, %v411_v32, %v443_v53  ;;  %v44_v7 = vmul.f32 %v605_v0, %v24_v36  ;;  %v127_v17 = vmul.f32 0.3275911, %v111_v40  ;;  %v76_v42 = vmul.f32 0.5, %v691_v59  ;;  %v26_v59 = vld [vmem:[%s1018_s0 + $0x68] sm:$0xff] }
  0x43   :  { %506 = vst [vmem:[%s1020_s2 + $0x28] sm:$0xff] %v490_v27  ;;  %v475_v34 = vadd.f32 1.0, %v459_v54  ;;  %v412_v33 = vsub.f32 1.0, %v396_v45  ;;  %v269_v52 = vadd.f32 -0.28449672, %v253_v16  ;;  %v909_v2 = vadd.f32 %v610_v1, %v45_v63 }
  0x44   :  { %v270_v56 = vadd.f32 -0.28449672, %v254_v15  ;;  %v896_v48 = vadd.f32 %v610_v1, %v44_v7  ;;  %v143_v62 = vadd.f32 1.0, %v127_v17  ;;  %v335_v24 = vsub.f32 0.0, %v111_v40 }
  0x45   :  { %v491_v57 = vmul.f32 %v475_v34, %v75_v44  ;;  %v444_v60 = vsub.f32 0.0, %v412_v33  ;;  %v285_v47 = vmul.f32 %v805_v51, %v269_v52  ;;  %v922_v20 = vmul.f32 0.70710677, %v909_v2 }
  0x46   :  { %v286_v23 = vmul.f32 %v823_v39, %v270_v56  ;;  %v903_v18 = vmul.f32 0.70710677, %v896_v48  ;;  %563 = vrcp.f32 %v143_v62  ;;  %v46_v50 = vmul.f32 %v605_v0, %v26_v59 }
  0x47   :  { %507 = vst [vmem:[%s1020_s2 + $0x30] sm:$0xff] %v491_v57  ;;  %v460_v10 = vsel %vm428_vm7, %v412_v33, %v444_v60  ;;  %v301_v55 = vadd.f32 0.2548296, %v285_v47  ;;  %vm429_vm8 = vcmp.ge.f32.partialorder %v717_v30, 0.0  ;;  %v47_v12 = vmul.f32 %v605_v0, %v27_v8 }
  0x48   :  { %v302_v38 = vadd.f32 0.2548296, %v286_v23  ;;  %v476_v4 = vadd.f32 1.0, %v460_v10  ;;  %v112_v61 = vand.u32 2147483647, %v903_v18  ;;  %vm430_vm9 = vcmp.ge.f32.partialorder %v741_v58, 0.0 }
  0x49   :  { %v317_v3 = vmul.f32 %v805_v51, %v301_v55  ;;  %v28_v51 = vld [vmem:[%s1018_s0 + $0x78] sm:$0xff]  ;;  %v113_v5 = vand.u32 2147483647, %v922_v20  ;;  %v351_v22 = vmul.f32 %v335_v24, %v111_v40  ;;  %v936_v32 = vadd.f32 %v610_v1, %v46_v50 }
  0x4a   :  { %v318_v9 = vmul.f32 %v823_v39, %v302_v38  ;;  %v492_v19 = vmul.f32 %v476_v4, %v76_v42  ;;  %v128_v21 = vmul.f32 0.3275911, %v112_v61  ;;  %v48_v49 = vmul.f32 %v605_v0, %v28_v51 }
  0x4b   :  { %v397_v43 = vmul.f32 %v815_v29, %v317_v3  ;;  %v129_v35 = vmul.f32 0.3275911, %v113_v5  ;;  %v940_v36 = vadd.f32 %v610_v1, %v47_v12  ;;  %v77_v28 = vmul.f32 0.5, %v702_v11 }
  0x4c   :  { %v398_v25 = vmul.f32 %v562_v6, %v318_v9  ;;  %508 = vst [vmem:[%s1020_s2 + $0x38] sm:$0xff] %v492_v19  ;;  %v144_v39 = vadd.f32 1.0, %v128_v21  ;;  %v78_v44 = vmul.f32 0.5, %v729_v41  ;;  %v945_v58 = vmul.f32 0.70710677, %v936_v32 }
  0x4d   :  { %v413_v29 = vsub.f32 1.0, %v397_v43  ;;  %v336_v45 = vsub.f32 0.0, %v112_v61  ;;  %v145_v16 = vadd.f32 1.0, %v129_v35  ;;  %v377_v54 = vmul.f32 1.442695, %v351_v22 }
  0x4e   :  { %v414_v31 = vsub.f32 1.0, %v398_v25  ;;  %565 = vrcp.f32 %v144_v39  ;;  %v114_v46 = vand.u32 2147483647, %v945_v58  ;;  %v951_v40 = vmul.f32 0.70710677, %v940_v36 }
  0x4f   :  { %v445_v26 = vsub.f32 0.0, %v413_v29  ;;  %567 = vrcp.f32 %v145_v16  ;;  %v954_v11 = vadd.f32 %v610_v1, %v48_v49  ;;  %v352_v33 = vmul.f32 %v336_v45, %v112_v61 }
  0x50   :  { %v446_v37 = vsub.f32 0.0, %v414_v31  ;;  %v130_v34 = vmul.f32 0.3275911, %v114_v46  ;;  %v115_v52 = vand.u32 2147483647, %v951_v40  ;;  %569 = vpow2.f32 %v377_v54 }
  0x51   :  { %v461_v53 = vsel %vm429_vm8, %v413_v29, %v445_v26  ;;  %v964_v1 = vmul.f32 0.70710677, %v954_v11  ;;  %v337_v63 = vsub.f32 0.0, %v113_v5  ;;  %v379_v23 = vmul.f32 1.442695, %v352_v33 }
  0x52   :  { %v462_v27 = vsel %vm430_vm9, %v414_v31, %v446_v37  ;;  %v477_v0 = vadd.f32 1.0, %v461_v53  ;;  %v146_v17 = vadd.f32 1.0, %v130_v34  ;;  %v131_v57 = vmul.f32 0.3275911, %v115_v52 }
  0x53   :  { %v478_v15 = vadd.f32 1.0, %v462_v27  ;;  %v564_v30 = vpop.eup %563  ;;  %v116_v47 = vand.u32 2147483647, %v964_v1  ;;  %v353_v38 = vmul.f32 %v337_v63, %v113_v5  ;;  %v338_v59 = vsub.f32 0.0, %v114_v46 }
  0x54   :  { %v493_v41 = vmul.f32 %v477_v0, %v77_v28  ;;  %v191_v56 = vmul.f32 1.0614054, %v564_v30  ;;  %571 = vrcp.f32 %v146_v17  ;;  %v147_v42 = vadd.f32 1.0, %v131_v57 }
  0x55   :  { %v494_v7 = vmul.f32 %v478_v15, %v78_v44  ;;  %v132_v10 = vmul.f32 0.3275911, %v116_v47  ;;  %v381_v8 = vmul.f32 1.442695, %v353_v38  ;;  %v339_v19 = vsub.f32 0.0, %v115_v52 }
  0x56   :  { %509 = vst [vmem:[%s1020_s2 + $0x40] sm:$0xff] %v493_v41  ;;  %v207_v60 = vadd.f32 -1.4531521, %v191_v56  ;;  %573 = vrcp.f32 %v147_v42  ;;  %v354_v25 = vmul.f32 %v338_v59, %v114_v46  ;;  %v340_v51 = vsub.f32 0.0, %v116_v47 }
  0x57   :  { %510 = vst [vmem:[%s1020_s2 + $0x48] sm:$0xff] %v494_v7  ;;  %v148_v6 = vadd.f32 1.0, %v132_v10  ;;  %575 = vpow2.f32 %v379_v23  ;;  %v355_v31 = vmul.f32 %v339_v19, %v115_v52  ;;  %vm431_vm10 = vcmp.ge.f32.partialorder %v875_v13, 0.0 }
  0x58   :  { %v223_v62 = vmul.f32 %v564_v30, %v207_v60  ;;  %v383_v26 = vmul.f32 1.442695, %v354_v25  ;;  %v356_v28 = vmul.f32 %v340_v51, %v116_v47  ;;  %vm432_vm11 = vcmp.ge.f32.partialorder %v903_v18, 0.0 }
  0x59   :  { %577 = vrcp.f32 %v148_v6  ;;  %v385_v16 = vmul.f32 1.442695, %v355_v31  ;;  %vm433_vm12 = vcmp.ge.f32.partialorder %v922_v20, 0.0  ;;  %vm434_vm13 = vcmp.ge.f32.partialorder %v945_v58, 0.0 }
  0x5a   :  { %v239_v4 = vadd.f32 1.4214138, %v223_v62  ;;  %579 = vpow2.f32 %v381_v8  ;;  %v387_v34 = vmul.f32 1.442695, %v356_v28  ;;  %v79_v62 = vmul.f32 0.5, %v866_v14 }
  0x5b   :  { %v566_v55 = vpop.eup %565  ;;  %581 = vpow2.f32 %v383_v26  ;;  %vm435_vm14 = vcmp.ge.f32.partialorder %v951_v40, 0.0  ;;  %v83_v58 = vmul.f32 0.5, %v940_v36  ;;  %vm436_vm15 = vcmp.ge.f32.partialorder %v964_v1, 0.0 }
  0x5c   :  { %v192_v61 = vmul.f32 1.0614054, %v566_v55  ;;  %v255_v3 = vmul.f32 %v564_v30, %v239_v4  ;;  %v568_v24 = vpop.eup %567  ;;  %583 = vpow2.f32 %v385_v16  ;;  %v81_v16 = vmul.f32 0.5, %v909_v2 }
  0x5d   :  { %v193_v50 = vmul.f32 1.0614054, %v568_v24  ;;  %v570_v5 = vpop.eup %569  ;;  %585 = vpow2.f32 %v387_v34 }
  0x5e   :  { %v208_v9 = vadd.f32 -1.4531521, %v192_v61  ;;  %v271_v21 = vadd.f32 -0.28449672, %v255_v3 }
  0x5f   :  { %v209_v29 = vadd.f32 -1.4531521, %v193_v50 }
  0x60   :  { %v224_v43 = vmul.f32 %v566_v55, %v208_v9  ;;  %v287_v39 = vmul.f32 %v564_v30, %v271_v21 }
  0x61   :  { %v967_v37 = vpop.eup %571  ;;  %v225_v35 = vmul.f32 %v568_v24, %v209_v29 }
  0x62   :  { %v240_v12 = vadd.f32 1.4214138, %v224_v43  ;;  %v303_v22 = vadd.f32 0.2548296, %v287_v39  ;;  %v194_v27 = vmul.f32 1.0614054, %v967_v37 }
  0x63   :  { %v241_v45 = vadd.f32 1.4214138, %v225_v35  ;;  %v970_v0 = vpop.eup %573 }
  0x64   :  { %v256_v49 = vmul.f32 %v566_v55, %v240_v12  ;;  %v319_v44 = vmul.f32 %v564_v30, %v303_v22  ;;  %v210_v54 = vadd.f32 -1.4531521, %v194_v27  ;;  %v195_v7 = vmul.f32 1.0614054, %v970_v0  ;;  %v576_v33 = vpop.eup %575 }
  0x65   :  { %v257_v41 = vmul.f32 %v568_v24, %v241_v45  ;;  %v80_v12 = vmul.f32 0.5, %v896_v48 }
  0x66   :  { %v272_v53 = vadd.f32 -0.28449672, %v256_v49  ;;  %v399_v15 = vmul.f32 %v570_v5, %v319_v44  ;;  %v226_v30 = vmul.f32 %v967_v37, %v210_v54  ;;  %v974_v17 = vpop.eup %577  ;;  %v211_v57 = vadd.f32 -1.4531521, %v195_v7 }
  0x67   :  { %v273_v63 = vadd.f32 -0.28449672, %v257_v41  ;;  %v196_v42 = vmul.f32 1.0614054, %v974_v17  ;;  %v580_v8 = vpop.eup %579 }
  0x68   :  { %v288_v46 = vmul.f32 %v566_v55, %v272_v53  ;;  %v415_v52 = vsub.f32 1.0, %v399_v15  ;;  %v242_v23 = vadd.f32 1.4214138, %v226_v30  ;;  %v227_v38 = vmul.f32 %v970_v0, %v211_v57  ;;  %v582_v18 = vpop.eup %581 }
  0x69   :  { %v289_v10 = vmul.f32 %v568_v24, %v273_v63  ;;  %v212_v6 = vadd.f32 -1.4531521, %v196_v42  ;;  %v584_v48 = vpop.eup %583  ;;  %v82_v30 = vmul.f32 0.5, %v936_v32 }
  0x6a   :  { %v304_v56 = vadd.f32 0.2548296, %v288_v46  ;;  %v447_v60 = vsub.f32 0.0, %v415_v52  ;;  %v258_v59 = vmul.f32 %v967_v37, %v242_v23  ;;  %v243_v9 = vadd.f32 1.4214138, %v227_v38  ;;  %v586_v20 = vpop.eup %585 }
  0x6b   :  { %v305_v3 = vadd.f32 0.2548296, %v289_v10  ;;  %v228_v21 = vmul.f32 %v974_v17, %v212_v6  ;;  %v84_v10 = vmul.f32 0.5, %v954_v11 }
  0x6c   :  { %v320_v47 = vmul.f32 %v566_v55, %v304_v56  ;;  %v463_v4 = vsel %vm431_vm10, %v415_v52, %v447_v60  ;;  %v274_v55 = vadd.f32 -0.28449672, %v258_v59  ;;  %v259_v25 = vmul.f32 %v970_v0, %v243_v9 }
  0x6d   :  { %v479_v13 = vadd.f32 1.0, %v463_v4  ;;  %v321_v14 = vmul.f32 %v568_v24, %v305_v3  ;;  %v244_v39 = vadd.f32 1.4214138, %v228_v21 }
  0x6e   :  { %v400_v61 = vmul.f32 %v576_v33, %v320_v47  ;;  %v290_v51 = vmul.f32 %v967_v37, %v274_v55  ;;  %v275_v31 = vadd.f32 -0.28449672, %v259_v25 }
  0x6f   :  { %v495_v43 = vmul.f32 %v479_v13, %v79_v62  ;;  %v401_v29 = vmul.f32 %v580_v8, %v321_v14  ;;  %v260_v49 = vmul.f32 %v974_v17, %v244_v39 }
  0x70   :  { %v416_v19 = vsub.f32 1.0, %v400_v61  ;;  %v306_v22 = vadd.f32 0.2548296, %v290_v51  ;;  %v291_v35 = vmul.f32 %v970_v0, %v275_v31 }
  0x71   :  { %511 = vst [vmem:[%s1020_s2 + $0x50] sm:$0xff] %v495_v43  ;;  %v417_v26 = vsub.f32 1.0, %v401_v29  ;;  %v276_v44 = vadd.f32 -0.28449672, %v260_v49 }
  0x72   :  { %v448_v50 = vsub.f32 0.0, %v416_v19  ;;  %v322_v28 = vmul.f32 %v967_v37, %v306_v22  ;;  %v307_v45 = vadd.f32 0.2548296, %v291_v35 }
  0x73   :  { %v449_v27 = vsub.f32 0.0, %v417_v26  ;;  %v292_v46 = vmul.f32 %v974_v17, %v276_v44 }
  0x74   :  { %v464_v5 = vsel %vm432_vm11, %v416_v19, %v448_v50  ;;  %v402_v15 = vmul.f32 %v582_v18, %v322_v28  ;;  %v323_v41 = vmul.f32 %v970_v0, %v307_v45 }
  0x75   :  { %v480_v24 = vadd.f32 1.0, %v464_v5  ;;  %v465_v54 = vsel %vm433_vm12, %v417_v26, %v449_v27  ;;  %v308_v34 = vadd.f32 0.2548296, %v292_v46 }
  0x76   :  { %v481_v7 = vadd.f32 1.0, %v465_v54  ;;  %v418_v37 = vsub.f32 1.0, %v402_v15  ;;  %v403_v33 = vmul.f32 %v584_v48, %v323_v41 }
  0x77   :  { %v496_v53 = vmul.f32 %v480_v24, %v80_v12  ;;  %v324_v2 = vmul.f32 %v974_v17, %v308_v34 }
  0x78   :  { %v497_v52 = vmul.f32 %v481_v7, %v81_v16  ;;  %v450_v56 = vsub.f32 0.0, %v418_v37  ;;  %v419_v63 = vsub.f32 1.0, %v403_v33 }
  0x79   :  { %512 = vst [vmem:[%s1020_s2 + $0x58] sm:$0xff] %v496_v53  ;;  %v404_v0 = vmul.f32 %v586_v20, %v324_v2 }
  0x7a   :  { %513 = vst [vmem:[%s1020_s2 + $0x60] sm:$0xff] %v497_v52  ;;  %v466_v57 = vsel %vm434_vm13, %v418_v37, %v450_v56  ;;  %v451_v47 = vsub.f32 0.0, %v419_v63 }
  0x7b   :  { %v482_v60 = vadd.f32 1.0, %v466_v57  ;;  %v420_v23 = vsub.f32 1.0, %v404_v0 }
  0x7c   :  { %v467_v62 = vsel %vm435_vm14, %v419_v63, %v451_v47 }
  0x7d   :  { %v498_v42 = vmul.f32 %v482_v60, %v82_v30  ;;  %v483_v17 = vadd.f32 1.0, %v467_v62  ;;  %v452_v32 = vsub.f32 0.0, %v420_v23 }
  0x7f   :  { %514 = vst [vmem:[%s1020_s2 + $0x68] sm:$0xff] %v498_v42  ;;  %v499_v38 = vmul.f32 %v483_v17, %v83_v58  ;;  %v468_v40 = vsel %vm436_vm15, %v420_v23, %v452_v32 }
  0x80   :  { %v484_v4 = vadd.f32 1.0, %v468_v40 }
  0x81   :  { %515 = vst [vmem:[%s1020_s2 + $0x70] sm:$0xff] %v499_v38 }
  0x82   :  { %v500_v36 = vmul.f32 %v484_v4, %v84_v10 }
  0x84   :  { %516 = vst [vmem:[%s1020_s2 + $0x78] sm:$0xff] %v500_v36 }

// kernel: conv_group_forward.3
= control target key start
LH: loop header
LB: loop body
LE: loop exit
PB: predicated region body
PF: predicated region fallthrough
CT: control target
= control target key end

     0   :  { %s1956_s1 = inlined_call_operand.vmem [shape: f32[128,128], index: 1, kind: input, shape index: {}]   ;;  %s1957_s0 = inlined_call_operand.vmem [shape: f32[2,4,8,8,128], index: 0, kind: input, shape index: {}]   ;;  %s1958_s3 = inlined_call_operand.vmem [shape: f32[8,128], index: 3, kind: output, shape index: {1}]   ;;  %s1959_s2 = inlined_call_operand.vmem [shape: f32[2,8,8,128], index: 2, kind: output, shape index: {0}]  }
   0x1   :  { %v1358_v0 = vld [vmem:[%s1956_s1 + $0x78] sm:$0xff]  ;;  %v1363_v1 = vld [vmem:[%s1956_s1 + $0x70] sm:$0xff]  ;;  %v1372_v2 = vld [vmem:[%s1956_s1 + $0x68] sm:$0xff] }
   0x2   :  { %1109 = vmatprep.subr.mxu0 %v1358_v0  ;;  %1165 = vmatprep.subr.mxu1 %v1358_v0  ;;  %v1381_v3 = vld [vmem:[%s1956_s1 + $0x60] sm:$0xff]  ;;  %v1390_v4 = vld [vmem:[%s1956_s1 + $0x58] sm:$0xff]  ;;  %v1399_v5 = vld [vmem:[%s1956_s1 + $0x50] sm:$0xff] }
   0x3   :  { %1110 = vmatpush3.msra.mxu0 %v1358_v0  ;;  %1166 = vmatpush3.msra.mxu1 %v1358_v0  ;;  %v1408_v6 = vld [vmem:[%s1956_s1 + $0x48] sm:$0xff]  ;;  %v1417_v7 = vld [vmem:[%s1956_s1 + $0x40] sm:$0xff]  ;;  %v1426_v8 = vld [vmem:[%s1956_s1 + $0x38] sm:$0xff] }
   0x4   :  { %1111 = vmatprep.subr.mxu0 %v1363_v1  ;;  %1167 = vmatprep.subr.mxu1 %v1363_v1  ;;  %v1435_v9 = vld [vmem:[%s1956_s1 + $0x30] sm:$0xff]  ;;  %v1444_v10 = vld [vmem:[%s1956_s1 + $0x28] sm:$0xff]  ;;  %v1453_v11 = vld [vmem:[%s1956_s1 + $0x20] sm:$0xff] }
   0x5   :  { %1112 = vmatpush3.msra.mxu0 %v1363_v1  ;;  %1168 = vmatpush3.msra.mxu1 %v1363_v1  ;;  %v1462_v12 = vld [vmem:[%s1956_s1 + $0x18] sm:$0xff]  ;;  %v1471_v13 = vld [vmem:[%s1956_s1 + $0x10] sm:$0xff]  ;;  %v1480_v14 = vld [vmem:[%s1956_s1 + $0x8] sm:$0xff] }
   0x6   :  { %1113 = vmatprep.subr.mxu0 %v1372_v2  ;;  %1169 = vmatprep.subr.mxu1 %v1372_v2  ;;  %v1489_v15 = vld [vmem:[%s1956_s1] sm:$0xff]  ;;  %v55_v18 = vld [vmem:[%s1957_s0 + $0x8] sm:$0xff]  ;;  %v56_v20 = vld [vmem:[%s1957_s0 + $0x10] sm:$0xff] }
   0x7   :  { %1114 = vmatpush3.msra.mxu0 %v1372_v2  ;;  %1170 = vmatpush3.msra.mxu1 %v1372_v2  ;;  %v54_v16 = vld [vmem:[%s1957_s0] sm:$0xff]  ;;  %v933_v19 = vld [vmem:[%s1957_s0 + $0x48] sm:$0xff]  ;;  %v934_v21 = vld [vmem:[%s1957_s0 + $0x50] sm:$0xff] }
   0x8   :  { %1115 = vmatprep.subr.mxu0 %v1381_v3  ;;  %1171 = vmatprep.subr.mxu1 %v1381_v3  ;;  %v932_v17 = vld [vmem:[%s1957_s0 + $0x40] sm:$0xff]  ;;  %v57_v22 = vld [vmem:[%s1957_s0 + $0x18] sm:$0xff]  ;;  %v59_v26 = vld [vmem:[%s1957_s0 + $0x28] sm:$0xff] }
   0x9   :  { %1116 = vmatpush3.msra.mxu0 %v1381_v3  ;;  %1172 = vmatpush3.msra.mxu1 %v1381_v3  ;;  %v935_v23 = vld [vmem:[%s1957_s0 + $0x58] sm:$0xff]  ;;  %v58_v24 = vld [vmem:[%s1957_s0 + $0x20] sm:$0xff]  ;;  %v937_v27 = vld [vmem:[%s1957_s0 + $0x68] sm:$0xff] }
   0xa   :  { %1117 = vmatprep.subr.mxu0 %v1390_v4  ;;  %1173 = vmatprep.subr.mxu1 %v1390_v4  ;;  %v936_v25 = vld [vmem:[%s1957_s0 + $0x60] sm:$0xff]  ;;  %v60_v28 = vld [vmem:[%s1957_s0 + $0x30] sm:$0xff]  ;;  %v61_v30 = vld [vmem:[%s1957_s0 + $0x38] sm:$0xff] }
   0xb   :  { %1118 = vmatpush3.msra.mxu0 %v1390_v4  ;;  %1174 = vmatpush3.msra.mxu1 %v1390_v4  ;;  %v938_v29 = vld [vmem:[%s1957_s0 + $0x70] sm:$0xff]  ;;  %v939_v31 = vld [vmem:[%s1957_s0 + $0x78] sm:$0xff]  ;;  %v62_v32 = vld [vmem:[%s1957_s0 + $0x100] sm:$0xff] }
   0xc   :  { %1119 = vmatprep.subr.mxu0 %v1399_v5  ;;  %1175 = vmatprep.subr.mxu1 %v1399_v5  ;;  %v940_v33 = vld [vmem:[%s1957_s0 + $0x140] sm:$0xff]  ;;  %v63_v34 = vld [vmem:[%s1957_s0 + $0x108] sm:$0xff]  ;;  %v64_v36 = vld [vmem:[%s1957_s0 + $0x110] sm:$0xff] }
   0xd   :  { %1120 = vmatpush3.msra.mxu0 %v1399_v5  ;;  %1176 = vmatpush3.msra.mxu1 %v1399_v5  ;;  %v941_v35 = vld [vmem:[%s1957_s0 + $0x148] sm:$0xff]  ;;  %v942_v37 = vld [vmem:[%s1957_s0 + $0x150] sm:$0xff]  ;;  %v65_v38 = vld [vmem:[%s1957_s0 + $0x118] sm:$0xff] }
   0xe   :  { %1121 = vmatprep.subr.mxu0 %v1408_v6  ;;  %1177 = vmatprep.subr.mxu1 %v1408_v6  ;;  %v943_v39 = vld [vmem:[%s1957_s0 + $0x158] sm:$0xff]  ;;  %v66_v40 = vld [vmem:[%s1957_s0 + $0x120] sm:$0xff]  ;;  %v67_v42 = vld [vmem:[%s1957_s0 + $0x128] sm:$0xff] }
   0xf   :  { %1122 = vmatpush3.msra.mxu0 %v1408_v6  ;;  %1178 = vmatpush3.msra.mxu1 %v1408_v6  ;;  %v944_v41 = vld [vmem:[%s1957_s0 + $0x160] sm:$0xff]  ;;  %v945_v43 = vld [vmem:[%s1957_s0 + $0x168] sm:$0xff]  ;;  %v68_v44 = vld [vmem:[%s1957_s0 + $0x130] sm:$0xff] }
  0x10   :  { %1123 = vmatprep.subr.mxu0 %v1417_v7  ;;  %1179 = vmatprep.subr.mxu1 %v1417_v7  ;;  %v946_v45 = vld [vmem:[%s1957_s0 + $0x170] sm:$0xff]  ;;  %v69_v46 = vld [vmem:[%s1957_s0 + $0x138] sm:$0xff]  ;;  %v948_v48 = vld [vmem:[%s1957_s0 + $0x80] sm:$0xff] }
  0x11   :  { %1124 = vmatpush3.msra.mxu0 %v1417_v7  ;;  %1180 = vmatpush3.msra.mxu1 %v1417_v7  ;;  %v947_v47 = vld [vmem:[%s1957_s0 + $0x178] sm:$0xff]  ;;  %v949_v49 = vld [vmem:[%s1957_s0 + $0x88] sm:$0xff]  ;;  %v964_v50 = vld [vmem:[%s1957_s0 + $0xc0] sm:$0xff] }
  0x12   :  { %1125 = vmatprep.subr.mxu0 %v1426_v8  ;;  %1181 = vmatprep.subr.mxu1 %v1426_v8  ;;  %v950_v51 = vld [vmem:[%s1957_s0 + $0x90] sm:$0xff]  ;;  %v965_v52 = vld [vmem:[%s1957_s0 + $0xc8] sm:$0xff]  ;;  %v951_v54 = vld [vmem:[%s1957_s0 + $0x98] sm:$0xff] }
  0x13   :  { %1126 = vmatpush3.msra.mxu0 %v1426_v8  ;;  %1182 = vmatpush3.msra.mxu1 %v1426_v8  ;;  %v966_v53 = vld [vmem:[%s1957_s0 + $0xd0] sm:$0xff]  ;;  %v952_v55 = vld [vmem:[%s1957_s0 + $0xa0] sm:$0xff]  ;;  %v967_v56 = vld [vmem:[%s1957_s0 + $0xd8] sm:$0xff] }
  0x14   :  { %1127 = vmatprep.subr.mxu0 %v1435_v9  ;;  %1183 = vmatprep.subr.mxu1 %v1435_v9  ;;  %v968_v57 = vld [vmem:[%s1957_s0 + $0xe0] sm:$0xff]  ;;  %v953_v58 = vld [vmem:[%s1957_s0 + $0xa8] sm:$0xff]  ;;  %v954_v59 = vld [vmem:[%s1957_s0 + $0xb0] sm:$0xff] }
  0x15   :  { %1128 = vmatpush3.msra.mxu0 %v1435_v9  ;;  %1184 = vmatpush3.msra.mxu1 %v1435_v9  ;;  %v969_v60 = vld [vmem:[%s1957_s0 + $0xe8] sm:$0xff]  ;;  %v970_v61 = vld [vmem:[%s1957_s0 + $0xf0] sm:$0xff]  ;;  %v955_v62 = vld [vmem:[%s1957_s0 + $0xb8] sm:$0xff] }
  0x16   :  { %1129 = vmatprep.subr.mxu0 %v1444_v10  ;;  %1185 = vmatprep.subr.mxu1 %v1444_v10  ;;  %v956_v63 = vld [vmem:[%s1957_s0 + $0x180] sm:$0xff] }
  0x17   :  { %1130 = vmatpush3.msra.mxu0 %v1444_v10  ;;  %1186 = vmatpush3.msra.mxu1 %v1444_v10 }
  0x18   :  { %1131 = vmatprep.subr.mxu0 %v1453_v11  ;;  %1187 = vmatprep.subr.mxu1 %v1453_v11 }
  0x19   :  { %1132 = vmatpush3.msra.mxu0 %v1453_v11  ;;  %1188 = vmatpush3.msra.mxu1 %v1453_v11 }
  0x1a   :  { %1133 = vmatprep.subr.mxu0 %v1462_v12  ;;  %1189 = vmatprep.subr.mxu1 %v1462_v12 }
  0x1b   :  { %1134 = vmatpush3.msra.mxu0 %v1462_v12  ;;  %1190 = vmatpush3.msra.mxu1 %v1462_v12 }
  0x1c   :  { %1135 = vmatprep.subr.mxu0 %v1471_v13  ;;  %1191 = vmatprep.subr.mxu1 %v1471_v13 }
  0x1d   :  { %1136 = vmatpush3.msra.mxu0 %v1471_v13  ;;  %1192 = vmatpush3.msra.mxu1 %v1471_v13 }
  0x1e   :  { %1137 = vmatprep.subr.mxu0 %v1480_v14  ;;  %1193 = vmatprep.subr.mxu1 %v1480_v14 }
  0x1f   :  { %1138 = vmatpush3.msra.mxu0 %v1480_v14  ;;  %1194 = vmatpush3.msra.mxu1 %v1480_v14 }
  0x20   :  { %1139 = vmatprep.subr.mxu0 %v1489_v15  ;;  %1195 = vmatprep.subr.mxu1 %v1489_v15 }
  0x21   :  { %1140 = vmatpush3.msra.mxu0 %v1489_v15  ;;  %1141 = vmatprep.mubr.f32.mxu0 %v54_v16  ;;  %v1334_v16 = vmov 0.0  }
  0x22   :  { %1196 = vmatpush3.msra.mxu1 %v1489_v15  ;;  %1197 = vmatprep.mubr.f32.mxu1 %v932_v17  ;;  %785 = vst [vmem:[%s1958_s3] sm:$0xff] %v1334_v16 }
  0x23   :  { %1142 = vmatmul.mubr.f32.vlgmr.msra.gmra.mxu0 %v55_v18  ;;  %1198 = vmatmul.mubr.f32.vlgmr.msra.gmra.mxu1 %v933_v19 }
  0x24   :  { %1221 = vmatprep.subr.mxu0 %v1358_v0  ;;  %1277 = vmatprep.subr.mxu1 %v1358_v0 }
  0x25   :  { %1222 = vmatpush3.msra.mxu0 %v1358_v0  ;;  %1278 = vmatpush3.msra.mxu1 %v1358_v0  ;;  %v971_v0 = vld [vmem:[%s1957_s0 + $0xf8] sm:$0xff] }
  0x26   :  { %1223 = vmatprep.subr.mxu0 %v1363_v1  ;;  %1144 = vmatprep.mubr.f32.mxu0 %v56_v20 }
  0x27   :  { %1200 = vmatprep.mubr.f32.mxu1 %v934_v21  ;;  %1224 = vmatpush3.msra.mxu0 %v1363_v1 }
  0x28   :  { %1279 = vmatprep.subr.mxu1 %v1363_v1  ;;  %1145 = vmatmul.mubr.f32.gmra.mxu0 %v57_v22 }
  0x29   :  { %1201 = vmatmul.mubr.f32.gmra.mxu1 %v935_v23  ;;  %1225 = vmatprep.subr.mxu0 %v1372_v2 }
  0x2a   :  { %1280 = vmatpush3.msra.mxu1 %v1363_v1  ;;  %1226 = vmatpush3.msra.mxu0 %v1372_v2  ;;  %v972_v1 = vld [vmem:[%s1957_s0 + $0x1c0] sm:$0xff] }
  0x2b   :  { %1281 = vmatprep.subr.mxu1 %v1372_v2  ;;  %1227 = vmatprep.subr.mxu0 %v1381_v3 }
  0x2c   :  { %1282 = vmatpush3.msra.mxu1 %v1372_v2  ;;  %1147 = vmatprep.mubr.f32.mxu0 %v58_v24  ;;  %v957_v2 = vld [vmem:[%s1957_s0 + $0x188] sm:$0xff] }
  0x2d   :  { %1203 = vmatprep.mubr.f32.mxu1 %v936_v25  ;;  %1228 = vmatpush3.msra.mxu0 %v1381_v3 }
  0x2e   :  { %1283 = vmatprep.subr.mxu1 %v1381_v3  ;;  %1148 = vmatmul.mubr.f32.gmra.mxu0 %v59_v26 }
  0x2f   :  { %1204 = vmatmul.mubr.f32.gmra.mxu1 %v937_v27  ;;  %1229 = vmatprep.subr.mxu0 %v1390_v4 }
  0x30   :  { %1284 = vmatpush3.msra.mxu1 %v1381_v3  ;;  %1230 = vmatpush3.msra.mxu0 %v1390_v4  ;;  %v958_v3 = vld [vmem:[%s1957_s0 + $0x190] sm:$0xff] }
  0x31   :  { %1285 = vmatprep.subr.mxu1 %v1390_v4  ;;  %1231 = vmatprep.subr.mxu0 %v1399_v5 }
  0x32   :  { %1286 = vmatpush3.msra.mxu1 %v1390_v4  ;;  %1150 = vmatprep.mubr.f32.mxu0 %v60_v28  ;;  %v973_v4 = vld [vmem:[%s1957_s0 + $0x1c8] sm:$0xff] }
  0x33   :  { %1206 = vmatprep.mubr.f32.mxu1 %v938_v29  ;;  %1232 = vmatpush3.msra.mxu0 %v1399_v5 }
  0x34   :  { %1287 = vmatprep.subr.mxu1 %v1399_v5  ;;  %1151 = vmatmul.mubr.f32.gmra.mxu0 %v61_v30 }
  0x35   :  { %1207 = vmatmul.mubr.f32.gmra.mxu1 %v939_v31  ;;  %1233 = vmatprep.subr.mxu0 %v1408_v6 }
  0x36   :  { %1288 = vmatpush3.msra.mxu1 %v1399_v5  ;;  %1234 = vmatpush3.msra.mxu0 %v1408_v6  ;;  %v974_v5 = vld [vmem:[%s1957_s0 + $0x1d0] sm:$0xff] }
  0x37   :  { %1289 = vmatprep.subr.mxu1 %v1408_v6  ;;  %1235 = vmatprep.subr.mxu0 %v1417_v7 }
  0x38   :  { %1290 = vmatpush3.msra.mxu1 %v1408_v6  ;;  %1153 = vmatprep.mubr.f32.mxu0 %v62_v32  ;;  %v959_v6 = vld [vmem:[%s1957_s0 + $0x198] sm:$0xff] }
  0x39   :  { %1209 = vmatprep.mubr.f32.mxu1 %v940_v33  ;;  %1236 = vmatpush3.msra.mxu0 %v1417_v7 }
  0x3a   :  { %1291 = vmatprep.subr.mxu1 %v1417_v7  ;;  %1154 = vmatmul.mubr.f32.gmra.mxu0 %v63_v34 }
  0x3b   :  { %1210 = vmatmul.mubr.f32.gmra.mxu1 %v941_v35  ;;  %1237 = vmatprep.subr.mxu0 %v1426_v8 }
  0x3c   :  { %1292 = vmatpush3.msra.mxu1 %v1417_v7  ;;  %1238 = vmatpush3.msra.mxu0 %v1426_v8  ;;  %v960_v7 = vld [vmem:[%s1957_s0 + $0x1a0] sm:$0xff] }
  0x3d   :  { %1293 = vmatprep.subr.mxu1 %v1426_v8  ;;  %1239 = vmatprep.subr.mxu0 %v1435_v9 }
  0x3e   :  { %1294 = vmatpush3.msra.mxu1 %v1426_v8  ;;  %1156 = vmatprep.mubr.f32.mxu0 %v64_v36  ;;  %v975_v8 = vld [vmem:[%s1957_s0 + $0x1d8] sm:$0xff] }
  0x3f   :  { %1212 = vmatprep.mubr.f32.mxu1 %v942_v37  ;;  %1240 = vmatpush3.msra.mxu0 %v1435_v9 }
  0x40   :  { %1295 = vmatprep.subr.mxu1 %v1435_v9  ;;  %1157 = vmatmul.mubr.f32.gmra.mxu0 %v65_v38 }
  0x41   :  { %1213 = vmatmul.mubr.f32.gmra.mxu1 %v943_v39  ;;  %1241 = vmatprep.subr.mxu0 %v1444_v10 }
  0x42   :  { %1296 = vmatpush3.msra.mxu1 %v1435_v9  ;;  %1242 = vmatpush3.msra.mxu0 %v1444_v10  ;;  %v976_v9 = vld [vmem:[%s1957_s0 + $0x1e0] sm:$0xff] }
  0x43   :  { %1297 = vmatprep.subr.mxu1 %v1444_v10  ;;  %1243 = vmatprep.subr.mxu0 %v1453_v11 }
  0x44   :  { %1298 = vmatpush3.msra.mxu1 %v1444_v10  ;;  %1159 = vmatprep.mubr.f32.mxu0 %v66_v40  ;;  %v961_v10 = vld [vmem:[%s1957_s0 + $0x1a8] sm:$0xff] }
  0x45   :  { %1215 = vmatprep.mubr.f32.mxu1 %v944_v41  ;;  %1244 = vmatpush3.msra.mxu0 %v1453_v11 }
  0x46   :  { %1299 = vmatprep.subr.mxu1 %v1453_v11  ;;  %1160 = vmatmul.mubr.f32.gmra.mxu0 %v67_v42 }
  0x47   :  { %1216 = vmatmul.mubr.f32.gmra.mxu1 %v945_v43  ;;  %1245 = vmatprep.subr.mxu0 %v1462_v12 }
  0x48   :  { %1300 = vmatpush3.msra.mxu1 %v1453_v11  ;;  %1246 = vmatpush3.msra.mxu0 %v1462_v12  ;;  %v962_v11 = vld [vmem:[%s1957_s0 + $0x1b0] sm:$0xff] }
  0x49   :  { %1301 = vmatprep.subr.mxu1 %v1462_v12  ;;  %1247 = vmatprep.subr.mxu0 %v1471_v13 }
  0x4a   :  { %1302 = vmatpush3.msra.mxu1 %v1462_v12  ;;  %1162 = vmatprep.mubr.f32.mxu0 %v68_v44  ;;  %v977_v12 = vld [vmem:[%s1957_s0 + $0x1e8] sm:$0xff] }
  0x4b   :  { %1218 = vmatprep.mubr.f32.mxu1 %v946_v45  ;;  %1248 = vmatpush3.msra.mxu0 %v1471_v13 }
  0x4c   :  { %1303 = vmatprep.subr.mxu1 %v1471_v13  ;;  %1163 = vmatmul.mubr.f32.gmra.mxu0 %v69_v46 }
  0x4d   :  { %1219 = vmatmul.mubr.f32.gmra.mxu1 %v947_v47  ;;  %1249 = vmatprep.subr.mxu0 %v1480_v14 }
  0x4e   :  { %1304 = vmatpush3.msra.mxu1 %v1471_v13  ;;  %1250 = vmatpush3.msra.mxu0 %v1480_v14  ;;  %v978_v13 = vld [vmem:[%s1957_s0 + $0x1f0] sm:$0xff] }
  0x4f   :  { %1305 = vmatprep.subr.mxu1 %v1480_v14  ;;  %1251 = vmatprep.subr.mxu0 %v1489_v15 }
  0x50   :  { %1306 = vmatpush3.msra.mxu1 %v1480_v14  ;;  %1252 = vmatpush3.msra.mxu0 %v1489_v15  ;;  %v963_v14 = vld [vmem:[%s1957_s0 + $0x1b8] sm:$0xff] }
  0x51   :  { %1253 = vmatprep.mubr.f32.mxu0 %v948_v48  ;;  %1307 = vmatprep.subr.mxu1 %v1489_v15 }
  0x52   :  { %1254 = vmatmul.mubr.f32.vlgmr.msra.gmra.mxu0 %v949_v49  ;;  %1308 = vmatpush3.msra.mxu1 %v1489_v15  ;;  %v979_v15 = vld [vmem:[%s1957_s0 + $0x1f8] sm:$0xff] }
  0x53   :  { %1309 = vmatprep.mubr.f32.mxu1 %v964_v50  ;;  %1256 = vmatprep.mubr.f32.mxu0 %v950_v51 }
  0x54   :  { %1310 = vmatmul.mubr.f32.vlgmr.msra.gmra.mxu1 %v965_v52 }
  0x55   :  { %1312 = vmatprep.mubr.f32.mxu1 %v966_v53 }
  0x56   :  { %1257 = vmatmul.mubr.f32.gmra.mxu0 %v951_v54 }
  0x57   :  { %1259 = vmatprep.mubr.f32.mxu0 %v952_v55 }
  0x58   :  { %1313 = vmatmul.mubr.f32.gmra.mxu1 %v967_v56 }
  0x59   :  { %1315 = vmatprep.mubr.f32.mxu1 %v968_v57 }
  0x5a   :  { %1260 = vmatmul.mubr.f32.gmra.mxu0 %v953_v58 }
  0x5b   :  { %1262 = vmatprep.mubr.f32.mxu0 %v954_v59 }
  0x5c   :  { %1316 = vmatmul.mubr.f32.gmra.mxu1 %v969_v60 }
  0x5d   :  { %1318 = vmatprep.mubr.f32.mxu1 %v970_v61 }
  0x5e   :  { %1263 = vmatmul.mubr.f32.gmra.mxu0 %v955_v62 }
  0x5f   :  { %1265 = vmatprep.mubr.f32.mxu0 %v956_v63 }
  0x60   :  { %1319 = vmatmul.mubr.f32.gmra.mxu1 %v971_v0 }
  0x61   :  { %1321 = vmatprep.mubr.f32.mxu1 %v972_v1 }
  0x62   :  { %1266 = vmatmul.mubr.f32.gmra.mxu0 %v957_v2 }
  0x63   :  { %1268 = vmatprep.mubr.f32.mxu0 %v958_v3 }
  0x64   :  { %1322 = vmatmul.mubr.f32.gmra.mxu1 %v973_v4 }
  0x65   :  { %1324 = vmatprep.mubr.f32.mxu1 %v974_v5 }
  0x66   :  { %1269 = vmatmul.mubr.f32.gmra.mxu0 %v959_v6 }
  0x67   :  { %1271 = vmatprep.mubr.f32.mxu0 %v960_v7 }
  0x68   :  { %1325 = vmatmul.mubr.f32.gmra.mxu1 %v975_v8 }
  0x69   :  { %1327 = vmatprep.mubr.f32.mxu1 %v976_v9 }
  0x6a   :  { %1272 = vmatmul.mubr.f32.gmra.mxu0 %v961_v10 }
  0x6b   :  { %1274 = vmatprep.mubr.f32.mxu0 %v962_v11 }
  0x6c   :  { %1328 = vmatmul.mubr.f32.gmra.mxu1 %v977_v12 }
  0x6d   :  { %1330 = vmatprep.mubr.f32.mxu1 %v978_v13 }
  0x6e   :  { %1275 = vmatmul.mubr.f32.gmra.mxu0 %v963_v14 }
  0x70   :  { %1331 = vmatmul.mubr.f32.gmra.mxu1 %v979_v15 }
  0xe3   :  { %v1143_v17 = vpop.f32.mrf.mxu0  ;;  %v1199_v18 = vpop.f32.mrf.mxu1 }
  0xe4   :  { %v394_v49 = vmax.f32 %v1143_v17, %v1199_v18 }
  0xe5   :  { %v152_v19 = vpop.f32.mrf.mxu0  ;;  %v314_v20 = vpop.f32.mrf.mxu1 }
  0xe6   :  { %v393_v51 = vmax.f32 %v152_v19, %v314_v20 }
  0xe8   :  { %v1146_v21 = vpop.f32.mrf.mxu0 }
  0xe9   :  { %v1202_v22 = vpop.f32.mrf.mxu1 }
  0xea   :  { %v162_v23 = vpop.f32.mrf.mxu0  ;;  %v396_v55 = vmax.f32 %v1146_v21, %v1202_v22 }
  0xeb   :  { %v324_v24 = vpop.f32.mrf.mxu1 }
  0xec   :  { %v395_v60 = vmax.f32 %v162_v23, %v324_v24 }
  0xee   :  { %v1149_v25 = vpop.f32.mrf.mxu0 }
  0xef   :  { %v1205_v26 = vpop.f32.mrf.mxu1 }
  0xf0   :  { %v172_v27 = vpop.f32.mrf.mxu0  ;;  %v398_v1 = vmax.f32 %v1149_v25, %v1205_v26 }
  0xf1   :  { %v334_v28 = vpop.f32.mrf.mxu1 }
  0xf2   :  { %v397_v6 = vmax.f32 %v172_v27, %v334_v28 }
  0xf4   :  { %v1758_v29 = vpop.f32.mrf.mxu0 }
  0xf5   :  { %v1208_v30 = vpop.f32.mrf.mxu1 }
  0xf6   :  { %v1760_v31 = vpop.f32.mrf.mxu0  ;;  %v400_v12 = vmax.f32 %v1758_v29, %v1208_v30 }
  0xf7   :  { %v1762_v32 = vpop.f32.mrf.mxu1 }
  0xf8   :  { %v399_v18 = vmax.f32 %v1760_v31, %v1762_v32 }
  0xfa   :  { %v1764_v33 = vpop.f32.mrf.mxu0 }
  0xfb   :  { %v1766_v34 = vpop.f32.mrf.mxu1 }
  0xfc   :  { %v1768_v35 = vpop.f32.mrf.mxu0  ;;  %v402_v24 = vmax.f32 %v1764_v33, %v1766_v34 }
  0xfd   :  { %v1770_v36 = vpop.f32.mrf.mxu1 }
  0xfe   :  { %v401_v30 = vmax.f32 %v1768_v35, %v1770_v36 }
 0x100   :  { %v1772_v37 = vpop.f32.mrf.mxu0 }
 0x101   :  { %v1774_v38 = vpop.f32.mrf.mxu1 }
 0x102   :  { %v1776_v39 = vpop.f32.mrf.mxu0 }
 0x103   :  { %v1778_v40 = vpop.f32.mrf.mxu1 }
 0x106   :  { %v1780_v41 = vpop.f32.mrf.mxu0 }
 0x107   :  { %v1782_v42 = vpop.f32.mrf.mxu1 }
 0x108   :  { %v1784_v43 = vpop.f32.mrf.mxu0 }
 0x109   :  { %v1786_v44 = vpop.f32.mrf.mxu1 }
 0x10c   :  { %v1788_v45 = vpop.f32.mrf.mxu0 }
 0x10d   :  { %v1790_v46 = vpop.f32.mrf.mxu1 }
 0x10e   :  { %v1792_v47 = vpop.f32.mrf.mxu0 }
 0x10f   :  { %v1794_v48 = vpop.f32.mrf.mxu1 }
 0x112   :  { %v1255_v50 = vpop.f32.mrf.mxu0 }
 0x113   :  { %v572_v52 = vmax.f32 %v394_v49, %v1255_v50  ;;  %v404_v50 = vmax.f32 %v1772_v37, %v1774_v38 }
 0x114   :  { %v1311_v53 = vpop.f32.mrf.mxu1  ;;  %v492_v54 = vpop.f32.mrf.mxu0 }
 0x115   :  { %v1796_v56 = vmax.f32 %v572_v52, %v1311_v53  ;;  %v571_v57 = vmax.f32 %v393_v51, %v492_v54  ;;  %v403_v54 = vmax.f32 %v1776_v39, %v1778_v40 }
 0x116   :  { %v670_v58 = vpop.f32.mrf.mxu1  ;;  %v1258_v59 = vpop.f32.mrf.mxu0 }
 0x117   :  { %766 = vst [vmem:[%s1959_s2 + $0x8] sm:$0xff] %v1796_v56  ;;  %v1802_v61 = vmax.f32 %v571_v57, %v670_v58  ;;  %v574_v62 = vmax.f32 %v396_v55, %v1258_v59  ;;  %v406_v59 = vmax.f32 %v1780_v41, %v1782_v42 }
 0x118   :  { %v1314_v63 = vpop.f32.mrf.mxu1  ;;  %v502_v0 = vpop.f32.mrf.mxu0 }
 0x119   :  { %765 = vst [vmem:[%s1959_s2] sm:$0xff] %v1802_v61  ;;  %v1808_v2 = vmax.f32 %v574_v62, %v1314_v63  ;;  %v573_v3 = vmax.f32 %v395_v60, %v502_v0  ;;  %v786_v7 = vadd.f32 %v1796_v56, %v1802_v61  ;;  %v405_v0 = vmax.f32 %v1784_v43, %v1786_v44 }
 0x11a   :  { %v680_v4 = vpop.f32.mrf.mxu1  ;;  %v1261_v5 = vpop.f32.mrf.mxu0 }
 0x11b   :  { %768 = vst [vmem:[%s1959_s2 + $0x18] sm:$0xff] %v1808_v2  ;;  %v1816_v8 = vmax.f32 %v573_v3, %v680_v4  ;;  %v576_v9 = vmax.f32 %v398_v1, %v1261_v5  ;;  %v408_v5 = vmax.f32 %v1788_v45, %v1790_v46 }
 0x11c   :  { %v1317_v10 = vpop.f32.mrf.mxu1  ;;  %v512_v11 = vpop.f32.mrf.mxu0 }
 0x11d   :  { %767 = vst [vmem:[%s1959_s2 + $0x10] sm:$0xff] %v1816_v8  ;;  %v787_v13 = vadd.f32 %v786_v7, %v1816_v8  ;;  %v1824_v14 = vmax.f32 %v576_v9, %v1317_v10  ;;  %v575_v15 = vmax.f32 %v397_v6, %v512_v11  ;;  %v407_v10 = vmax.f32 %v1792_v47, %v1794_v48 }
 0x11e   :  { %v690_v16 = vpop.f32.mrf.mxu1  ;;  %v1264_v17 = vpop.f32.mrf.mxu0 }
 0x11f   :  { %770 = vst [vmem:[%s1959_s2 + $0x28] sm:$0xff] %v1824_v14  ;;  %v1832_v19 = vmax.f32 %v575_v15, %v690_v16  ;;  %v788_v20 = vadd.f32 %v787_v13, %v1808_v2  ;;  %v578_v21 = vmax.f32 %v400_v12, %v1264_v17 }
 0x120   :  { %v1320_v22 = vpop.f32.mrf.mxu1  ;;  %v522_v23 = vpop.f32.mrf.mxu0 }
 0x121   :  { %769 = vst [vmem:[%s1959_s2 + $0x20] sm:$0xff] %v1832_v19  ;;  %v789_v25 = vadd.f32 %v788_v20, %v1832_v19  ;;  %v1842_v26 = vmax.f32 %v578_v21, %v1320_v22  ;;  %v577_v27 = vmax.f32 %v399_v18, %v522_v23 }
 0x122   :  { %v700_v28 = vpop.f32.mrf.mxu1  ;;  %v1267_v29 = vpop.f32.mrf.mxu0 }
 0x123   :  { %772 = vst [vmem:[%s1959_s2 + $0x38] sm:$0xff] %v1842_v26  ;;  %v1850_v31 = vmax.f32 %v577_v27, %v700_v28  ;;  %v790_v32 = vadd.f32 %v789_v25, %v1824_v14  ;;  %v580_v33 = vmax.f32 %v402_v24, %v1267_v29 }
 0x124   :  { %v1323_v34 = vpop.f32.mrf.mxu1  ;;  %v532_v49 = vpop.f32.mrf.mxu0 }
 0x125   :  { %771 = vst [vmem:[%s1959_s2 + $0x30] sm:$0xff] %v1850_v31  ;;  %v791_v35 = vadd.f32 %v790_v32, %v1850_v31  ;;  %v1860_v36 = vmax.f32 %v580_v33, %v1323_v34  ;;  %v579_v51 = vmax.f32 %v401_v30, %v532_v49 }
 0x126   :  { %v710_v52 = vpop.f32.mrf.mxu1  ;;  %v1270_v53 = vpop.f32.mrf.mxu0 }
 0x127   :  { %774 = vst [vmem:[%s1959_s2 + $0x48] sm:$0xff] %v1860_v36  ;;  %v1868_v37 = vmax.f32 %v579_v51, %v710_v52  ;;  %v792_v38 = vadd.f32 %v791_v35, %v1842_v26  ;;  %v582_v55 = vmax.f32 %v404_v50, %v1270_v53 }
 0x128   :  { %v1326_v57 = vpop.f32.mrf.mxu1  ;;  %v542_v58 = vpop.f32.mrf.mxu0 }
 0x129   :  { %773 = vst [vmem:[%s1959_s2 + $0x40] sm:$0xff] %v1868_v37  ;;  %v793_v39 = vadd.f32 %v792_v38, %v1868_v37  ;;  %v1878_v40 = vmax.f32 %v582_v55, %v1326_v57  ;;  %v581_v60 = vmax.f32 %v403_v54, %v542_v58 }
 0x12a   :  { %v720_v62 = vpop.f32.mrf.mxu1  ;;  %v1273_v63 = vpop.f32.mrf.mxu0 }
 0x12b   :  { %776 = vst [vmem:[%s1959_s2 + $0x58] sm:$0xff] %v1878_v40  ;;  %v1886_v41 = vmax.f32 %v581_v60, %v720_v62  ;;  %v794_v42 = vadd.f32 %v793_v39, %v1860_v36  ;;  %v584_v1 = vmax.f32 %v406_v59, %v1273_v63 }
 0x12c   :  { %v1329_v3 = vpop.f32.mrf.mxu1  ;;  %v552_v4 = vpop.f32.mrf.mxu0 }
 0x12d   :  { %775 = vst [vmem:[%s1959_s2 + $0x50] sm:$0xff] %v1886_v41  ;;  %v795_v43 = vadd.f32 %v794_v42, %v1886_v41  ;;  %v1896_v44 = vmax.f32 %v584_v1, %v1329_v3  ;;  %v583_v6 = vmax.f32 %v405_v0, %v552_v4 }
 0x12e   :  { %v730_v7 = vpop.f32.mrf.mxu1  ;;  %v1276_v9 = vpop.f32.mrf.mxu0 }
 0x12f   :  { %778 = vst [vmem:[%s1959_s2 + $0x68] sm:$0xff] %v1896_v44  ;;  %v1904_v45 = vmax.f32 %v583_v6, %v730_v7  ;;  %v796_v46 = vadd.f32 %v795_v43, %v1878_v40  ;;  %v586_v11 = vmax.f32 %v408_v5, %v1276_v9 }
 0x130   :  { %v1332_v12 = vpop.f32.mrf.mxu1  ;;  %v562_v13 = vpop.f32.mrf.mxu0 }
 0x131   :  { %777 = vst [vmem:[%s1959_s2 + $0x60] sm:$0xff] %v1904_v45  ;;  %v797_v15 = vadd.f32 %v796_v46, %v1904_v45  ;;  %v1912_v47 = vmax.f32 %v586_v11, %v1332_v12  ;;  %v585_v48 = vmax.f32 %v407_v10, %v562_v13 }
 0x132   :  { %v740_v16 = vpop.f32.mrf.mxu1 }
 0x133   :  { %780 = vst [vmem:[%s1959_s2 + $0x78] sm:$0xff] %v1912_v47  ;;  %v763_v17 = vmax.f32 %v585_v48, %v740_v16  ;;  %v798_v18 = vadd.f32 %v797_v15, %v1896_v44 }
 0x135   :  { %779 = vst [vmem:[%s1959_s2 + $0x70] sm:$0xff] %v763_v17  ;;  %v799_v20 = vadd.f32 %v798_v18, %v763_v17 }
 0x137   :  { %v800_v21 = vadd.f32 %v799_v20, %v1912_v47 }
 0x139   :  { %v801_v22 = vrot.slane %v800_v21, 4 }
 0x13b   :  { %v802_v23 = vadd.f32 %v801_v22, %v800_v21 }
 0x13d   :  { %v803_v24 = vrot.slane %v802_v23, 2 }
 0x13f   :  { %v804_v25 = vadd.f32 %v803_v24, %v802_v23 }
 0x141   :  { %v805_v27 = vrot.slane %v804_v25, 1 }
 0x143   :  { %v806_v28 = vadd.f32 %v805_v27, %v804_v25 }
 0x145   :  { %v807_v29 = vmul.f32 0.0078125, %v806_v28 }
 0x147   :  { %808 = vst [vmem:[%s1958_s3 + $0x2] sm:$0x1] %v807_v29 }
 0x14e   :  { %v980_v30 = vld [vmem:[%s1958_s3 + $0x2] ss:$0 sm:$0xff] }
 0x14f   :  { %v814_v32 = vsub.f32 %v1802_v61, %v980_v30  ;;  %v815_v33 = vsub.f32 %v1796_v56, %v980_v30  ;;  %v816_v34 = vsub.f32 %v1816_v8, %v980_v30  ;;  %v817_v51 = vsub.f32 %v1808_v2, %v980_v30 }
 0x150   :  { %v818_v53 = vsub.f32 %v1832_v19, %v980_v30  ;;  %v819_v57 = vsub.f32 %v1824_v14, %v980_v30  ;;  %v820_v56 = vsub.f32 %v1850_v31, %v980_v30  ;;  %v821_v62 = vsub.f32 %v1842_v26, %v980_v30 }
 0x151   :  { %v831_v49 = vadd.f32 %v815_v33, %v814_v32  ;;  %v855_v50 = vmul.f32 %v814_v32, %v814_v32  ;;  %v856_v35 = vmul.f32 %v815_v33, %v815_v33  ;;  %v857_v38 = vmul.f32 %v816_v34, %v816_v34 }
 0x152   :  { %v858_v59 = vmul.f32 %v817_v51, %v817_v51  ;;  %v859_v8 = vmul.f32 %v818_v53, %v818_v53  ;;  %v860_v2 = vmul.f32 %v819_v57, %v819_v57  ;;  %v822_v19 = vsub.f32 %v1868_v37, %v980_v30 }
 0x153   :  { %v832_v52 = vadd.f32 %v831_v49, %v816_v34  ;;  %v871_v55 = vadd.f32 %v856_v35, %v855_v50  ;;  %v861_v1 = vmul.f32 %v820_v56, %v820_v56  ;;  %v823_v14 = vsub.f32 %v1860_v36, %v980_v30 }
 0x154   :  { %v862_v5 = vmul.f32 %v821_v62, %v821_v62  ;;  %v824_v31 = vsub.f32 %v1886_v41, %v980_v30  ;;  %v863_v7 = vmul.f32 %v822_v19, %v822_v19  ;;  %v825_v26 = vsub.f32 %v1878_v40, %v980_v30 }
 0x155   :  { %v833_v54 = vadd.f32 %v832_v52, %v817_v51  ;;  %v872_v61 = vadd.f32 %v871_v55, %v857_v38  ;;  %v864_v46 = vmul.f32 %v823_v14, %v823_v14  ;;  %v826_v37 = vsub.f32 %v1904_v45, %v980_v30  ;;  %v854_v55 = vld [vmem:[%s1958_s3 + $0x1] sm:$0x1] }
 0x156   :  { %v865_v13 = vmul.f32 %v824_v31, %v824_v31  ;;  %v827_v36 = vsub.f32 %v1896_v44, %v980_v30  ;;  %v866_v16 = vmul.f32 %v825_v26, %v825_v26  ;;  %v828_v20 = vsub.f32 %v763_v17, %v980_v30 }
 0x157   :  { %v834_v58 = vadd.f32 %v833_v54, %v818_v53  ;;  %v873_v60 = vadd.f32 %v872_v61, %v858_v59  ;;  %v867_v21 = vmul.f32 %v826_v37, %v826_v37  ;;  %v829_v23 = vsub.f32 %v1912_v47, %v980_v30  ;;  %v830_v47 = vld [vmem:[%s1958_s3] sm:$0x1] }
 0x158   :  { %v868_v24 = vmul.f32 %v827_v36, %v827_v36  ;;  %v869_v28 = vmul.f32 %v828_v20, %v828_v20 }
 0x159   :  { %v835_v39 = vadd.f32 %v834_v58, %v819_v57  ;;  %v874_v0 = vadd.f32 %v873_v60, %v859_v8  ;;  %v870_v32 = vmul.f32 %v829_v23, %v829_v23 }
 0x15b   :  { %v836_v63 = vadd.f32 %v835_v39, %v820_v56  ;;  %v875_v3 = vadd.f32 %v874_v0, %v860_v2 }
 0x15d   :  { %v837_v42 = vadd.f32 %v836_v63, %v821_v62  ;;  %v876_v43 = vadd.f32 %v875_v3, %v861_v1 }
 0x15f   :  { %v838_v4 = vadd.f32 %v837_v42, %v822_v19  ;;  %v877_v9 = vadd.f32 %v876_v43, %v862_v5 }
 0x161   :  { %v839_v6 = vadd.f32 %v838_v4, %v823_v14  ;;  %v878_v11 = vadd.f32 %v877_v9, %v863_v7 }
 0x163   :  { %v840_v10 = vadd.f32 %v839_v6, %v824_v31  ;;  %v879_v15 = vadd.f32 %v878_v11, %v864_v46 }
 0x165   :  { %v841_v12 = vadd.f32 %v840_v10, %v825_v26  ;;  %v880_v18 = vadd.f32 %v879_v15, %v865_v13 }
 0x167   :  { %v842_v48 = vadd.f32 %v841_v12, %v826_v37  ;;  %v881_v22 = vadd.f32 %v880_v18, %v866_v16 }
 0x169   :  { %v843_v41 = vadd.f32 %v842_v48, %v827_v36  ;;  %v882_v25 = vadd.f32 %v881_v22, %v867_v21 }
 0x16b   :  { %v844_v40 = vadd.f32 %v843_v41, %v828_v20  ;;  %v883_v45 = vadd.f32 %v882_v25, %v868_v24 }
 0x16d   :  { %v845_v27 = vadd.f32 %v844_v40, %v829_v23  ;;  %v884_v33 = vadd.f32 %v883_v45, %v869_v28 }
 0x16f   :  { %v846_v29 = vrot.slane %v845_v27, 4  ;;  %v885_v44 = vadd.f32 %v884_v33, %v870_v32 }
 0x171   :  { %v847_v34 = vadd.f32 %v846_v29, %v845_v27  ;;  %v886_v50 = vrot.slane %v885_v44, 4 }
 0x173   :  { %v848_v49 = vrot.slane %v847_v34, 2  ;;  %v887_v17 = vadd.f32 %v886_v50, %v885_v44 }
 0x175   :  { %v849_v35 = vadd.f32 %v848_v49, %v847_v34  ;;  %v888_v52 = vrot.slane %v887_v17, 2 }
 0x177   :  { %v850_v51 = vrot.slane %v849_v35, 1  ;;  %v889_v53 = vadd.f32 %v888_v52, %v887_v17 }
 0x179   :  { %v851_v30 = vadd.f32 %v850_v51, %v849_v35  ;;  %v890_v38 = vrot.slane %v889_v53, 1 }
 0x17b   :  { %v852_v54 = vadd.f32 %v851_v30, %v830_v47  ;;  %v891_v57 = vadd.f32 %v890_v38, %v889_v53 }
 0x17d   :  { %853 = vst [vmem:[%s1958_s3] sm:$0x1] %v852_v54  ;;  %v892_v58 = vadd.f32 %v891_v57, %v854_v55 }
 0x17f   :  { %893 = vst [vmem:[%s1958_s3 + $0x1] sm:$0x1] %v892_v58 }

// kernel: conv_group_forward.4
= control target key start
LH: loop header
LB: loop body
LE: loop exit
PB: predicated region body
PF: predicated region fallthrough
CT: control target
= control target key end

     0   :  { %v2587_v3 = vmov 0.0   ;;  %s3961_s2 = inlined_call_operand.vmem [shape: f32[1152,128], index: 2, kind: input, shape index: {}]   ;;  %s3962_s0 = inlined_call_operand.vmem [shape: f32[2,8,8,128], index: 0, kind: input, shape index: {}]   ;;  %s3963_s1 = inlined_call_operand.vmem [shape: f32[2,128], index: 1, kind: input, shape index: {}]   ;;  %s3964_s4 = inlined_call_operand.vmem [shape: f32[8,128], index: 4, kind: output, shape index: {1}]   ;;  %s3965_s3 = inlined_call_operand.vmem [shape: f32[2,8,8,128], index: 3, kind: output, shape index: {0}]  }
   0x1   :  { %v1072_v0 = vld [vmem:[%s3961_s2 + $0xf8] sm:$0xff]  ;;  %v1071_v2 = vld [vmem:[%s3961_s2 + $0xf0] sm:$0xff]  ;;  %61 = vst [vmem:[#allocation2] sm:$0xff] %v2587_v3  ;;  %62 = vst [vmem:[#allocation2 + $0x8] sm:$0x3] %v2587_v3 }
   0x2   :  { %v1056_v1 = vld [vmem:[%s3961_s2 + $0x78] sm:$0xff]  ;;  %63 = vst [vmem:[#allocation2 + $0x10] sm:$0xff] %v2587_v3  ;;  %64 = vst [vmem:[#allocation2 + $0x18] sm:$0x3] %v2587_v3  ;;  %2079 = vmatprep.subr.mxu0 %v1072_v0  ;;  %v1055_v4 = vld [vmem:[%s3961_s2 + $0x70] sm:$0xff] }
   0x3   :  { %65 = vst [vmem:[#allocation2 + $0x20] sm:$0xff] %v2587_v3  ;;  %66 = vst [vmem:[#allocation2 + $0x28] sm:$0x3] %v2587_v3  ;;  %2080 = vmatpush3.msra.mxu0 %v1056_v1  ;;  %v1070_v5 = vld [vmem:[%s3961_s2 + $0xe8] sm:$0xff]  ;;  %v1104_v6 = vld [vmem:[%s3961_s2 + $0x1f8] sm:$0xff] }
   0x4   :  { %67 = vst [vmem:[#allocation2 + $0x30] sm:$0xff] %v2587_v3  ;;  %68 = vst [vmem:[#allocation2 + $0x38] sm:$0x3] %v2587_v3  ;;  %2081 = vmatprep.subr.mxu0 %v1071_v2  ;;  %v1054_v7 = vld [vmem:[%s3961_s2 + $0x68] sm:$0xff]  ;;  %2159 = vmatprep.subr.mxu1 %v1104_v6  ;;  %v1088_v8 = vld [vmem:[%s3961_s2 + $0x178] sm:$0xff] }
   0x5   :  { %69 = vst [vmem:[#allocation2 + $0x40] sm:$0xff] %v2587_v3  ;;  %70 = vst [vmem:[#allocation2 + $0x48] sm:$0x3] %v2587_v3  ;;  %v1103_v9 = vld [vmem:[%s3961_s2 + $0x1f0] sm:$0xff]  ;;  %2082 = vmatpush3.msra.mxu0 %v1055_v4  ;;  %v1069_v10 = vld [vmem:[%s3961_s2 + $0xe0] sm:$0xff]  ;;  %2160 = vmatpush3.msra.mxu1 %v1088_v8 }
   0x6   :  { %71 = vst [vmem:[#allocation2 + $0x50] sm:$0xff] %v2587_v3  ;;  %72 = vst [vmem:[#allocation2 + $0x58] sm:$0x3] %v2587_v3  ;;  %v1087_v11 = vld [vmem:[%s3961_s2 + $0x170] sm:$0xff]  ;;  %2083 = vmatprep.subr.mxu0 %v1070_v5  ;;  %v1053_v12 = vld [vmem:[%s3961_s2 + $0x60] sm:$0xff]  ;;  %2161 = vmatprep.subr.mxu1 %v1103_v9 }
   0x7   :  { %73 = vst [vmem:[#allocation2 + $0x60] sm:$0xff] %v2587_v3  ;;  %74 = vst [vmem:[#allocation2 + $0x68] sm:$0x3] %v2587_v3  ;;  %v1102_v13 = vld [vmem:[%s3961_s2 + $0x1e8] sm:$0xff]  ;;  %2084 = vmatpush3.msra.mxu0 %v1054_v7  ;;  %v1068_v15 = vld [vmem:[%s3961_s2 + $0xd8] sm:$0xff]  ;;  %2162 = vmatpush3.msra.mxu1 %v1087_v11 }
   0x8   :  { %75 = vst [vmem:[#allocation2 + $0x70] sm:$0xff] %v2587_v3  ;;  %76 = vst [vmem:[#allocation2 + $0x78] sm:$0x3] %v2587_v3  ;;  %v1086_v14 = vld [vmem:[%s3961_s2 + $0x168] sm:$0xff]  ;;  %v1101_v16 = vld [vmem:[%s3961_s2 + $0x1e0] sm:$0xff]  ;;  %2085 = vmatprep.subr.mxu0 %v1069_v10  ;;  %2163 = vmatprep.subr.mxu1 %v1102_v13 }
   0x9   :  { %77 = vst [vmem:[#allocation2 + $0x80] sm:$0xff] %v2587_v3  ;;  %78 = vst [vmem:[#allocation2 + $0x88] sm:$0x3] %v2587_v3  ;;  %v1052_v17 = vld [vmem:[%s3961_s2 + $0x58] sm:$0xff]  ;;  %v1085_v18 = vld [vmem:[%s3961_s2 + $0x160] sm:$0xff]  ;;  %2086 = vmatpush3.msra.mxu0 %v1053_v12  ;;  %2164 = vmatpush3.msra.mxu1 %v1086_v14 }
   0xa   :  { %79 = vst [vmem:[#allocation2 + $0x90] sm:$0xff] %v2587_v3  ;;  %80 = vst [vmem:[#allocation2 + $0x98] sm:$0x3] %v2587_v3  ;;  %v1067_v19 = vld [vmem:[%s3961_s2 + $0xd0] sm:$0xff]  ;;  %v1100_v20 = vld [vmem:[%s3961_s2 + $0x1d8] sm:$0xff]  ;;  %2087 = vmatprep.subr.mxu0 %v1068_v15  ;;  %2165 = vmatprep.subr.mxu1 %v1101_v16 }
   0xb   :  { %81 = vst [vmem:[#allocation2 + $0xa0] sm:$0xff] %v2587_v3  ;;  %82 = vst [vmem:[#allocation2 + $0xa8] sm:$0x3] %v2587_v3  ;;  %v1051_v21 = vld [vmem:[%s3961_s2 + $0x50] sm:$0xff]  ;;  %v1084_v22 = vld [vmem:[%s3961_s2 + $0x158] sm:$0xff]  ;;  %2088 = vmatpush3.msra.mxu0 %v1052_v17  ;;  %2166 = vmatpush3.msra.mxu1 %v1085_v18 }
   0xc   :  { %83 = vst [vmem:[#allocation2 + $0xb0] sm:$0xff] %v2587_v3  ;;  %84 = vst [vmem:[#allocation2 + $0xb8] sm:$0x3] %v2587_v3  ;;  %v1066_v23 = vld [vmem:[%s3961_s2 + $0xc8] sm:$0xff]  ;;  %v1099_v24 = vld [vmem:[%s3961_s2 + $0x1d0] sm:$0xff]  ;;  %2089 = vmatprep.subr.mxu0 %v1067_v19  ;;  %2167 = vmatprep.subr.mxu1 %v1100_v20 }
   0xd   :  { %85 = vst [vmem:[#allocation2 + $0xc0] sm:$0xff] %v2587_v3  ;;  %86 = vst [vmem:[#allocation2 + $0xc8] sm:$0x3] %v2587_v3  ;;  %v1050_v25 = vld [vmem:[%s3961_s2 + $0x48] sm:$0xff]  ;;  %v1083_v26 = vld [vmem:[%s3961_s2 + $0x150] sm:$0xff]  ;;  %2090 = vmatpush3.msra.mxu0 %v1051_v21  ;;  %2168 = vmatpush3.msra.mxu1 %v1084_v22 }
   0xe   :  { %87 = vst [vmem:[#allocation2 + $0xd0] sm:$0xff] %v2587_v3  ;;  %88 = vst [vmem:[#allocation2 + $0xd8] sm:$0x3] %v2587_v3  ;;  %v1065_v27 = vld [vmem:[%s3961_s2 + $0xc0] sm:$0xff]  ;;  %v1098_v28 = vld [vmem:[%s3961_s2 + $0x1c8] sm:$0xff]  ;;  %2091 = vmatprep.subr.mxu0 %v1066_v23  ;;  %2169 = vmatprep.subr.mxu1 %v1099_v24 }
   0xf   :  { %89 = vst [vmem:[#allocation2 + $0xe0] sm:$0xff] %v2587_v3  ;;  %90 = vst [vmem:[#allocation2 + $0xe8] sm:$0x3] %v2587_v3  ;;  %v1049_v29 = vld [vmem:[%s3961_s2 + $0x40] sm:$0xff]  ;;  %v1082_v30 = vld [vmem:[%s3961_s2 + $0x148] sm:$0xff]  ;;  %2092 = vmatpush3.msra.mxu0 %v1050_v25  ;;  %2170 = vmatpush3.msra.mxu1 %v1083_v26 }
  0x10   :  { %91 = vst [vmem:[#allocation2 + $0xf0] sm:$0xff] %v2587_v3  ;;  %92 = vst [vmem:[#allocation2 + $0xf8] sm:$0x3] %v2587_v3  ;;  %v1064_v31 = vld [vmem:[%s3961_s2 + $0xb8] sm:$0xff]  ;;  %v1097_v32 = vld [vmem:[%s3961_s2 + $0x1c0] sm:$0xff]  ;;  %2093 = vmatprep.subr.mxu0 %v1065_v27  ;;  %2171 = vmatprep.subr.mxu1 %v1098_v28 }
  0x11   :  { %93 = vst [vmem:[#allocation2 + $0x100] sm:$0xff] %v2587_v3  ;;  %94 = vst [vmem:[#allocation2 + $0x108] sm:$0x3] %v2587_v3  ;;  %v1048_v33 = vld [vmem:[%s3961_s2 + $0x38] sm:$0xff]  ;;  %v1081_v34 = vld [vmem:[%s3961_s2 + $0x140] sm:$0xff]  ;;  %2094 = vmatpush3.msra.mxu0 %v1049_v29  ;;  %2172 = vmatpush3.msra.mxu1 %v1082_v30 }
  0x12   :  { %95 = vst [vmem:[#allocation2 + $0x110] sm:$0xff] %v2587_v3  ;;  %96 = vst [vmem:[#allocation2 + $0x118] sm:$0x3] %v2587_v3  ;;  %v1063_v35 = vld [vmem:[%s3961_s2 + $0xb0] sm:$0xff]  ;;  %v1096_v36 = vld [vmem:[%s3961_s2 + $0x1b8] sm:$0xff]  ;;  %2095 = vmatprep.subr.mxu0 %v1064_v31  ;;  %2173 = vmatprep.subr.mxu1 %v1097_v32 }
  0x13   :  { %97 = vst [vmem:[#allocation2 + $0x120] sm:$0xff] %v2587_v3  ;;  %98 = vst [vmem:[#allocation2 + $0x128] sm:$0x3] %v2587_v3  ;;  %v1047_v37 = vld [vmem:[%s3961_s2 + $0x30] sm:$0xff]  ;;  %v1080_v38 = vld [vmem:[%s3961_s2 + $0x138] sm:$0xff]  ;;  %2096 = vmatpush3.msra.mxu0 %v1048_v33  ;;  %2174 = vmatpush3.msra.mxu1 %v1081_v34 }
  0x14   :  { %99 = vst [vmem:[#allocation2 + $0x130] sm:$0xff] %v2587_v3  ;;  %100 = vst [vmem:[#allocation2 + $0x138] sm:$0x3] %v2587_v3  ;;  %v1062_v39 = vld [vmem:[%s3961_s2 + $0xa8] sm:$0xff]  ;;  %v1095_v40 = vld [vmem:[%s3961_s2 + $0x1b0] sm:$0xff]  ;;  %2097 = vmatprep.subr.mxu0 %v1063_v35  ;;  %2175 = vmatprep.subr.mxu1 %v1096_v36 }
  0x15   :  { %v1046_v41 = vld [vmem:[%s3961_s2 + $0x28] sm:$0xff]  ;;  %v1079_v42 = vld [vmem:[%s3961_s2 + $0x130] sm:$0xff]  ;;  %2098 = vmatpush3.msra.mxu0 %v1047_v37  ;;  %v1061_v43 = vld [vmem:[%s3961_s2 + $0xa0] sm:$0xff]  ;;  %2176 = vmatpush3.msra.mxu1 %v1080_v38 }
  0x16   :  { %v1045_v44 = vld [vmem:[%s3961_s2 + $0x20] sm:$0xff]  ;;  %v1094_v45 = vld [vmem:[%s3961_s2 + $0x1a8] sm:$0xff]  ;;  %2099 = vmatprep.subr.mxu0 %v1062_v39  ;;  %v1060_v46 = vld [vmem:[%s3961_s2 + $0x98] sm:$0xff]  ;;  %2177 = vmatprep.subr.mxu1 %v1095_v40 }
  0x17   :  { %v1078_v47 = vld [vmem:[%s3961_s2 + $0x128] sm:$0xff]  ;;  %v1093_v48 = vld [vmem:[%s3961_s2 + $0x1a0] sm:$0xff]  ;;  %2100 = vmatpush3.msra.mxu0 %v1046_v41  ;;  %2178 = vmatpush3.msra.mxu1 %v1079_v42  ;;  %v1044_v52 = vld [vmem:[%s3961_s2 + $0x18] sm:$0xff] }
  0x18   :  { %v2800_v49 = vld [vmem:[%s3963_s1] ss:$0 sm:$0xff]  ;;  %v2805_v50 = vld [vmem:[%s3963_s1 + $0x1] ss:$0 sm:$0xff]  ;;  %2101 = vmatprep.subr.mxu0 %v1061_v43  ;;  %2179 = vmatprep.subr.mxu1 %v1094_v45  ;;  %v1059_v55 = vld [vmem:[%s3961_s2 + $0x90] sm:$0xff] }
  0x19   :  { %v103_v51 = vld [vmem:[%s3962_s0] sm:$0xff]  ;;  %2102 = vmatpush3.msra.mxu0 %v1045_v44  ;;  %2180 = vmatpush3.msra.mxu1 %v1078_v47  ;;  %v1092_v56 = vld [vmem:[%s3961_s2 + $0x198] sm:$0xff]  ;;  %v104_v57 = vld [vmem:[%s3962_s0 + $0x8] sm:$0xff] }
  0x1a   :  { %v1077_v53 = vld [vmem:[%s3961_s2 + $0x120] sm:$0xff]  ;;  %v123_v54 = vmul.f32 %v2800_v49, %v103_v51  ;;  %2103 = vmatprep.subr.mxu0 %v1060_v46  ;;  %v1043_v58 = vld [vmem:[%s3961_s2 + $0x10] sm:$0xff]  ;;  %2181 = vmatprep.subr.mxu1 %v1093_v48  ;;  %v124_v61 = vmul.f32 %v2800_v49, %v104_v57  ;;  %v1058_v63 = vld [vmem:[%s3961_s2 + $0x88] sm:$0xff] }
  0x1b   :  { %v640_v59 = vld [vmem:[#allocation2 + $0x1] sm:$0xff]  ;;  %v105_v62 = vld [vmem:[%s3962_s0 + $0x10] sm:$0xff]  ;;  %2104 = vmatpush3.msra.mxu0 %v1044_v52  ;;  %2182 = vmatpush3.msra.mxu1 %v1077_v53  ;;  %v1076_v0 = vld [vmem:[%s3961_s2 + $0x118] sm:$0xff] }
  0x1c   :  { %v2830_v60 = vadd.f32 %v2805_v50, %v123_v54  ;;  %v125_v1 = vmul.f32 %v2800_v49, %v105_v62  ;;  %v106_v2 = vld [vmem:[%s3962_s0 + $0x18] sm:$0xff]  ;;  %2105 = vmatprep.subr.mxu0 %v1059_v55  ;;  %v1042_v4 = vld [vmem:[%s3961_s2 + $0x8] sm:$0xff]  ;;  %v1057_v5 = vld [vmem:[%s3961_s2 + $0x80] sm:$0xff]  ;;  %2183 = vmatprep.subr.mxu1 %v1092_v56  ;;  %v2859_v8 = vadd.f32 %v2805_v50, %v124_v61 }
  0x1d   :  { %v1091_v6 = vld [vmem:[%s3961_s2 + $0x190] sm:$0xff]  ;;  %v126_v9 = vmul.f32 %v2800_v49, %v106_v2  ;;  %2106 = vmatpush3.msra.mxu0 %v1043_v58  ;;  %v1041_v10 = vld [vmem:[%s3961_s2] sm:$0xff]  ;;  %1249 = vmatprep.mubr.f32.mxu0 %v640_v59  ;;  %v1136_v12 = vld [vmem:[%s3961_s2 + $0x2f8] sm:$0xff] }
  0x1e   :  { %v2856_v7 = vmul.f32 0.70710677, %v2830_v60  ;;  %v1075_v11 = vld [vmem:[%s3961_s2 + $0x110] sm:$0xff]  ;;  %v2872_v13 = vadd.f32 %v2805_v50, %v125_v1  ;;  %2107 = vmatprep.subr.mxu0 %v1058_v63  ;;  %2184 = vmatpush3.msra.mxu1 %v1076_v0  ;;  %v1090_v14 = vld [vmem:[%s3961_s2 + $0x188] sm:$0xff]  ;;  %v1120_v15 = vld [vmem:[%s3961_s2 + $0x278] sm:$0xff]  ;;  %v2940_v55 = vmul.f32 0.5, %v2830_v60 }
  0x1f   :  { %v2882_v17 = vmul.f32 0.70710677, %v2859_v8  ;;  %2108 = vmatpush3.msra.mxu0 %v1042_v4  ;;  %2185 = vmatprep.subr.mxu1 %v1091_v6  ;;  %v1074_v18 = vld [vmem:[%s3961_s2 + $0x108] sm:$0xff]  ;;  %v1089_v19 = vld [vmem:[%s3961_s2 + $0x180] sm:$0xff]  ;;  %v2894_v21 = vadd.f32 %v2805_v50, %v126_v9  ;;  %v1135_v27 = vld [vmem:[%s3961_s2 + $0x2f0] sm:$0xff]  ;;  %v2949_v61 = vmul.f32 0.5, %v2859_v8 }
  0x20   :  { %v191_v16 = vand.u32 2147483647, %v2856_v7  ;;  %v2891_v20 = vmul.f32 0.70710677, %v2872_v13  ;;  %v107_v22 = vld [vmem:[%s3962_s0 + $0x20] sm:$0xff]  ;;  %2109 = vmatprep.subr.mxu0 %v1057_v5  ;;  %2186 = vmatpush3.msra.mxu1 %v1075_v11  ;;  %v1119_v28 = vld [vmem:[%s3961_s2 + $0x270] sm:$0xff] }
  0x21   :  { %v1073_v25 = vld [vmem:[%s3961_s2 + $0x100] sm:$0xff]  ;;  %v192_v26 = vand.u32 2147483647, %v2882_v17  ;;  %2110 = vmatpush3.msra.mxu0 %v1041_v10  ;;  %2187 = vmatprep.subr.mxu1 %v1090_v14  ;;  %v2911_v30 = vmul.f32 0.70710677, %v2894_v21  ;;  %v1134_v34 = vld [vmem:[%s3961_s2 + $0x2e8] sm:$0xff]  ;;  %v127_v36 = vmul.f32 %v2800_v49, %v107_v22 }
  0x22   :  { %v207_v23 = vmul.f32 0.3275911, %v191_v16  ;;  %v415_v24 = vsub.f32 0.0, %v191_v16  ;;  %v193_v29 = vand.u32 2147483647, %v2891_v20  ;;  %1250 = vmatmul.mubr.f32.vlgmr.msra.gmra.mxu0 %v2587_v3  ;;  %2239 = vmatprep.subr.mxu0 %v1136_v12  ;;  %v1168_v35 = vld [vmem:[%s3961_s2 + $0x3f8] sm:$0xff] }
  0x23   :  { %v208_v32 = vmul.f32 0.3275911, %v192_v26  ;;  %v416_v33 = vsub.f32 0.0, %v192_v26  ;;  %2240 = vmatpush3.msra.mxu0 %v1120_v15  ;;  %2188 = vmatpush3.msra.mxu1 %v1074_v18  ;;  %v194_v3 = vand.u32 2147483647, %v2911_v30  ;;  %v108_v39 = vld [vmem:[%s3962_s0 + $0x28] sm:$0xff]  ;;  %v147_v52 = vadd.f32 %v2805_v50, %v127_v36 }
  0x24   :  { %v223_v31 = vadd.f32 1.0, %v207_v23  ;;  %v209_v37 = vmul.f32 0.3275911, %v193_v29  ;;  %v417_v38 = vsub.f32 0.0, %v193_v29  ;;  %2189 = vmatprep.subr.mxu1 %v1089_v19  ;;  %v431_v40 = vmul.f32 %v415_v24, %v191_v16  ;;  %2241 = vmatprep.subr.mxu0 %v1135_v27  ;;  %v1118_v42 = vld [vmem:[%s3961_s2 + $0x268] sm:$0xff]  ;;  %v1133_v45 = vld [vmem:[%s3961_s2 + $0x2e0] sm:$0xff] }
  0x25   :  { %v224_v41 = vadd.f32 1.0, %v208_v32  ;;  %2190 = vmatpush3.msra.mxu1 %v1073_v25  ;;  %2242 = vmatpush3.msra.mxu0 %v1119_v28  ;;  %v432_v43 = vmul.f32 %v416_v33, %v192_v26  ;;  %v210_v46 = vmul.f32 0.3275911, %v194_v3  ;;  %v1117_v48 = vld [vmem:[%s3961_s2 + $0x260] sm:$0xff]  ;;  %v418_v51 = vsub.f32 0.0, %v194_v3  ;;  %v109_v54 = vld [vmem:[%s3962_s0 + $0x30] sm:$0xff] }
  0x26   :  { %2520 = vrcp.f32 %v223_v31  ;;  %v225_v44 = vadd.f32 1.0, %v209_v37  ;;  %2243 = vmatprep.subr.mxu0 %v1134_v34  ;;  %v433_v47 = vmul.f32 %v417_v38, %v193_v29  ;;  %2319 = vmatprep.subr.mxu1 %v1168_v35  ;;  %v128_v53 = vmul.f32 %v2800_v49, %v108_v39  ;;  %v1132_v57 = vld [vmem:[%s3961_s2 + $0x2d8] sm:$0xff]  ;;  %v1131_v1 = vld [vmem:[%s3961_s2 + $0x2d0] sm:$0xff]  ;;  %v1130_v12 = vld [vmem:[%s3961_s2 + $0x2c8] sm:$0xff] }
  0x27   :  { %2522 = vrcp.f32 %v224_v41  ;;  %2244 = vmatpush3.msra.mxu0 %v1118_v42  ;;  %v226_v56 = vadd.f32 1.0, %v210_v46  ;;  %v110_v58 = vld [vmem:[%s3962_s0 + $0x38] sm:$0xff]  ;;  %v447_v59 = vmul.f32 1.442695, %v431_v40  ;;  %v2954_v62 = vmul.f32 0.70710677, %v147_v52 }
  0x28   :  { %2245 = vmatprep.subr.mxu0 %v1133_v45  ;;  %v1116_v60 = vld [vmem:[%s3961_s2 + $0x258] sm:$0xff]  ;;  %v148_v63 = vadd.f32 %v2805_v50, %v128_v53  ;;  %v449_v0 = vmul.f32 1.442695, %v432_v43  ;;  %2524 = vrcp.f32 %v225_v44  ;;  %v129_v2 = vmul.f32 %v2800_v49, %v109_v54  ;;  %v1115_v10 = vld [vmem:[%s3961_s2 + $0x250] sm:$0xff]  ;;  %v1114_v19 = vld [vmem:[%s3961_s2 + $0x248] sm:$0xff] }
  0x29   :  { %2246 = vmatpush3.msra.mxu0 %v1117_v48  ;;  %v130_v4 = vmul.f32 %v2800_v49, %v110_v58  ;;  %v2963_v5 = vmul.f32 0.5, %v2872_v13  ;;  %v451_v6 = vmul.f32 1.442695, %v433_v47  ;;  %v434_v8 = vmul.f32 %v418_v51, %v194_v3  ;;  %v1129_v22 = vld [vmem:[%s3961_s2 + $0x2c0] sm:$0xff]  ;;  %v1128_v35 = vld [vmem:[%s3961_s2 + $0x2b8] sm:$0xff]  ;;  %v1127_v44 = vld [vmem:[%s3961_s2 + $0x2b0] sm:$0xff] }
  0x2a   :  { %2247 = vmatprep.subr.mxu0 %v1132_v57  ;;  %v195_v9 = vand.u32 2147483647, %v2954_v62  ;;  %2526 = vrcp.f32 %v226_v56  ;;  %v2969_v11 = vmul.f32 0.70710677, %v148_v63  ;;  %v149_v13 = vadd.f32 %v2805_v50, %v129_v2  ;;  %v1113_v28 = vld [vmem:[%s3961_s2 + $0x240] sm:$0xff]  ;;  %v1112_v38 = vld [vmem:[%s3961_s2 + $0x238] sm:$0xff] }
  0x2b   :  { %2248 = vmatpush3.msra.mxu0 %v1116_v60  ;;  %v2976_v14 = vadd.f32 %v2805_v50, %v130_v4  ;;  %2528 = vpow2.f32 %v447_v59  ;;  %v2979_v15 = vmul.f32 0.5, %v2894_v21  ;;  %v2987_v23 = vmul.f32 0.5, %v147_v52  ;;  %v111_v21 = vld [vmem:[%s3962_s0 + $0x40] sm:$0xff]  ;;  %v1111_v45 = vld [vmem:[%s3961_s2 + $0x230] sm:$0xff]  ;;  %v112_v51 = vld [vmem:[%s3962_s0 + $0x48] sm:$0xff] }
  0x2c   :  { %v211_v16 = vmul.f32 0.3275911, %v195_v9  ;;  %v419_v18 = vsub.f32 0.0, %v195_v9  ;;  %2249 = vmatprep.subr.mxu0 %v1131_v1  ;;  %2530 = vpow2.f32 %v449_v0  ;;  %v196_v24 = vand.u32 2147483647, %v2969_v11  ;;  %v1126_v56 = vld [vmem:[%s3961_s2 + $0x2a8] sm:$0xff] }
  0x2d   :  { %2250 = vmatpush3.msra.mxu0 %v1115_v10  ;;  %v2990_v25 = vmul.f32 0.70710677, %v149_v13  ;;  %2532 = vpow2.f32 %v451_v6  ;;  %v453_v26 = vmul.f32 1.442695, %v434_v8  ;;  %v2999_v29 = vmul.f32 0.70710677, %v2976_v14 }
  0x2e   :  { %v227_v27 = vadd.f32 1.0, %v211_v16  ;;  %2251 = vmatprep.subr.mxu0 %v1130_v12  ;;  %v435_v31 = vmul.f32 %v419_v18, %v195_v9  ;;  %v212_v32 = vmul.f32 0.3275911, %v196_v24  ;;  %v420_v33 = vsub.f32 0.0, %v196_v24  ;;  %v1110_v0 = vld [vmem:[%s3961_s2 + $0x228] sm:$0xff]  ;;  %v1125_v8 = vld [vmem:[%s3961_s2 + $0x2a0] sm:$0xff] }
  0x2f   :  { %2252 = vmatpush3.msra.mxu0 %v1114_v19  ;;  %v197_v34 = vand.u32 2147483647, %v2990_v25  ;;  %v3005_v36 = vmul.f32 0.5, %v148_v63  ;;  %v198_v37 = vand.u32 2147483647, %v2999_v29  ;;  %v131_v3 = vmul.f32 %v2800_v49, %v111_v21  ;;  %v1109_v18 = vld [vmem:[%s3961_s2 + $0x220] sm:$0xff] }
  0x30   :  { %2534 = vrcp.f32 %v227_v27  ;;  %2253 = vmatprep.subr.mxu0 %v1129_v22  ;;  %v228_v40 = vadd.f32 1.0, %v212_v32  ;;  %v436_v41 = vmul.f32 %v420_v33, %v196_v24  ;;  %v455_v52 = vmul.f32 1.442695, %v435_v31  ;;  %v1124_v19 = vld [vmem:[%s3961_s2 + $0x298] sm:$0xff] }
  0x31   :  { %v213_v42 = vmul.f32 0.3275911, %v197_v34  ;;  %v421_v43 = vsub.f32 0.0, %v197_v34  ;;  %2254 = vmatpush3.msra.mxu0 %v1113_v28  ;;  %2536 = vpow2.f32 %v453_v26  ;;  %v214_v47 = vmul.f32 0.3275911, %v198_v37  ;;  %v1108_v31 = vld [vmem:[%s3961_s2 + $0x218] sm:$0xff] }
  0x32   :  { %v422_v48 = vsub.f32 0.0, %v198_v37  ;;  %2255 = vmatprep.subr.mxu0 %v1128_v35  ;;  %2538 = vrcp.f32 %v228_v40  ;;  %v3030_v63 = vadd.f32 %v2805_v50, %v131_v3  ;;  %v457_v2 = vmul.f32 1.442695, %v436_v41 }
  0x33   :  { %v3012_v39 = vpop.eup %2520  ;;  %v229_v53 = vadd.f32 1.0, %v213_v42  ;;  %v437_v54 = vmul.f32 %v421_v43, %v197_v34  ;;  %2256 = vmatpush3.msra.mxu0 %v1112_v38  ;;  %v230_v59 = vadd.f32 1.0, %v214_v47  ;;  %v3036_v4 = vmul.f32 0.5, %v149_v13  ;;  %v113_v13 = vld [vmem:[%s3962_s0 + $0x50] sm:$0xff]  ;;  %v1122_v43 = vld [vmem:[%s3961_s2 + $0x288] sm:$0xff] }
  0x34   :  { %v271_v46 = vmul.f32 1.0614054, %v3012_v39  ;;  %v3027_v57 = vpop.eup %2522  ;;  %v438_v60 = vmul.f32 %v422_v48, %v198_v37  ;;  %2257 = vmatprep.subr.mxu0 %v1127_v44  ;;  %v132_v6 = vmul.f32 %v2800_v49, %v112_v51  ;;  %v3046_v16 = vmul.f32 0.5, %v2976_v14  ;;  %v1123_v37 = vld [vmem:[%s3961_s2 + $0x290] sm:$0xff] }
  0x35   :  { %v272_v1 = vmul.f32 1.0614054, %v3027_v57  ;;  %2258 = vmatpush3.msra.mxu0 %v1111_v45  ;;  %v3042_v9 = vpop.eup %2524  ;;  %2540 = vrcp.f32 %v229_v53  ;;  %v459_v12 = vmul.f32 1.442695, %v437_v54  ;;  %v3059_v14 = vmul.f32 0.70710677, %v3030_v63 }
  0x36   :  { %v287_v58 = vadd.f32 -1.4531521, %v271_v46  ;;  %2259 = vmatprep.subr.mxu0 %v1126_v56  ;;  %v273_v24 = vmul.f32 1.0614054, %v3042_v9  ;;  %2542 = vpow2.f32 %v455_v52  ;;  %v461_v27 = vmul.f32 1.442695, %v438_v60 }
  0x37   :  { %v288_v22 = vadd.f32 -1.4531521, %v272_v1  ;;  %2260 = vmatpush3.msra.mxu0 %v1110_v0  ;;  %v3061_v21 = vpop.eup %2526  ;;  %2544 = vrcp.f32 %v230_v59  ;;  %v3064_v28 = vadd.f32 %v2805_v50, %v132_v6  ;;  %v199_v40 = vand.u32 2147483647, %v3059_v14  ;;  %v1107_v42 = vld [vmem:[%s3961_s2 + $0x210] sm:$0xff]  ;;  %v1106_v54 = vld [vmem:[%s3961_s2 + $0x208] sm:$0xff] }
  0x38   :  { %v303_v10 = vmul.f32 %v3012_v39, %v287_v58  ;;  %2261 = vmatprep.subr.mxu0 %v1125_v8  ;;  %v3069_v32 = vpop.eup %2528  ;;  %v289_v34 = vadd.f32 -1.4531521, %v273_v24  ;;  %v274_v35 = vmul.f32 1.0614054, %v3061_v21  ;;  %2546 = vpow2.f32 %v457_v2  ;;  %v1121_v1 = vld [vmem:[%s3961_s2 + $0x280] sm:$0xff] }
  0x39   :  { %v304_v33 = vmul.f32 %v3027_v57, %v288_v22  ;;  %2262 = vmatpush3.msra.mxu0 %v1109_v18  ;;  %v3076_v38 = vpop.eup %2530  ;;  %2548 = vpow2.f32 %v459_v12  ;;  %v3081_v41 = vmul.f32 %v2800_v49, %v113_v13  ;;  %v3093_v48 = vmul.f32 0.70710677, %v3064_v28  ;;  %v1105_v12 = vld [vmem:[%s3961_s2 + $0x200] sm:$0xff]  ;;  %v3116_v13 = vld [vmem:[%s3961_s2 + $0x478] sm:$0xff] }
  0x3a   :  { %v319_v26 = vadd.f32 1.4214138, %v303_v10  ;;  %2263 = vmatprep.subr.mxu0 %v1124_v19  ;;  %v3089_v44 = vpop.eup %2532  ;;  %v305_v46 = vmul.f32 %v3042_v9, %v289_v34  ;;  %v290_v47 = vadd.f32 -1.4531521, %v274_v35  ;;  %2550 = vpow2.f32 %v461_v27 }
  0x3b   :  { %v320_v45 = vadd.f32 1.4214138, %v304_v33  ;;  %2264 = vmatpush3.msra.mxu0 %v1108_v31  ;;  %v215_v52 = vmul.f32 0.3275911, %v199_v40  ;;  %v423_v53 = vsub.f32 0.0, %v199_v40  ;;  %vm511_vm0 = vcmp.ge.f32.partialorder %v2856_v7, 0.0 }
  0x3c   :  { %v335_v3 = vmul.f32 %v3012_v39, %v319_v26  ;;  %2265 = vmatprep.subr.mxu0 %v1123_v37  ;;  %v321_v59 = vadd.f32 1.4214138, %v305_v46  ;;  %v306_v60 = vmul.f32 %v3061_v21, %v290_v47  ;;  %v3103_v0 = vand.u32 2147483647, %v3093_v48 }
  0x3d   :  { %v3098_v56 = vpop.eup %2534  ;;  %v336_v58 = vmul.f32 %v3027_v57, %v320_v45  ;;  %2266 = vmatpush3.msra.mxu0 %v1107_v42  ;;  %v231_v8 = vadd.f32 1.0, %v215_v52  ;;  %v439_v10 = vmul.f32 %v423_v53, %v199_v40  ;;  %vm512_vm1 = vcmp.ge.f32.partialorder %v2882_v17, 0.0 }
  0x3e   :  { %v351_v51 = vadd.f32 -0.28449672, %v335_v3  ;;  %v275_v6 = vmul.f32 1.0614054, %v3098_v56  ;;  %2267 = vmatprep.subr.mxu0 %v1122_v43  ;;  %v3118_v18 = vpop.eup %2536  ;;  %v337_v22 = vmul.f32 %v3042_v9, %v321_v59  ;;  %v322_v24 = vadd.f32 1.4214138, %v306_v60 }
  0x3f   :  { %v352_v19 = vadd.f32 -0.28449672, %v336_v58  ;;  %v216_v26 = vmul.f32 0.3275911, %v3103_v0  ;;  %2268 = vmatpush3.msra.mxu0 %v1106_v54  ;;  %v3123_v27 = vpop.eup %2538  ;;  %2552 = vrcp.f32 %v231_v8  ;;  %v463_v34 = vmul.f32 1.442695, %v439_v10 }
  0x40   :  { %v367_v2 = vmul.f32 %v3012_v39, %v351_v51  ;;  %v291_v33 = vadd.f32 -1.4531521, %v275_v6  ;;  %2269 = vmatprep.subr.mxu0 %v1121_v1  ;;  %v353_v37 = vadd.f32 -0.28449672, %v337_v22  ;;  %v338_v3 = vmul.f32 %v3061_v21, %v322_v24 }
  0x41   :  { %v368_v35 = vmul.f32 %v3027_v57, %v352_v19  ;;  %v276_v40 = vmul.f32 1.0614054, %v3123_v27  ;;  %2270 = vmatpush3.msra.mxu0 %v1105_v12  ;;  %2554 = vpow2.f32 %v463_v34  ;;  %v232_v45 = vadd.f32 1.0, %v216_v26 }
  0x42   :  { %v383_v31 = vadd.f32 0.2548296, %v367_v2  ;;  %v307_v43 = vmul.f32 %v3098_v56, %v291_v33  ;;  %2431 = vmatprep.subr.mxu0 %v3116_v13  ;;  %v3132_v46 = vpop.eup %2540  ;;  %v369_v51 = vmul.f32 %v3042_v9, %v353_v37  ;;  %v354_v52 = vadd.f32 -0.28449672, %v338_v3 }
  0x43   :  { %v384_v47 = vadd.f32 0.2548296, %v368_v35  ;;  %v292_v53 = vadd.f32 -1.4531521, %v276_v40  ;;  %v3135_v54 = vpop.eup %2542  ;;  %vm513_vm2 = vcmp.ge.f32.partialorder %v2891_v20, 0.0  ;;  %2556 = vrcp.f32 %v232_v45 }
  0x44   :  { %v399_v42 = vmul.f32 %v3012_v39, %v383_v31  ;;  %v323_v39 = vadd.f32 1.4214138, %v307_v43  ;;  %v277_v59 = vmul.f32 1.0614054, %v3132_v46  ;;  %v3140_v60 = vpop.eup %2544  ;;  %v385_v2 = vadd.f32 0.2548296, %v369_v51 }
  0x45   :  { %v400_v1 = vmul.f32 %v3027_v57, %v384_v47  ;;  %v370_v6 = vmul.f32 %v3061_v21, %v354_v52  ;;  %v308_v8 = vmul.f32 %v3123_v27, %v292_v53  ;;  %v3145_v10 = vpop.eup %2546  ;;  %vm514_vm3 = vcmp.ge.f32.partialorder %v2911_v30, 0.0 }
  0x46   :  { %v479_v58 = vmul.f32 %v3069_v32, %v399_v42  ;;  %v339_v32 = vmul.f32 %v3098_v56, %v323_v39  ;;  %v293_v19 = vadd.f32 -1.4531521, %v277_v59  ;;  %v278_v22 = vmul.f32 1.0614054, %v3140_v60  ;;  %v3150_v24 = vpop.eup %2548 }
  0x47   :  { %v480_v26 = vmul.f32 %v3076_v38, %v400_v1  ;;  %v401_v57 = vmul.f32 %v3042_v9, %v385_v2  ;;  %v386_v31 = vadd.f32 0.2548296, %v370_v6  ;;  %v324_v33 = vadd.f32 1.4214138, %v308_v8  ;;  %v3155_v40 = vpop.eup %2550 }
  0x48   :  { %v495_v12 = vsub.f32 1.0, %v479_v58  ;;  %v355_v35 = vadd.f32 -0.28449672, %v339_v32  ;;  %v309_v37 = vmul.f32 %v3132_v46, %v293_v19  ;;  %v294_v3 = vadd.f32 -1.4531521, %v278_v22 }
  0x49   :  { %v496_v42 = vsub.f32 1.0, %v480_v26  ;;  %v481_v43 = vmul.f32 %v3089_v44, %v401_v57  ;;  %v402_v45 = vmul.f32 %v3061_v21, %v386_v31  ;;  %v340_v47 = vmul.f32 %v3123_v27, %v324_v33 }
  0x4a   :  { %v527_v34 = vsub.f32 0.0, %v495_v12  ;;  %v371_v9 = vmul.f32 %v3098_v56, %v355_v35  ;;  %v325_v51 = vadd.f32 1.4214138, %v309_v37  ;;  %v310_v52 = vmul.f32 %v3140_v60, %v294_v3 }
  0x4b   :  { %v528_v58 = vsub.f32 0.0, %v496_v42  ;;  %v497_v39 = vsub.f32 1.0, %v481_v43  ;;  %v482_v59 = vmul.f32 %v3118_v18, %v402_v45  ;;  %vm515_vm4 = vcmp.ge.f32.partialorder %v2954_v62, 0.0 }
  0x4c   :  { %v543_v38 = vsel %vm511_vm0, %v495_v12, %v527_v34  ;;  %v387_v44 = vadd.f32 0.2548296, %v371_v9  ;;  %v356_v1 = vadd.f32 -0.28449672, %v340_v47  ;;  %v341_v21 = vmul.f32 %v3132_v46, %v325_v51  ;;  %v3167_v6 = vpop.eup %2552 }
  0x4d   :  { %v559_v53 = vadd.f32 1.0, %v543_v38  ;;  %v326_v2 = vadd.f32 1.4214138, %v310_v52  ;;  %v544_v8 = vsel %vm512_vm1, %v496_v42, %v528_v58  ;;  %v529_v12 = vsub.f32 0.0, %v497_v39 }
  0x4e   :  { %v498_v32 = vsub.f32 1.0, %v482_v59  ;;  %v560_v19 = vadd.f32 1.0, %v544_v8  ;;  %v403_v22 = vmul.f32 %v3098_v56, %v387_v44  ;;  %v372_v18 = vmul.f32 %v3123_v27, %v356_v1  ;;  %v3174_v57 = vpop.eup %2554 }
  0x4f   :  { %v575_v7 = vmul.f32 %v559_v53, %v2940_v55  ;;  %v357_v26 = vadd.f32 -0.28449672, %v341_v21  ;;  %v545_v31 = vsel %vm513_vm2, %v497_v39, %v529_v12  ;;  %vm516_vm5 = vcmp.ge.f32.partialorder %v2969_v11, 0.0  ;;  %v672_v53 = vld [vmem:[#allocation2 + $0x2] sm:$0xff] }
  0x50   :  { %v530_v33 = vsub.f32 0.0, %v498_v32  ;;  %v342_v17 = vmul.f32 %v3140_v60, %v326_v2  ;;  %v279_v55 = vmul.f32 1.0614054, %v3167_v6  ;;  %v576_v34 = vmul.f32 %v560_v19, %v2949_v61  ;;  %v3183_v3 = vpop.eup %2556  ;;  %v1150_v11 = vld [vmem:[%s3961_s2 + $0x368] sm:$0xff] }
  0x51   :  { %592 = vst [vmem:[#allocation2 + $0x11] sm:$0xff] %v575_v7  ;;  %1254 = vmatprep.mubr.f32.mxu0 %v575_v7  ;;  %v561_v56 = vadd.f32 1.0, %v545_v31  ;;  %v483_v35 = vmul.f32 %v3135_v54, %v403_v22  ;;  %v388_v37 = vadd.f32 0.2548296, %v372_v18  ;;  %v373_v20 = vmul.f32 %v3132_v46, %v357_v26  ;;  %v1152_v7 = vld [vmem:[%s3961_s2 + $0x378] sm:$0xff] }
  0x52   :  { %v546_v42 = vsel %vm514_vm3, %v498_v32, %v530_v33  ;;  %v358_v43 = vadd.f32 -0.28449672, %v342_v17  ;;  %v295_v45 = vadd.f32 -1.4531521, %v279_v55  ;;  %593 = vst [vmem:[#allocation2 + $0x21] sm:$0xff] %v576_v34  ;;  %v424_v59 = vsub.f32 0.0, %v3103_v0 }
  0x53   :  { %v3189_v47 = vmul.f32 %v561_v56, %v2963_v5  ;;  %v562_v38 = vadd.f32 1.0, %v546_v42  ;;  %v499_v9 = vsub.f32 1.0, %v483_v35  ;;  %v404_v61 = vmul.f32 %v3123_v27, %v388_v37  ;;  %v1167_v32 = vld [vmem:[%s3961_s2 + $0x3f0] sm:$0xff]  ;;  %v1166_v35 = vld [vmem:[%s3961_s2 + $0x3e8] sm:$0xff] }
  0x54   :  { %v389_v51 = vadd.f32 0.2548296, %v373_v20  ;;  %v374_v54 = vmul.f32 %v3140_v60, %v358_v43  ;;  %v311_v52 = vmul.f32 %v3167_v6, %v295_v45  ;;  %v280_v30 = vmul.f32 1.0614054, %v3183_v3 }
  0x55   :  { %594 = vst [vmem:[#allocation2 + $0x31] sm:$0xff] %v3189_v47  ;;  %v3197_v58 = vmul.f32 %v562_v38, %v2979_v15  ;;  %v531_v39 = vsub.f32 0.0, %v499_v9  ;;  %v484_v5 = vmul.f32 %v3145_v10, %v404_v61  ;;  %v440_v10 = vmul.f32 %v424_v59, %v3103_v0  ;;  %v1165_v38 = vld [vmem:[%s3961_s2 + $0x3e0] sm:$0xff] }
  0x56   :  { %v405_v27 = vmul.f32 %v3132_v46, %v389_v51  ;;  %v390_v44 = vadd.f32 0.2548296, %v374_v54  ;;  %v327_v1 = vadd.f32 1.4214138, %v311_v52  ;;  %v296_v21 = vadd.f32 -1.4531521, %v280_v30 }
  0x57   :  { %595 = vst [vmem:[#allocation2 + $0x41] sm:$0xff] %v3197_v58  ;;  %v547_v15 = vsel %vm515_vm4, %v499_v9, %v531_v39  ;;  %v500_v8 = vsub.f32 1.0, %v484_v5  ;;  %v3211_v12 = vadd.f32 %v2805_v50, %v3081_v41  ;;  %v1151_v41 = vld [vmem:[%s3961_s2 + $0x370] sm:$0xff]  ;;  %vm517_vm6 = vcmp.ge.f32.partialorder %v2990_v25, 0.0  ;;  %v1149_v30 = vld [vmem:[%s3961_s2 + $0x360] sm:$0xff] }
  0x58   :  { %v704_v2 = vld [vmem:[#allocation2 + $0x10] sm:$0xff]  ;;  %v563_v46 = vadd.f32 1.0, %v547_v15  ;;  %v485_v19 = vmul.f32 %v3150_v24, %v405_v27  ;;  %v406_v22 = vmul.f32 %v3140_v60, %v390_v44  ;;  %v343_v62 = vmul.f32 %v3167_v6, %v327_v1  ;;  %v1148_v15 = vld [vmem:[%s3961_s2 + $0x358] sm:$0xff] }
  0x59   :  { %1394 = vmatprep.mubr.f32.mxu1 %v704_v2  ;;  %1255 = vmatmul.mubr.f32.gmra.mxu0 %v704_v2  ;;  %v532_v0 = vsub.f32 0.0, %v500_v8  ;;  %v312_v18 = vmul.f32 %v3183_v3, %v296_v21  ;;  %v465_v26 = vmul.f32 1.442695, %v440_v10  ;;  %v705_v31 = vld [vmem:[#allocation2 + $0x20] sm:$0xff]  ;;  %v673_v33 = vld [vmem:[#allocation2 + $0x12] sm:$0xff]  ;;  %vm518_vm7 = vcmp.ge.f32.partialorder %v2999_v29, 0.0 }
  0x5a   :  { %1395 = vmatmul.mubr.f32.vlgmr.msra.gmra.mxu1 %v672_v53  ;;  %1259 = vmatprep.mubr.f32.mxu0 %v576_v34  ;;  %v3225_v24 = vmul.f32 %v563_v46, %v2987_v23  ;;  %v501_v60 = vsub.f32 1.0, %v485_v19  ;;  %v486_v17 = vmul.f32 %v3155_v40, %v406_v22  ;;  %v359_v55 = vadd.f32 -0.28449672, %v343_v62  ;;  %v114_v34 = vld [vmem:[%s3962_s0 + $0x58] sm:$0xff]  ;;  %v674_v54 = vld [vmem:[#allocation2 + $0x22] sm:$0xff]  ;;  %v1163_v22 = vld [vmem:[%s3961_s2 + $0x3d0] sm:$0xff] }
  0x5b   :  { %2320 = vmatpush3.msra.mxu1 %v1152_v7  ;;  %1399 = vmatprep.mubr.f32.mxu1 %v705_v31  ;;  %v548_v56 = vsel %vm516_vm5, %v500_v8, %v532_v0  ;;  %v328_v37 = vadd.f32 1.4214138, %v312_v18  ;;  %2558 = vpow2.f32 %v465_v26  ;;  %v3237_v23 = vmul.f32 0.70710677, %v3211_v12  ;;  %v115_v2 = vld [vmem:[%s3962_s0 + $0x60] sm:$0xff]  ;;  %v1147_v0 = vld [vmem:[%s3961_s2 + $0x350] sm:$0xff] }
  0x5c   :  { %2321 = vmatprep.subr.mxu1 %v1167_v32  ;;  %v706_v40 = vld [vmem:[#allocation2 + $0x30] sm:$0xff]  ;;  %596 = vst [vmem:[#allocation2 + $0x51] sm:$0xff] %v3225_v24  ;;  %v564_v42 = vadd.f32 1.0, %v548_v56  ;;  %v533_v20 = vsub.f32 0.0, %v501_v60  ;;  %v502_v43 = vsub.f32 1.0, %v486_v17  ;;  %v375_v45 = vmul.f32 %v3167_v6, %v359_v55 }
  0x5d   :  { %1260 = vmatmul.mubr.f32.gmra.mxu0 %v705_v31  ;;  %2322 = vmatpush3.msra.mxu1 %v1151_v41  ;;  %v344_v9 = vmul.f32 %v3183_v3, %v328_v37  ;;  %v3251_v61 = vand.u32 2147483647, %v3237_v23  ;;  %v134_v51 = vmul.f32 %v2800_v49, %v114_v34  ;;  %v675_v10 = vld [vmem:[#allocation2 + $0x32] sm:$0xff]  ;;  %vm519_vm8 = vcmp.ge.f32.partialorder %v3059_v14, 0.0  ;;  %v1162_v31 = vld [vmem:[%s3961_s2 + $0x3c8] sm:$0xff] }
  0x5e   :  { %1400 = vmatmul.mubr.f32.gmra.mxu1 %v673_v33  ;;  %1264 = vmatprep.mubr.f32.mxu0 %v3189_v47  ;;  %v3255_v52 = vmul.f32 %v564_v42, %v3005_v36  ;;  %v549_v47 = vsel %vm517_vm6, %v501_v60, %v533_v20  ;;  %v534_v53 = vsub.f32 0.0, %v502_v43  ;;  %v391_v39 = vadd.f32 0.2548296, %v375_v45  ;;  %v707_v5 = vld [vmem:[#allocation2 + $0x40] sm:$0xff]  ;;  %v1164_v36 = vld [vmem:[%s3961_s2 + $0x3d8] sm:$0xff] }
  0x5f   :  { %1404 = vmatprep.mubr.f32.mxu1 %v706_v40  ;;  %2323 = vmatprep.subr.mxu1 %v1166_v35  ;;  %v565_v59 = vadd.f32 1.0, %v549_v47  ;;  %v360_v27 = vadd.f32 -0.28449672, %v344_v9  ;;  %v217_v44 = vmul.f32 0.3275911, %v3251_v61  ;;  %v3271_v21 = vadd.f32 %v2805_v50, %v134_v51  ;;  %v676_v17 = vld [vmem:[#allocation2 + $0x42] sm:$0xff] }
  0x60   :  { %2324 = vmatpush3.msra.mxu1 %v1150_v11  ;;  %597 = vst [vmem:[#allocation2 + $0x61] sm:$0xff] %v3255_v52  ;;  %v550_v25 = vsel %vm518_vm7, %v502_v43, %v534_v53  ;;  %v407_v1 = vmul.f32 %v3167_v6, %v391_v39  ;;  %v118_v34 = vld [vmem:[%s3962_s0 + $0x78] sm:$0xff]  ;;  %v167_v56 = vmul.f32 0.5, %v3030_v63  ;;  %v1146_v35 = vld [vmem:[%s3961_s2 + $0x348] sm:$0xff]  ;;  %v425_v37 = vsub.f32 0.0, %v3251_v61  ;;  %v1161_v63 = vld [vmem:[%s3961_s2 + $0x3c0] sm:$0xff] }
  0x61   :  { %1265 = vmatmul.mubr.f32.gmra.mxu0 %v706_v40  ;;  %2325 = vmatprep.subr.mxu1 %v1165_v38  ;;  %v3278_v7 = vmul.f32 %v565_v59, %v3036_v4  ;;  %v566_v29 = vadd.f32 1.0, %v550_v25  ;;  %v376_v6 = vmul.f32 %v3183_v3, %v360_v27  ;;  %v233_v8 = vadd.f32 1.0, %v217_v44  ;;  %v116_v4 = vld [vmem:[%s3962_s0 + $0x68] sm:$0xff]  ;;  %v1145_v51 = vld [vmem:[%s3961_s2 + $0x340] sm:$0xff] }
  0x62   :  { %1405 = vmatmul.mubr.f32.gmra.mxu1 %v674_v54  ;;  %1269 = vmatprep.mubr.f32.mxu0 %v3197_v58  ;;  %v487_v46 = vmul.f32 %v3174_v57, %v407_v1  ;;  %v3286_v32 = vmul.f32 0.70710677, %v3271_v21  ;;  %v135_v57 = vmul.f32 %v2800_v49, %v115_v2  ;;  %v136_v60 = vmul.f32 %v2800_v49, %v116_v4  ;;  %v648_v44 = vld [vmem:[#allocation2 + $0xa1] sm:$0xff]  ;;  %v1159_v2 = vld [vmem:[%s3961_s2 + $0x3b0] sm:$0xff] }
  0x63   :  { %1409 = vmatprep.mubr.f32.mxu1 %v707_v5  ;;  %2326 = vmatpush3.msra.mxu1 %v1149_v30  ;;  %v708_v58 = vld [vmem:[#allocation2 + $0x50] sm:$0xff]  ;;  %598 = vst [vmem:[#allocation2 + $0x71] sm:$0xff] %v3278_v7  ;;  %v3293_v19 = vmul.f32 %v566_v29, %v3046_v16  ;;  %v392_v62 = vadd.f32 0.2548296, %v376_v6  ;;  %2560 = vrcp.f32 %v233_v8  ;;  %v138_v54 = vmul.f32 %v2800_v49, %v118_v34  ;;  %v2584_v29 = vld [vmem:[%s3963_s1 + $0x1] ss:$0 sm:$0xff] }
  0x64   :  { %2327 = vmatprep.subr.mxu1 %v1164_v36  ;;  %v503_v41 = vsub.f32 1.0, %v487_v46  ;;  %v3303_v18 = vand.u32 2147483647, %v3286_v32  ;;  %v117_v16 = vld [vmem:[%s3962_s0 + $0x70] sm:$0xff]  ;;  %v3316_v33 = vadd.f32 %v2805_v50, %v135_v57  ;;  %v3338_v45 = vadd.f32 %v2805_v50, %v136_v60 }
  0x65   :  { %1270 = vmatmul.mubr.f32.gmra.mxu0 %v707_v5  ;;  %2328 = vmatpush3.msra.mxu1 %v1148_v15  ;;  %599 = vst [vmem:[#allocation2 + $0x81] sm:$0xff] %v3293_v19  ;;  %v408_v26 = vmul.f32 %v3183_v3, %v392_v62  ;;  %v137_v42 = vmul.f32 %v2800_v49, %v117_v16  ;;  %v3348_v47 = vld [vmem:[#allocation2 + $0x52] sm:$0xff]  ;;  %vm520_vm9 = vcmp.ge.f32.partialorder %v3093_v48, 0.0  ;;  %v168_v25 = vmul.f32 0.5, %v3064_v28  ;;  %v1158_v48 = vld [vmem:[%s3961_s2 + $0x3a8] sm:$0xff] }
  0x66   :  { %1410 = vmatmul.mubr.f32.gmra.mxu1 %v675_v10  ;;  %1274 = vmatprep.mubr.f32.mxu0 %v3225_v24  ;;  %v535_v55 = vsub.f32 0.0, %v503_v41  ;;  %v218_v24 = vmul.f32 0.3275911, %v3303_v18  ;;  %v3329_v40 = vmul.f32 0.70710677, %v3316_v33  ;;  %v441_v5 = vmul.f32 %v425_v37, %v3251_v61  ;;  %v1160_v49 = vld [vmem:[%s3961_s2 + $0x3b8] sm:$0xff] }
  0x67   :  { %1414 = vmatprep.mubr.f32.mxu1 %v708_v58  ;;  %2329 = vmatprep.subr.mxu1 %v1163_v22  ;;  %v709_v3 = vld [vmem:[#allocation2 + $0x60] sm:$0xff]  ;;  %v3351_v30 = vadd.f32 %v2805_v50, %v137_v42  ;;  %v1144_v50 = vld [vmem:[%s3961_s2 + $0x338] sm:$0xff]  ;;  %v3367_v27 = vmul.f32 0.70710677, %v3338_v45  ;;  %v3382_v15 = vadd.f32 %v2584_v29, %v138_v54  ;;  %v426_v8 = vsub.f32 0.0, %v3303_v18  ;;  %v1143_v22 = vld [vmem:[%s3961_s2 + $0x330] sm:$0xff] }
  0x68   :  { %2330 = vmatpush3.msra.mxu1 %v1147_v0  ;;  %v2559_v11 = vpop.eup %2558  ;;  %v551_v20 = vsel %vm519_vm8, %v503_v41, %v535_v55  ;;  %v234_v43 = vadd.f32 1.0, %v218_v24  ;;  %v3345_v14 = vand.u32 2147483647, %v3329_v40  ;;  %v3385_v6 = vld [vmem:[#allocation2 + $0x62] sm:$0xff]  ;;  %vm521_vm10 = vcmp.ge.f32.partialorder %v3237_v23, 0.0 }
  0x69   :  { %1275 = vmatmul.mubr.f32.gmra.mxu0 %v708_v58  ;;  %2331 = vmatprep.subr.mxu1 %v1162_v31  ;;  %v567_v38 = vadd.f32 1.0, %v551_v20  ;;  %v488_v9 = vmul.f32 %v2559_v11, %v408_v26  ;;  %v3370_v61 = vmul.f32 0.70710677, %v3351_v30  ;;  %v3389_v28 = vand.u32 2147483647, %v3367_v27  ;;  %v1142_v26 = vld [vmem:[%s3961_s2 + $0x328] sm:$0xff] }
  0x6a   :  { %1415 = vmatmul.mubr.f32.gmra.mxu1 %v676_v17  ;;  %1279 = vmatprep.mubr.f32.mxu0 %v3255_v52  ;;  %2562 = vrcp.f32 %v234_v43  ;;  %v3353_v52 = vld [vmem:[#allocation2 + $0x70] sm:$0xff]  ;;  %v219_v59 = vmul.f32 0.3275911, %v3345_v14  ;;  %v467_v58 = vmul.f32 1.442695, %v441_v5  ;;  %v442_v55 = vmul.f32 %v426_v8, %v3303_v18  ;;  %v3430_v42 = vld [vmem:[#allocation2] sm:$0xff] }
  0x6b   :  { %1419 = vmatprep.mubr.f32.mxu1 %v709_v3  ;;  %2332 = vmatpush3.msra.mxu1 %v1146_v35  ;;  %v3355_v53 = vmul.f32 %v567_v38, %v167_v56  ;;  %v504_v39 = vsub.f32 1.0, %v488_v9  ;;  %v3392_v10 = vand.u32 2147483647, %v3370_v61  ;;  %v220_v41 = vmul.f32 0.3275911, %v3389_v28  ;;  %v3418_v60 = vld [vmem:[#allocation2 + $0x72] sm:$0xff]  ;;  %1929 = vst [vmem:[%s3964_s4] sm:$0xff] %v3430_v42 }
  0x6c   :  { %2333 = vmatprep.subr.mxu1 %v1161_v63  ;;  %v235_v1 = vadd.f32 1.0, %v219_v59  ;;  %v3394_v46 = vld [vmem:[#allocation2 + $0x80] sm:$0xff]  ;;  %v3415_v31 = vmul.f32 0.70710677, %v3382_v15  ;;  %v427_v56 = vsub.f32 0.0, %v3345_v14  ;;  %v1156_v63 = vld [vmem:[%s3961_s2 + $0x398] sm:$0xff] }
  0x6d   :  { %1280 = vmatmul.mubr.f32.gmra.mxu0 %v709_v3  ;;  %2334 = vmatpush3.msra.mxu1 %v1145_v51  ;;  %600 = vst [vmem:[#allocation2 + $0xb1] sm:$0xff] %v3355_v53  ;;  %v536_v36 = vsub.f32 0.0, %v504_v39  ;;  %v221_v0 = vmul.f32 0.3275911, %v3392_v10  ;;  %v236_v24 = vadd.f32 1.0, %v220_v41  ;;  %v1157_v35 = vld [vmem:[%s3961_s2 + $0x3a0] sm:$0xff] }
  0x6e   :  { %1420 = vmatmul.mubr.f32.gmra.mxu1 %v3348_v47  ;;  %1284 = vmatprep.mubr.f32.mxu0 %v3278_v7  ;;  %2564 = vrcp.f32 %v235_v1  ;;  %v3428_v37 = vand.u32 2147483647, %v3415_v31  ;;  %v1141_v11 = vld [vmem:[%s3961_s2 + $0x320] sm:$0xff]  ;;  %v469_v9 = vmul.f32 1.442695, %v442_v55  ;;  %v1140_v5 = vld [vmem:[%s3961_s2 + $0x318] sm:$0xff] }
  0x6f   :  { %1424 = vmatprep.mubr.f32.mxu1 %v3353_v52  ;;  %2335 = vmatprep.subr.mxu1 %v1160_v49  ;;  %v552_v4 = vsel %vm520_vm9, %v504_v39, %v536_v36  ;;  %v237_v34 = vadd.f32 1.0, %v221_v0  ;;  %2566 = vpow2.f32 %v467_v58  ;;  %v680_v38 = vld [vmem:[#allocation2 + $0xa2] sm:$0xff]  ;;  %v443_v39 = vmul.f32 %v427_v56, %v3345_v14 }
  0x70   :  { %2336 = vmatpush3.msra.mxu1 %v1144_v50  ;;  %v3401_v62 = vpop.eup %2560  ;;  %v568_v57 = vadd.f32 1.0, %v552_v4  ;;  %2568 = vrcp.f32 %v236_v24  ;;  %v222_v43 = vmul.f32 0.3275911, %v3428_v37  ;;  %v428_v50 = vsub.f32 0.0, %v3389_v28  ;;  %v1139_v4 = vld [vmem:[%s3961_s2 + $0x310] sm:$0xff]  ;;  %v1138_v55 = vld [vmem:[%s3961_s2 + $0x308] sm:$0xff] }
  0x71   :  { %1285 = vmatmul.mubr.f32.gmra.mxu0 %v3353_v52  ;;  %2337 = vmatprep.subr.mxu1 %v1159_v2  ;;  %v281_v16 = vmul.f32 1.0614054, %v3401_v62  ;;  %2570 = vrcp.f32 %v237_v34  ;;  %v471_v8 = vmul.f32 1.442695, %v443_v39  ;;  %v430_v41 = vsub.f32 0.0, %v3428_v37  ;;  %v1137_v56 = vld [vmem:[%s3961_s2 + $0x300] sm:$0xff] }
  0x72   :  { %1425 = vmatmul.mubr.f32.gmra.mxu1 %v3385_v6  ;;  %1289 = vmatprep.mubr.f32.mxu0 %v648_v44  ;;  %v3420_v17 = vmul.f32 %v568_v57, %v168_v25  ;;  %v238_v49 = vadd.f32 1.0, %v222_v43  ;;  %v1155_v44 = vld [vmem:[%s3961_s2 + $0x390] sm:$0xff]  ;;  %v429_v25 = vsub.f32 0.0, %v3392_v10  ;;  %v444_v57 = vmul.f32 %v428_v50, %v3389_v28  ;;  %v1153_v28 = vld [vmem:[%s3961_s2 + $0x380] sm:$0xff] }
  0x73   :  { %1429 = vmatprep.mubr.f32.mxu1 %v3394_v46  ;;  %2338 = vmatpush3.msra.mxu1 %v1143_v22  ;;  %v297_v3 = vadd.f32 -1.4531521, %v281_v16  ;;  %vm522_vm11 = vcmp.ge.f32.partialorder %v3286_v32, 0.0  ;;  %vm523_vm12 = vcmp.ge.f32.partialorder %v3329_v40, 0.0  ;;  %vm524_vm13 = vcmp.ge.f32.partialorder %v3367_v27, 0.0 }
  0x74   :  { %2339 = vmatprep.subr.mxu1 %v1158_v48  ;;  %v712_v18 = vld [vmem:[#allocation2 + $0xb0] sm:$0xff]  ;;  %601 = vst [vmem:[#allocation2 + $0xc1] sm:$0xff] %v3420_v17  ;;  %2572 = vrcp.f32 %v238_v49  ;;  %v1154_v48 = vld [vmem:[%s3961_s2 + $0x388] sm:$0xff]  ;;  %vm525_vm14 = vcmp.ge.f32.partialorder %v3370_v61, 0.0  ;;  %vm526_vm15 = vcmp.ge.f32.partialorder %v3415_v31, 0.0 }
  0x75   :  { %1290 = vmatmul.mubr.f32.gmra.mxu0 %v3430_v42  ;;  %2340 = vmatpush3.msra.mxu1 %v1142_v26  ;;  %v313_v20 = vmul.f32 %v3401_v62, %v297_v3  ;;  %v3458_v36 = vld [vmem:[#allocation2 + $0xb2] sm:$0xff]  ;;  %2574 = vpow2.f32 %v469_v9  ;;  %v445_v26 = vmul.f32 %v429_v25, %v3392_v10 }
  0x76   :  { %1430 = vmatmul.mubr.f32.gmra.mxu1 %v3418_v60  ;;  %1294 = vmatprep.mubr.f32.mxu0 %v3355_v53  ;;  %2576 = vpow2.f32 %v471_v8 }
  0x77   :  { %1434 = vmatprep.mubr.f32.mxu1 %v712_v18  ;;  %2341 = vmatprep.subr.mxu1 %v1157_v35  ;;  %v3444_v51 = vpop.eup %2562  ;;  %v329_v54 = vadd.f32 1.4214138, %v313_v20 }
  0x78   :  { %2342 = vmatpush3.msra.mxu1 %v1141_v11  ;;  %v282_v59 = vmul.f32 1.0614054, %v3444_v51  ;;  %v446_v11 = vmul.f32 %v430_v41, %v3428_v37 }
  0x79   :  { %1295 = vmatmul.mubr.f32.gmra.mxu0 %v712_v18  ;;  %2343 = vmatprep.subr.mxu1 %v1156_v63  ;;  %v345_v14 = vmul.f32 %v3401_v62, %v329_v54  ;;  %v473_v18 = vmul.f32 1.442695, %v444_v57 }
  0x7a   :  { %1435 = vmatmul.mubr.f32.gmra.mxu1 %v680_v38  ;;  %1299 = vmatprep.mubr.f32.mxu0 %v3420_v17  ;;  %v298_v1 = vadd.f32 -1.4531521, %v282_v59  ;;  %v475_v38 = vmul.f32 1.442695, %v445_v26 }
  0x7b   :  { %2344 = vmatpush3.msra.mxu1 %v1140_v5  ;;  %v3460_v2 = vld [vmem:[#allocation2 + $0xc0] sm:$0xff]  ;;  %v361_v29 = vadd.f32 -0.28449672, %v345_v14  ;;  %v3465_v58 = vpop.eup %2564  ;;  %2578 = vpow2.f32 %v473_v18 }
  0x7c   :  { %2345 = vmatprep.subr.mxu1 %v1155_v44  ;;  %1439 = vmatprep.mubr.f32.mxu1 %v3460_v2  ;;  %v314_v22 = vmul.f32 %v3444_v51, %v298_v1  ;;  %v283_v16 = vmul.f32 1.0614054, %v3465_v58  ;;  %v2567_v35 = vpop.eup %2566  ;;  %2580 = vpow2.f32 %v475_v38 }
  0x7d   :  { %1300 = vmatmul.mubr.f32.gmra.mxu0 %v3460_v2  ;;  %v377_v0 = vmul.f32 %v3401_v62, %v361_v29  ;;  %2346 = vmatpush3.msra.mxu1 %v1139_v4  ;;  %v3490_v20 = vpop.eup %2568 }
  0x7e   :  { %1440 = vmatmul.mubr.f32.gmra.mxu1 %v3458_v36  ;;  %v330_v24 = vadd.f32 1.4214138, %v314_v22  ;;  %v299_v3 = vadd.f32 -1.4531521, %v283_v16  ;;  %2347 = vmatprep.subr.mxu1 %v1154_v48  ;;  %v3494_v9 = vpop.eup %2570  ;;  %v284_v39 = vmul.f32 1.0614054, %v3490_v20 }
  0x7f   :  { %v393_v34 = vadd.f32 0.2548296, %v377_v0  ;;  %2348 = vmatpush3.msra.mxu1 %v1138_v55  ;;  %v285_v59 = vmul.f32 1.0614054, %v3494_v9  ;;  %v169_v48 = vmul.f32 0.5, %v3211_v12 }
  0x80   :  { %v346_v10 = vmul.f32 %v3444_v51, %v330_v24  ;;  %v315_v43 = vmul.f32 %v3465_v58, %v299_v3  ;;  %2349 = vmatprep.subr.mxu1 %v1153_v28  ;;  %v300_v50 = vadd.f32 -1.4531521, %v284_v39 }
  0x81   :  { %v409_v63 = vmul.f32 %v3401_v62, %v393_v34  ;;  %2350 = vmatpush3.msra.mxu1 %v1137_v56  ;;  %v477_v62 = vmul.f32 1.442695, %v446_v11  ;;  %v301_v25 = vadd.f32 -1.4531521, %v285_v59  ;;  %v3501_v1 = vpop.eup %2572 }
  0x82   :  { %v362_v54 = vadd.f32 -0.28449672, %v346_v10  ;;  %v331_v49 = vadd.f32 1.4214138, %v315_v43  ;;  %2487 = vmatprep.subr.mxu1 %v3116_v13  ;;  %v316_v8 = vmul.f32 %v3490_v20, %v300_v50  ;;  %v2575_v4 = vpop.eup %2574  ;;  %v286_v41 = vmul.f32 1.0614054, %v3501_v1 }
  0x83   :  { %v489_v5 = vmul.f32 %v2567_v35, %v409_v63  ;;  %v317_v57 = vmul.f32 %v3494_v9, %v301_v25  ;;  %2582 = vpow2.f32 %v477_v62  ;;  %v2577_v18 = vpop.eup %2576 }
  0x84   :  { %v378_v37 = vmul.f32 %v3444_v51, %v362_v54  ;;  %v347_v14 = vmul.f32 %v3465_v58, %v331_v49  ;;  %v332_v16 = vadd.f32 1.4214138, %v316_v8  ;;  %v302_v24 = vadd.f32 -1.4531521, %v286_v41 }
  0x85   :  { %v505_v44 = vsub.f32 1.0, %v489_v5  ;;  %v333_v23 = vadd.f32 1.4214138, %v317_v57  ;;  %v170_v5 = vmul.f32 0.5, %v3271_v21  ;;  %v3529_v57 = vld [vmem:[#allocation2 + $0xc2] sm:$0xff]  ;;  %v171_v41 = vmul.f32 0.5, %v3316_v33 }
  0x86   :  { %v394_v29 = vadd.f32 0.2548296, %v378_v37  ;;  %v363_v13 = vadd.f32 -0.28449672, %v347_v14  ;;  %v348_v3 = vmul.f32 %v3490_v20, %v332_v16  ;;  %v318_v10 = vmul.f32 %v3501_v1, %v302_v24 }
  0x87   :  { %v537_v22 = vsub.f32 0.0, %v505_v44  ;;  %v349_v35 = vmul.f32 %v3494_v9, %v333_v23 }
  0x88   :  { %v410_v0 = vmul.f32 %v3444_v51, %v394_v29  ;;  %v379_v55 = vmul.f32 %v3465_v58, %v363_v13  ;;  %v364_v11 = vadd.f32 -0.28449672, %v348_v3  ;;  %v334_v38 = vadd.f32 1.4214138, %v318_v10  ;;  %v2579_v62 = vpop.eup %2578 }
  0x89   :  { %v553_v26 = vsel %vm521_vm10, %v505_v44, %v537_v22  ;;  %v365_v43 = vadd.f32 -0.28449672, %v349_v35  ;;  %v2581_v29 = vpop.eup %2580  ;;  %v173_v10 = vmul.f32 0.5, %v3351_v30 }
  0x8a   :  { %v569_v28 = vadd.f32 1.0, %v553_v26  ;;  %v490_v34 = vmul.f32 %v2575_v4, %v410_v0  ;;  %v395_v56 = vadd.f32 0.2548296, %v379_v55  ;;  %v380_v39 = vmul.f32 %v3490_v20, %v364_v11 }
  0x8b   :  { %v381_v59 = vmul.f32 %v3494_v9, %v365_v43  ;;  %v350_v37 = vmul.f32 %v3501_v1, %v334_v38  ;;  %v174_v43 = vmul.f32 0.5, %v3382_v15 }
  0x8c   :  { %v3513_v12 = vmul.f32 %v569_v28, %v169_v48  ;;  %v506_v51 = vsub.f32 1.0, %v490_v34  ;;  %v411_v63 = vmul.f32 %v3465_v58, %v395_v56  ;;  %v396_v32 = vadd.f32 0.2548296, %v380_v39 }
  0x8d   :  { %v397_v14 = vadd.f32 0.2548296, %v381_v59  ;;  %v366_v25 = vadd.f32 -0.28449672, %v350_v37  ;;  %v172_v34 = vmul.f32 0.5, %v3338_v45 }
  0x8e   :  { %602 = vst [vmem:[#allocation2 + $0xd1] sm:$0xff] %v3513_v12  ;;  %1304 = vmatprep.mubr.f32.mxu0 %v3513_v12  ;;  %v538_v54 = vsub.f32 0.0, %v506_v51  ;;  %v491_v49 = vmul.f32 %v2577_v18, %v411_v63  ;;  %v412_v8 = vmul.f32 %v3490_v20, %v396_v32 }
  0x8f   :  { %v413_v22 = vmul.f32 %v3494_v9, %v397_v14  ;;  %v382_v13 = vmul.f32 %v3501_v1, %v366_v25  ;;  %v833_v14 = vld [vmem:[#allocation2 + $0x21] sm:$0xff]  ;;  %v1183_v25 = vld [vmem:[%s3961_s2 + $0x470] sm:$0xff] }
  0x90   :  { %v554_v50 = vsel %vm522_vm11, %v506_v51, %v538_v54  ;;  %v507_v44 = vsub.f32 1.0, %v491_v49  ;;  %v492_v48 = vmul.f32 %v2579_v62, %v412_v8  ;;  %v2583_v0 = vpop.eup %2582  ;;  %v736_v62 = vld [vmem:[#allocation2 + $0x11] sm:$0xff]  ;;  %v801_v8 = vld [vmem:[#allocation2 + $0x20] sm:$0xff] }
  0x91   :  { %v570_v58 = vadd.f32 1.0, %v554_v50  ;;  %v493_v26 = vmul.f32 %v2581_v29, %v413_v22  ;;  %v398_v20 = vadd.f32 0.2548296, %v382_v13  ;;  %v768_v50 = vld [vmem:[#allocation2 + $0x12] sm:$0xff]  ;;  %v1182_v13 = vld [vmem:[%s3961_s2 + $0x468] sm:$0xff] }
  0x92   :  { %v539_v21 = vsub.f32 0.0, %v507_v44  ;;  %v508_v55 = vsub.f32 1.0, %v492_v48  ;;  %v2586_v29 = vld [vmem:[%s3961_s2 + $0x478] sm:$0xff]  ;;  %v3610_v48 = vld [vmem:[#allocation2 + $0x42] sm:$0xff] }
  0x93   :  { %v3525_v4 = vmul.f32 %v570_v58, %v170_v5  ;;  %v509_v33 = vsub.f32 1.0, %v493_v26  ;;  %v414_v23 = vmul.f32 %v3501_v1, %v398_v20  ;;  %v834_v22 = vld [vmem:[#allocation2 + $0x31] sm:$0xff]  ;;  %v803_v26 = vld [vmem:[#allocation2 + $0x40] sm:$0xff] }
  0x94   :  { %v555_v40 = vsel %vm523_vm12, %v507_v44, %v539_v21  ;;  %v540_v28 = vsub.f32 0.0, %v508_v55  ;;  %v3594_v44 = vld [vmem:[#allocation2 + $0x22] sm:$0xff]  ;;  %v3604_v21 = vld [vmem:[#allocation2 + $0x32] sm:$0xff] }
  0x95   :  { %v3532_v16 = vld [vmem:[#allocation2 + $0xd0] sm:$0xff]  ;;  %603 = vst [vmem:[#allocation2 + $0xe1] sm:$0xff] %v3525_v4  ;;  %v571_v9 = vadd.f32 1.0, %v555_v40  ;;  %v541_v3 = vsub.f32 0.0, %v509_v33  ;;  %v494_v56 = vmul.f32 %v2583_v0, %v414_v23  ;;  %v835_v0 = vld [vmem:[#allocation2 + $0x41] sm:$0xff] }
  0x96   :  { %1444 = vmatprep.mubr.f32.mxu1 %v3532_v16  ;;  %1305 = vmatmul.mubr.f32.gmra.mxu0 %v3532_v16  ;;  %v556_v35 = vsel %vm524_vm13, %v508_v55, %v540_v28  ;;  %v3547_v18 = vld [vmem:[#allocation2 + $0xd2] sm:$0xff]  ;;  %v1181_v40 = vld [vmem:[%s3961_s2 + $0x460] sm:$0xff] }
  0x97   :  { %1445 = vmatmul.mubr.f32.gmra.mxu1 %v3529_v57  ;;  %1309 = vmatprep.mubr.f32.mxu0 %v3525_v4  ;;  %v3541_v24 = vmul.f32 %v571_v9, %v171_v41  ;;  %v572_v27 = vadd.f32 1.0, %v556_v35  ;;  %v557_v51 = vsel %vm525_vm14, %v509_v33, %v541_v3  ;;  %v510_v11 = vsub.f32 1.0, %v494_v56  ;;  %v802_v41 = vld [vmem:[#allocation2 + $0x30] sm:$0xff]  ;;  %v1180_v9 = vld [vmem:[%s3961_s2 + $0x458] sm:$0xff]  ;;  %v837_v33 = vld [vmem:[#allocation2 + $0x61] sm:$0xff] }
  0x98   :  { %v573_v63 = vadd.f32 1.0, %v557_v51  ;;  %v836_v20 = vld [vmem:[#allocation2 + $0x51] sm:$0xff]  ;;  %v805_v28 = vld [vmem:[#allocation2 + $0x60] sm:$0xff] }
  0x99   :  { %604 = vst [vmem:[#allocation2 + $0xf1] sm:$0xff] %v3541_v24  ;;  %v3554_v45 = vmul.f32 %v572_v27, %v172_v34  ;;  %v542_v61 = vsub.f32 0.0, %v510_v11  ;;  %v804_v55 = vld [vmem:[#allocation2 + $0x50] sm:$0xff]  ;;  %v3629_v34 = vld [vmem:[#allocation2 + $0x82] sm:$0xff] }
  0x9a   :  { %v3558_v30 = vmul.f32 %v573_v63, %v173_v10  ;;  %v1179_v23 = vld [vmem:[%s3961_s2 + $0x450] sm:$0xff]  ;;  %v869_v35 = vld [vmem:[#allocation2 + $0x62] sm:$0xff] }
  0x9b   :  { %605 = vst [vmem:[#allocation2 + $0x101] sm:$0xff] %v3554_v45  ;;  %v558_v38 = vsel %vm526_vm15, %v510_v11, %v542_v61  ;;  %v848_v3 = vld [vmem:[#allocation2 + $0x131] sm:$0xff] }
  0x9c   :  { %v3549_v1 = vld [vmem:[#allocation2 + $0xe0] sm:$0xff]  ;;  %606 = vst [vmem:[#allocation2 + $0x111] sm:$0xff] %v3558_v30  ;;  %v574_v31 = vadd.f32 1.0, %v558_v38  ;;  %v868_v56 = vld [vmem:[#allocation2 + $0x52] sm:$0xff] }
  0x9d   :  { %1449 = vmatprep.mubr.f32.mxu1 %v3549_v1  ;;  %1310 = vmatmul.mubr.f32.gmra.mxu0 %v3549_v1  ;;  %v3562_v54 = vld [vmem:[#allocation2 + $0xe2] sm:$0xff]  ;;  %v870_v10 = vld [vmem:[#allocation2 + $0x72] sm:$0xff] }
  0x9e   :  { %1450 = vmatmul.mubr.f32.gmra.mxu1 %v3547_v18  ;;  %1314 = vmatprep.mubr.f32.mxu0 %v3541_v24  ;;  %v3569_v5 = vmul.f32 %v574_v31, %v174_v43  ;;  %v872_v27 = vld [vmem:[#allocation2 + $0x92] sm:$0xff] }
  0xa0   :  { %v3565_v39 = vld [vmem:[#allocation2 + $0xf0] sm:$0xff]  ;;  %607 = vst [vmem:[#allocation2 + $0x121] sm:$0xff] %v3569_v5 }
  0xa1   :  { %1454 = vmatprep.mubr.f32.mxu1 %v3565_v39  ;;  %1315 = vmatmul.mubr.f32.gmra.mxu0 %v3565_v39  ;;  %v3574_v15 = vld [vmem:[#allocation2 + $0xf2] sm:$0xff] }
  0xa2   :  { %1455 = vmatmul.mubr.f32.gmra.mxu1 %v3562_v54  ;;  %1319 = vmatprep.mubr.f32.mxu0 %v3554_v45  ;;  %v3576_v49 = vld [vmem:[#allocation2 + $0x100] sm:$0xff] }
  0xa3   :  { %1459 = vmatprep.mubr.f32.mxu1 %v3576_v49  ;;  %v3580_v59 = vld [vmem:[#allocation2 + $0x110] sm:$0xff]  ;;  %v3585_v37 = vld [vmem:[#allocation2 + $0x102] sm:$0xff] }
  0xa4   :  { %v3592_v58 = vld [vmem:[#allocation2 + $0x112] sm:$0xff] }
  0xa5   :  { %1320 = vmatmul.mubr.f32.gmra.mxu0 %v3576_v49 }
  0xa6   :  { %1460 = vmatmul.mubr.f32.gmra.mxu1 %v3574_v15  ;;  %1324 = vmatprep.mubr.f32.mxu0 %v3558_v30 }
  0xa7   :  { %1464 = vmatprep.mubr.f32.mxu1 %v3580_v59  ;;  %v3588_v32 = vld [vmem:[#allocation2 + $0x120] sm:$0xff] }
  0xa9   :  { %1325 = vmatmul.mubr.f32.gmra.mxu0 %v3580_v59 }
  0xaa   :  { %1465 = vmatmul.mubr.f32.gmra.mxu1 %v3585_v37  ;;  %1539 = vmatprep.mubr.f32.mxu0 %v768_v50 }
  0xab   :  { %1469 = vmatprep.mubr.f32.mxu1 %v3588_v32 }
  0xad   :  { %1540 = vmatmul.mubr.f32.vlgmr.msra.gmra.mxu0 %v736_v62 }
  0xae   :  { %1470 = vmatmul.mubr.f32.gmra.mxu1 %v3592_v58  ;;  %2432 = vmatpush3.msra.mxu0 %v2586_v29 }
  0xaf   :  { %1544 = vmatprep.mubr.f32.mxu0 %v3594_v44  ;;  %1684 = vmatprep.mubr.f32.mxu1 %v833_v14 }
  0xb0   :  { %2433 = vmatprep.subr.mxu0 %v1183_v25 }
  0xb1   :  { %1545 = vmatmul.mubr.f32.gmra.mxu0 %v833_v14 }
  0xb2   :  { %1685 = vmatmul.mubr.f32.vlgmr.msra.gmra.mxu1 %v801_v8  ;;  %2434 = vmatpush3.msra.mxu0 %v1183_v25 }
  0xb3   :  { %1549 = vmatprep.mubr.f32.mxu0 %v3604_v21  ;;  %1689 = vmatprep.mubr.f32.mxu1 %v834_v22 }
  0xb4   :  { %2435 = vmatprep.subr.mxu0 %v1182_v13  ;;  %2503 = vmatpush3.msra.mxu1 %v2586_v29 }
  0xb5   :  { %1550 = vmatmul.mubr.f32.gmra.mxu0 %v834_v22  ;;  %2488 = vmatprep.subr.mxu1 %v1183_v25 }
  0xb6   :  { %1690 = vmatmul.mubr.f32.gmra.mxu1 %v802_v41  ;;  %2436 = vmatpush3.msra.mxu0 %v1182_v13 }
  0xb7   :  { %1554 = vmatprep.mubr.f32.mxu0 %v3610_v48  ;;  %1694 = vmatprep.mubr.f32.mxu1 %v835_v0 }
  0xb8   :  { %2437 = vmatprep.subr.mxu0 %v1181_v40  ;;  %2504 = vmatpush3.msra.mxu1 %v1183_v25 }
  0xb9   :  { %1555 = vmatmul.mubr.f32.gmra.mxu0 %v835_v0  ;;  %2489 = vmatprep.subr.mxu1 %v1182_v13 }
  0xba   :  { %1695 = vmatmul.mubr.f32.gmra.mxu1 %v803_v26  ;;  %2438 = vmatpush3.msra.mxu0 %v1181_v40 }
  0xbb   :  { %1559 = vmatprep.mubr.f32.mxu0 %v3348_v47  ;;  %1699 = vmatprep.mubr.f32.mxu1 %v836_v20  ;;  %v1178_v47 = vld [vmem:[%s3961_s2 + $0x448] sm:$0xff] }
  0xbc   :  { %2439 = vmatprep.subr.mxu0 %v1180_v9  ;;  %2505 = vmatpush3.msra.mxu1 %v1182_v13 }
  0xbd   :  { %1560 = vmatmul.mubr.f32.gmra.mxu0 %v836_v20  ;;  %2490 = vmatprep.subr.mxu1 %v1181_v40 }
  0xbe   :  { %1700 = vmatmul.mubr.f32.gmra.mxu1 %v804_v55  ;;  %2440 = vmatpush3.msra.mxu0 %v1180_v9 }
  0xbf   :  { %1564 = vmatprep.mubr.f32.mxu0 %v3385_v6  ;;  %1704 = vmatprep.mubr.f32.mxu1 %v837_v33  ;;  %v1177_v6 = vld [vmem:[%s3961_s2 + $0x440] sm:$0xff] }
  0xc0   :  { %2441 = vmatprep.subr.mxu0 %v1179_v23  ;;  %2506 = vmatpush3.msra.mxu1 %v1181_v40 }
  0xc1   :  { %1565 = vmatmul.mubr.f32.gmra.mxu0 %v837_v33  ;;  %2491 = vmatprep.subr.mxu1 %v1180_v9 }
  0xc2   :  { %1705 = vmatmul.mubr.f32.gmra.mxu1 %v805_v28  ;;  %2442 = vmatpush3.msra.mxu0 %v1179_v23 }
  0xc3   :  { %1569 = vmatprep.mubr.f32.mxu0 %v3418_v60  ;;  %1709 = vmatprep.mubr.f32.mxu1 %v3278_v7  ;;  %v840_v60 = vld [vmem:[#allocation2 + $0x91] sm:$0xff] }
  0xc4   :  { %2443 = vmatprep.subr.mxu0 %v1178_v47  ;;  %2507 = vmatpush3.msra.mxu1 %v1180_v9 }
  0xc5   :  { %1570 = vmatmul.mubr.f32.gmra.mxu0 %v3278_v7  ;;  %2492 = vmatprep.subr.mxu1 %v1179_v23  ;;  %v1176_v7 = vld [vmem:[%s3961_s2 + $0x438] sm:$0xff] }
  0xc6   :  { %1710 = vmatmul.mubr.f32.gmra.mxu1 %v3353_v52  ;;  %2444 = vmatpush3.msra.mxu0 %v1178_v47  ;;  %v1175_v52 = vld [vmem:[%s3961_s2 + $0x430] sm:$0xff] }
  0xc7   :  { %1574 = vmatprep.mubr.f32.mxu0 %v3629_v34  ;;  %1714 = vmatprep.mubr.f32.mxu1 %v3293_v19 }
  0xc8   :  { %2445 = vmatprep.subr.mxu0 %v1177_v6  ;;  %2508 = vmatpush3.msra.mxu1 %v1179_v23 }
  0xc9   :  { %1575 = vmatmul.mubr.f32.gmra.mxu0 %v3293_v19  ;;  %2493 = vmatprep.subr.mxu1 %v1178_v47  ;;  %v1174_v19 = vld [vmem:[%s3961_s2 + $0x428] sm:$0xff] }
  0xca   :  { %1715 = vmatmul.mubr.f32.gmra.mxu1 %v3394_v46  ;;  %2446 = vmatpush3.msra.mxu0 %v1177_v6  ;;  %v1172_v46 = vld [vmem:[%s3961_s2 + $0x418] sm:$0xff] }
  0xcb   :  { %1579 = vmatprep.mubr.f32.mxu0 %v3458_v36  ;;  %1719 = vmatprep.mubr.f32.mxu1 %v840_v60  ;;  %v1170_v36 = vld [vmem:[%s3961_s2 + $0x408] sm:$0xff] }
  0xcc   :  { %2447 = vmatprep.subr.mxu0 %v1176_v7  ;;  %2509 = vmatpush3.msra.mxu1 %v1178_v47 }
  0xcd   :  { %1580 = vmatmul.mubr.f32.gmra.mxu0 %v3355_v53  ;;  %2494 = vmatprep.subr.mxu1 %v1177_v6  ;;  %v1173_v53 = vld [vmem:[%s3961_s2 + $0x420] sm:$0xff] }
  0xce   :  { %1720 = vmatmul.mubr.f32.gmra.mxu1 %v3430_v42  ;;  %2448 = vmatpush3.msra.mxu0 %v1176_v7 }
  0xcf   :  { %1584 = vmatprep.mubr.f32.mxu0 %v3529_v57  ;;  %1724 = vmatprep.mubr.f32.mxu1 %v3420_v17 }
  0xd0   :  { %2449 = vmatprep.subr.mxu0 %v1175_v52  ;;  %2510 = vmatpush3.msra.mxu1 %v1177_v6 }
  0xd1   :  { %1585 = vmatmul.mubr.f32.gmra.mxu0 %v3420_v17  ;;  %2495 = vmatprep.subr.mxu1 %v1176_v7  ;;  %v1171_v17 = vld [vmem:[%s3961_s2 + $0x410] sm:$0xff] }
  0xd2   :  { %1725 = vmatmul.mubr.f32.gmra.mxu1 %v3460_v2  ;;  %2450 = vmatpush3.msra.mxu0 %v1175_v52 }
  0xd3   :  { %1589 = vmatprep.mubr.f32.mxu0 %v3547_v18  ;;  %1729 = vmatprep.mubr.f32.mxu1 %v3513_v12 }
  0xd4   :  { %2451 = vmatprep.subr.mxu0 %v1174_v19  ;;  %2511 = vmatpush3.msra.mxu1 %v1176_v7 }
  0xd5   :  { %1590 = vmatmul.mubr.f32.gmra.mxu0 %v3513_v12  ;;  %2496 = vmatprep.subr.mxu1 %v1175_v52 }
  0xd6   :  { %1730 = vmatmul.mubr.f32.gmra.mxu1 %v3532_v16  ;;  %2452 = vmatpush3.msra.mxu0 %v1174_v19 }
  0xd7   :  { %1594 = vmatprep.mubr.f32.mxu0 %v3562_v54  ;;  %1734 = vmatprep.mubr.f32.mxu1 %v3525_v4 }
  0xd8   :  { %2453 = vmatprep.subr.mxu0 %v1173_v53  ;;  %2512 = vmatpush3.msra.mxu1 %v1175_v52 }
  0xd9   :  { %1595 = vmatmul.mubr.f32.gmra.mxu0 %v3525_v4  ;;  %2497 = vmatprep.subr.mxu1 %v1174_v19  ;;  %v783_v4 = vld [vmem:[#allocation2 + $0x122] sm:$0xff] }
  0xda   :  { %1735 = vmatmul.mubr.f32.gmra.mxu1 %v3549_v1  ;;  %2454 = vmatpush3.msra.mxu0 %v1173_v53 }
  0xdb   :  { %1599 = vmatprep.mubr.f32.mxu0 %v3574_v15  ;;  %1739 = vmatprep.mubr.f32.mxu1 %v3541_v24 }
  0xdc   :  { %2455 = vmatprep.subr.mxu0 %v1172_v46  ;;  %2513 = vmatpush3.msra.mxu1 %v1174_v19 }
  0xdd   :  { %1600 = vmatmul.mubr.f32.gmra.mxu0 %v3541_v24  ;;  %2498 = vmatprep.subr.mxu1 %v1173_v53  ;;  %v1169_v24 = vld [vmem:[%s3961_s2 + $0x400] sm:$0xff] }
  0xde   :  { %1740 = vmatmul.mubr.f32.gmra.mxu1 %v3565_v39  ;;  %2456 = vmatpush3.msra.mxu0 %v1172_v46 }
  0xdf   :  { %1604 = vmatprep.mubr.f32.mxu0 %v3585_v37  ;;  %1744 = vmatprep.mubr.f32.mxu1 %v3554_v45 }
  0xe0   :  { %2457 = vmatprep.subr.mxu0 %v1171_v17  ;;  %2514 = vmatpush3.msra.mxu1 %v1173_v53 }
  0xe1   :  { %1605 = vmatmul.mubr.f32.gmra.mxu0 %v3554_v45  ;;  %2499 = vmatprep.subr.mxu1 %v1172_v46 }
  0xe2   :  { %v2111_v2 = vpop.f32.mrf.mxu0  ;;  %1745 = vmatmul.mubr.f32.gmra.mxu1 %v3576_v49  ;;  %2458 = vmatpush3.msra.mxu0 %v1171_v17 }
  0xe3   :  { %1609 = vmatprep.mubr.f32.mxu0 %v3592_v58  ;;  %1749 = vmatprep.mubr.f32.mxu1 %v3558_v30 }
  0xe4   :  { %v2112_v12 = vpop.f32.mrf.mxu0  ;;  %2459 = vmatprep.subr.mxu0 %v1170_v36  ;;  %2515 = vmatpush3.msra.mxu1 %v1172_v46 }
  0xe5   :  { %v2113_v16 = vadd.f32 %v2112_v12, %v2111_v2  ;;  %1610 = vmatmul.mubr.f32.gmra.mxu0 %v3558_v30  ;;  %2500 = vmatprep.subr.mxu1 %v1171_v17 }
  0xe6   :  { %1750 = vmatmul.mubr.f32.gmra.mxu1 %v3580_v59  ;;  %2460 = vmatpush3.msra.mxu0 %v1170_v36 }
  0xe7   :  { %1614 = vmatprep.mubr.f32.mxu0 %v783_v4  ;;  %1754 = vmatprep.mubr.f32.mxu1 %v3569_v5 }
  0xe8   :  { %2461 = vmatprep.subr.mxu0 %v1169_v24  ;;  %2516 = vmatpush3.msra.mxu1 %v1171_v17 }
  0xe9   :  { %1615 = vmatmul.mubr.f32.gmra.mxu0 %v3569_v5  ;;  %2501 = vmatprep.subr.mxu1 %v1170_v36 }
  0xea   :  { %1755 = vmatmul.mubr.f32.gmra.mxu1 %v3588_v32  ;;  %2462 = vmatpush3.msra.mxu0 %v1169_v24 }
  0xeb   :  { %1759 = vmatprep.mubr.f32.mxu1 %v848_v3  ;;  %2463 = vmatprep.mubr.f32.mxu0 %v3594_v44 }
  0xec   :  { %2517 = vmatpush3.msra.mxu1 %v1170_v36 }
  0xed   :  { %2464 = vmatmul.mubr.f32.vlgmr.msra.gmra.mxu0 %v3604_v21  ;;  %2502 = vmatprep.subr.mxu1 %v1169_v24 }
  0xee   :  { %1760 = vmatmul.mubr.f32.gmra.mxu1 %v3430_v42  ;;  %2466 = vmatprep.mubr.f32.mxu0 %v3610_v48 }
  0xef   :  { %2518 = vmatpush3.msra.mxu1 %v1169_v24  ;;  %2475 = vmatprep.mubr.f32.mxu1 %v3529_v57  ;;  %v880_v57 = vld [vmem:[#allocation2 + $0x132] sm:$0xff] }
  0xf1   :  { %2467 = vmatmul.mubr.f32.gmra.mxu0 %v868_v56 }
  0xf2   :  { %2476 = vmatmul.mubr.f32.vlgmr.msra.gmra.mxu1 %v3547_v18  ;;  %2469 = vmatprep.mubr.f32.mxu0 %v869_v35 }
  0xf3   :  { %2478 = vmatprep.mubr.f32.mxu1 %v3562_v54 }
  0xf5   :  { %2470 = vmatmul.mubr.f32.gmra.mxu0 %v870_v10 }
  0xf6   :  { %2479 = vmatmul.mubr.f32.gmra.mxu1 %v3574_v15  ;;  %2472 = vmatprep.mubr.f32.mxu0 %v3629_v34 }
  0xf7   :  { %2481 = vmatprep.mubr.f32.mxu1 %v3585_v37 }
  0xf9   :  { %2473 = vmatmul.mubr.f32.gmra.mxu0 %v872_v27 }
  0xfa   :  { %2482 = vmatmul.mubr.f32.gmra.mxu1 %v3592_v58 }
  0xfb   :  { %2484 = vmatprep.mubr.f32.mxu1 %v783_v4 }
  0xfe   :  { %2485 = vmatmul.mubr.f32.gmra.mxu1 %v880_v57 }
 0x119   :  { %v2114_v51 = vpop.f32.mrf.mxu0 }
 0x11a   :  { %v2191_v18 = vpop.f32.mrf.mxu1 }
 0x11b   :  { %v2115_v11 = vpop.f32.mrf.mxu0 }
 0x11c   :  { %v2116_v1 = vadd.f32 %v2115_v11, %v2114_v51  ;;  %v2192_v63 = vpop.f32.mrf.mxu1 }
 0x11d   :  { %v2193_v45 = vadd.f32 %v2192_v63, %v2191_v18  ;;  %v2117_v61 = vpop.f32.mrf.mxu0 }
 0x11e   :  { %v2194_v30 = vpop.f32.mrf.mxu1 }
 0x11f   :  { %v3705_v43 = vadd.f32 %v2193_v45, %v2113_v16  ;;  %v2118_v38 = vpop.f32.mrf.mxu0 }
 0x120   :  { %v2119_v54 = vadd.f32 %v2118_v38, %v2117_v61  ;;  %v2195_v31 = vpop.f32.mrf.mxu1 }
 0x121   :  { %v2196_v39 = vadd.f32 %v2195_v31, %v2194_v30  ;;  %v2120_v5 = vpop.f32.mrf.mxu0 }
 0x122   :  { %v2197_v15 = vpop.f32.mrf.mxu1 }
 0x123   :  { %v3707_v49 = vadd.f32 %v2196_v39, %v2116_v1  ;;  %v2121_v59 = vpop.f32.mrf.mxu0 }
 0x124   :  { %v2122_v37 = vadd.f32 %v2121_v59, %v2120_v5  ;;  %v2198_v50 = vpop.f32.mrf.mxu1 }
 0x125   :  { %v2199_v32 = vadd.f32 %v2198_v50, %v2197_v15  ;;  %v2123_v62 = vpop.f32.mrf.mxu0 }
 0x126   :  { %v2200_v58 = vpop.f32.mrf.mxu1 }
 0x127   :  { %v3709_v44 = vadd.f32 %v2199_v32, %v2119_v54  ;;  %v2124_v14 = vpop.f32.mrf.mxu0 }
 0x128   :  { %v2125_v25 = vadd.f32 %v2124_v14, %v2123_v62  ;;  %v2201_v29 = vpop.f32.mrf.mxu1 }
 0x129   :  { %v2202_v8 = vadd.f32 %v2201_v29, %v2200_v58  ;;  %v2126_v21 = vpop.f32.mrf.mxu0 }
 0x12a   :  { %v2203_v22 = vpop.f32.mrf.mxu1 }
 0x12b   :  { %v3711_v13 = vadd.f32 %v2202_v8, %v2122_v37  ;;  %v2127_v41 = vpop.f32.mrf.mxu0 }
 0x12c   :  { %v2128_v48 = vadd.f32 %v2127_v41, %v2126_v21  ;;  %v2204_v0 = vpop.f32.mrf.mxu1 }
 0x12d   :  { %v2205_v40 = vadd.f32 %v2204_v0, %v2203_v22  ;;  %v2129_v26 = vpop.f32.mrf.mxu0 }
 0x12e   :  { %v2206_v20 = vpop.f32.mrf.mxu1 }
 0x12f   :  { %v3713_v9 = vadd.f32 %v2205_v40, %v2125_v25  ;;  %v2130_v55 = vpop.f32.mrf.mxu0 }
 0x130   :  { %v2131_v33 = vadd.f32 %v2130_v55, %v2129_v26  ;;  %v2207_v23 = vpop.f32.mrf.mxu1 }
 0x131   :  { %v2208_v28 = vadd.f32 %v2207_v23, %v2206_v20  ;;  %v2132_v47 = vpop.f32.mrf.mxu0 }
 0x132   :  { %v2209_v34 = vpop.f32.mrf.mxu1 }
 0x133   :  { %v3715_v6 = vadd.f32 %v2208_v28, %v2128_v48  ;;  %v2133_v60 = vpop.f32.mrf.mxu0 }
 0x134   :  { %v2134_v7 = vadd.f32 %v2133_v60, %v2132_v47  ;;  %v2210_v52 = vpop.f32.mrf.mxu1 }
 0x135   :  { %v2211_v19 = vadd.f32 %v2210_v52, %v2209_v34  ;;  %v2135_v53 = vpop.f32.mrf.mxu0 }
 0x136   :  { %v2212_v46 = vpop.f32.mrf.mxu1 }
 0x137   :  { %v3717_v17 = vadd.f32 %v2211_v19, %v2131_v33  ;;  %v2136_v36 = vpop.f32.mrf.mxu0 }
 0x138   :  { %v2137_v2 = vadd.f32 %v2136_v36, %v2135_v53  ;;  %v2213_v12 = vpop.f32.mrf.mxu1 }
 0x139   :  { %v2214_v4 = vadd.f32 %v2213_v12, %v2212_v46  ;;  %v2138_v16 = vpop.f32.mrf.mxu0 }
 0x13a   :  { %v2215_v24 = vpop.f32.mrf.mxu1 }
 0x13b   :  { %v3719_v3 = vadd.f32 %v2214_v4, %v2134_v7  ;;  %v2139_v56 = vpop.f32.mrf.mxu0 }
 0x13c   :  { %v2140_v35 = vadd.f32 %v2139_v56, %v2138_v16  ;;  %v2216_v10 = vpop.f32.mrf.mxu1 }
 0x13d   :  { %3966 = vst [vmem:[#allocation4_spill] sm:$0xff] %v3719_v3  ;;  %v2217_v27 = vadd.f32 %v2216_v10, %v2215_v24  ;;  %v2141_v57 = vpop.f32.mrf.mxu0 }
 0x13e   :  { %v2218_v51 = vpop.f32.mrf.mxu1 }
 0x13f   :  { %v3721_v18 = vadd.f32 %v2217_v27, %v2137_v2  ;;  %v2142_v11 = vpop.f32.mrf.mxu0 }
 0x140   :  { %v2143_v1 = vadd.f32 %v2142_v11, %v2141_v57  ;;  %v2219_v63 = vpop.f32.mrf.mxu1 }
 0x141   :  { %3967 = vst [vmem:[#allocation5_spill] sm:$0xff] %v3721_v18  ;;  %v2220_v45 = vadd.f32 %v2219_v63, %v2218_v51 }
 0x143   :  { %v3723_v61 = vadd.f32 %v2220_v45, %v2140_v35 }
 0x156   :  { %v2144_v30 = vpop.f32.mrf.mxu0 }
 0x157   :  { %v2221_v38 = vpop.f32.mrf.mxu1 }
 0x158   :  { %v2145_v54 = vpop.f32.mrf.mxu0 }
 0x159   :  { %v2146_v31 = vadd.f32 %v2145_v54, %v2144_v30  ;;  %v2222_v39 = vpop.f32.mrf.mxu1 }
 0x15a   :  { %v2223_v5 = vadd.f32 %v2222_v39, %v2221_v38 }
 0x15c   :  { %v3729_v15 = vadd.f32 %v2223_v5, %v2143_v1 }
 0x15d   :  { %v2147_v59 = vpop.f32.mrf.mxu0 }
 0x15e   :  { %3968 = vst [vmem:[#allocation6_spill] sm:$0xff] %v3729_v15  ;;  %v2224_v37 = vpop.f32.mrf.mxu1 }
 0x15f   :  { %v2148_v50 = vpop.f32.mrf.mxu0 }
 0x160   :  { %v2149_v32 = vadd.f32 %v2148_v50, %v2147_v59  ;;  %v2225_v62 = vpop.f32.mrf.mxu1 }
 0x161   :  { %v2226_v58 = vadd.f32 %v2225_v62, %v2224_v37  ;;  %v2150_v14 = vpop.f32.mrf.mxu0 }
 0x162   :  { %v2227_v29 = vpop.f32.mrf.mxu1 }
 0x163   :  { %v3731_v25 = vadd.f32 %v2226_v58, %v2146_v31  ;;  %v2151_v8 = vpop.f32.mrf.mxu0 }
 0x164   :  { %v2152_v42 = vadd.f32 %v2151_v8, %v2150_v14  ;;  %v2228_v21 = vpop.f32.mrf.mxu1 }
 0x165   :  { %3969 = vst [vmem:[#allocation7_spill] sm:$0xff] %v3731_v25  ;;  %v2229_v22 = vadd.f32 %v2228_v21, %v2227_v29  ;;  %v2153_v41 = vpop.f32.mrf.mxu0 }
 0x166   :  { %v2230_v0 = vpop.f32.mrf.mxu1 }
 0x167   :  { %v3733_v48 = vadd.f32 %v2229_v22, %v2149_v32  ;;  %v2154_v40 = vpop.f32.mrf.mxu0 }
 0x168   :  { %v2155_v26 = vadd.f32 %v2154_v40, %v2153_v41  ;;  %v2231_v20 = vpop.f32.mrf.mxu1 }
 0x169   :  { %3970 = vst [vmem:[#allocation8_spill] sm:$0xff] %v3733_v48  ;;  %v2232_v55 = vadd.f32 %v2231_v20, %v2230_v0  ;;  %v2156_v33 = vpop.f32.mrf.mxu0 }
 0x16a   :  { %v2233_v23 = vpop.f32.mrf.mxu1 }
 0x16b   :  { %v3735_v28 = vadd.f32 %v2232_v55, %v2152_v42  ;;  %v2157_v47 = vpop.f32.mrf.mxu0 }
 0x16c   :  { %v2158_v34 = vadd.f32 %v2157_v47, %v2156_v33  ;;  %v2234_v60 = vpop.f32.mrf.mxu1 }
 0x16d   :  { %3971 = vst [vmem:[#allocation9_spill] sm:$0xff] %v3735_v28  ;;  %v2235_v7 = vadd.f32 %v2234_v60, %v2233_v23  ;;  %v2271_v52 = vpop.f32.mrf.mxu0 }
 0x16e   :  { %v2236_v19 = vpop.f32.mrf.mxu1 }
 0x16f   :  { %v3737_v53 = vadd.f32 %v2235_v7, %v2155_v26  ;;  %v2272_v46 = vpop.f32.mrf.mxu0 }
 0x170   :  { %v2237_v36 = vpop.f32.mrf.mxu1 }
 0x171   :  { %3972 = vst [vmem:[#allocation10_spill] sm:$0xff] %v3737_v53  ;;  %v2238_v2 = vadd.f32 %v2237_v36, %v2236_v19  ;;  %v2274_v12 = vpop.f32.mrf.mxu0 }
 0x172   :  { %v2351_v4 = vpop.f32.mrf.mxu1 }
 0x173   :  { %v3739_v16 = vadd.f32 %v2238_v2, %v2158_v34  ;;  %v2275_v24 = vpop.f32.mrf.mxu0 }
 0x174   :  { %v2352_v56 = vpop.f32.mrf.mxu1  ;;  %v2276_v15 = vadd.f32 %v2275_v24, %v2274_v12 }
 0x175   :  { %3973 = vst [vmem:[#allocation11_spill] sm:$0xff] %v3739_v16  ;;  %v2277_v35 = vpop.f32.mrf.mxu0 }
 0x176   :  { %v2354_v10 = vpop.f32.mrf.mxu1 }
 0x177   :  { %v2278_v27 = vpop.f32.mrf.mxu0 }
 0x178   :  { %v2355_v57 = vpop.f32.mrf.mxu1  ;;  %v2279_v25 = vadd.f32 %v2278_v27, %v2277_v35 }
 0x179   :  { %v2280_v51 = vpop.f32.mrf.mxu0 }
 0x17a   :  { %v2357_v11 = vpop.f32.mrf.mxu1 }
 0x17b   :  { %v2281_v1 = vpop.f32.mrf.mxu0 }
 0x17c   :  { %v2358_v63 = vpop.f32.mrf.mxu1 }
 0x17d   :  { %v2283_v45 = vpop.f32.mrf.mxu0 }
 0x17e   :  { %v2360_v30 = vpop.f32.mrf.mxu1 }
 0x17f   :  { %v2284_v38 = vpop.f32.mrf.mxu0 }
 0x180   :  { %v2361_v54 = vpop.f32.mrf.mxu1 }
 0x181   :  { %v2286_v31 = vpop.f32.mrf.mxu0  ;;  %v2362_v18 = vadd.f32 %v2361_v54, %v2360_v30 }
 0x182   :  { %v2363_v39 = vpop.f32.mrf.mxu1 }
 0x183   :  { %v2287_v5 = vpop.f32.mrf.mxu0 }
 0x184   :  { %v2364_v59 = vpop.f32.mrf.mxu1 }
 0x185   :  { %v2289_v37 = vpop.f32.mrf.mxu0 }
 0x186   :  { %v2366_v50 = vpop.f32.mrf.mxu1 }
 0x187   :  { %v2290_v32 = vpop.f32.mrf.mxu0 }
 0x188   :  { %v2367_v62 = vpop.f32.mrf.mxu1 }
 0x189   :  { %v3741_v58 = vpop.f32.mrf.mxu0 }
 0x18a   :  { %3974 = vst [vmem:[#allocation12_spill] sm:$0xff] %v3741_v58  ;;  %v3743_v14 = vpop.f32.mrf.mxu1  ;;  %v2359_v58 = vadd.f32 %v2358_v63, %v2357_v11 }
 0x18b   :  { %3975 = vst [vmem:[#allocation13_spill] sm:$0xff] %v3743_v14  ;;  %v3745_v29 = vpop.f32.mrf.mxu0 }
 0x18c   :  { %3976 = vst [vmem:[#allocation14_spill] sm:$0xff] %v3745_v29  ;;  %v3747_v8 = vpop.f32.mrf.mxu1  ;;  %v2353_v29 = vadd.f32 %v2352_v56, %v2351_v4  ;;  %v2365_v4 = vadd.f32 %v2364_v59, %v2363_v39  ;;  %v2291_v56 = vadd.f32 %v2290_v32, %v2289_v37  ;;  %v3988_v59 = vld [vmem:[#allocation5_spill] sm:$0xff] }
 0x18d   :  { %3977 = vst [vmem:[#allocation15_spill] sm:$0xff] %v3747_v8  ;;  %v2295_v42 = vpop.f32.mrf.mxu0 }
 0x18e   :  { %v3749_v21 = vpop.f32.mrf.mxu1 }
 0x18f   :  { %3978 = vst [vmem:[#allocation16_spill] sm:$0xff] %v3749_v21  ;;  %v2296_v22 = vpop.f32.mrf.mxu0  ;;  %v2273_v21 = vadd.f32 %v2272_v46, %v2271_v52  ;;  %v1552_v52 = vadd.f32 %v2279_v25, %v3709_v44  ;;  %v2288_v46 = vadd.f32 %v2287_v5, %v2286_v31 }
 0x190   :  { %v3751_v41 = vpop.f32.mrf.mxu1 }
 0x191   :  { %3979 = vst [vmem:[#allocation17_spill] sm:$0xff] %v3751_v41  ;;  %v2298_v0 = vpop.f32.mrf.mxu0  ;;  %v1542_v12 = vadd.f32 %v2273_v21, %v3705_v43  ;;  %v1567_v30 = vadd.f32 %v2288_v46, %v3715_v6 }
 0x192   :  { %v2375_v40 = vpop.f32.mrf.mxu1 }
 0x193   :  { %v2299_v26 = vpop.f32.mrf.mxu0 }
 0x194   :  { %v2376_v20 = vpop.f32.mrf.mxu1  ;;  %v2300_v24 = vadd.f32 %v2299_v26, %v2298_v0  ;;  %v3993_v0 = vld [vmem:[#allocation7_spill] sm:$0xff] }
 0x195   :  { %v2301_v55 = vpop.f32.mrf.mxu0 }
 0x196   :  { %v2378_v33 = vpop.f32.mrf.mxu1 }
 0x197   :  { %v2302_v23 = vpop.f32.mrf.mxu0 }
 0x198   :  { %v2379_v47 = vpop.f32.mrf.mxu1  ;;  %v2303_v39 = vadd.f32 %v2302_v23, %v2301_v55 }
 0x199   :  { %v2304_v34 = vpop.f32.mrf.mxu0 }
 0x19a   :  { %v3753_v60 = vpop.f32.mrf.mxu1 }
 0x19b   :  { %3980 = vst [vmem:[#allocation18_spill] sm:$0xff] %v3753_v60  ;;  %v2305_v7 = vpop.f32.mrf.mxu0  ;;  %v2282_v60 = vadd.f32 %v2281_v1, %v2280_v51  ;;  %v2380_v51 = vadd.f32 %v2379_v47, %v2378_v33  ;;  %v1687_v1 = vadd.f32 %v2353_v29, %v1542_v12  ;;  %v3995_v47 = vld [vmem:[#allocation16_spill] sm:$0xff] }
 0x19c   :  { %v3755_v19 = vpop.f32.mrf.mxu1  ;;  %v2306_v54 = vadd.f32 %v2305_v7, %v2304_v34  ;;  %v3996_v34 = vld [vmem:[#allocation17_spill] sm:$0xff]  ;;  %v3997_v7 = vld [vmem:[#allocation6_spill] sm:$0xff] }
 0x19d   :  { %3981 = vst [vmem:[#allocation19_spill] sm:$0xff] %v3755_v19  ;;  %v3757_v36 = vpop.f32.mrf.mxu0 }
 0x19e   :  { %3982 = vst [vmem:[#allocation20_spill] sm:$0xff] %v3757_v36  ;;  %v2384_v2 = vpop.f32.mrf.mxu1  ;;  %v2356_v36 = vadd.f32 %v2355_v57, %v2354_v10  ;;  %v1557_v10 = vadd.f32 %v2282_v60, %v3711_v13  ;;  %v2297_v57 = vadd.f32 %v2296_v22, %v2295_v42  ;;  %v1587_v13 = vadd.f32 %v2300_v24, %v3723_v61  ;;  %v4000_v24 = vld [vmem:[#allocation13_spill] sm:$0xff] }
 0x19f   :  { %v3759_v53 = vpop.f32.mrf.mxu0  ;;  %v2374_v60 = vadd.f32 %v3996_v34, %v3995_v47 }
 0x1a0   :  { %3983 = vst [vmem:[#allocation21_spill] sm:$0xff] %v3759_v53  ;;  %v2385_v16 = vpop.f32.mrf.mxu1  ;;  %v1702_v25 = vadd.f32 %v2362_v18, %v1557_v10  ;;  %v1582_v37 = vadd.f32 %v2297_v57, %v3988_v59  ;;  %v1732_v61 = vadd.f32 %v2380_v51, %v1587_v13  ;;  %v4001_v10 = vld [vmem:[#allocation15_spill] sm:$0xff]  ;;  %v4002_v51 = vld [vmem:[#allocation4_spill] sm:$0xff] }
 0x1a1   :  { %v3761_v48 = vpop.f32.mrf.mxu0  ;;  %v2386_v6 = vadd.f32 %v2385_v16, %v2384_v2  ;;  %v4006_v59 = vld [vmem:[#allocation8_spill] sm:$0xff] }
 0x1a2   :  { %3984 = vst [vmem:[#allocation22_spill] sm:$0xff] %v3761_v48  ;;  %v3763_v28 = vpop.f32.mrf.mxu1 }
 0x1a3   :  { %3985 = vst [vmem:[#allocation23_spill] sm:$0xff] %v3763_v28  ;;  %v2311_v3 = vpop.f32.mrf.mxu0  ;;  %v1547_v28 = vadd.f32 %v2276_v15, %v3707_v49  ;;  %v2368_v15 = vadd.f32 %v2367_v62, %v2366_v50  ;;  %v3989_v62 = vld [vmem:[#allocation12_spill] sm:$0xff] }
 0x1a4   :  { %v3765_v8 = vpop.f32.mrf.mxu1 }
 0x1a5   :  { %3986 = vst [vmem:[#allocation24_spill] sm:$0xff] %v3765_v8  ;;  %v3767_v14 = vpop.f32.mrf.mxu0  ;;  %v2285_v8 = vadd.f32 %v2284_v38, %v2283_v45  ;;  %v1692_v49 = vadd.f32 %v2356_v36, %v1547_v28  ;;  %v1697_v45 = vadd.f32 %v2359_v58, %v1552_v52  ;;  %v2377_v38 = vadd.f32 %v2376_v20, %v2375_v40  ;;  %v3990_v58 = vld [vmem:[#allocation14_spill] sm:$0xff]  ;;  %v3998_v2 = vld [vmem:[#allocation20_spill] sm:$0xff] }
 0x1a6   :  { %3987 = vst [vmem:[#allocation25_spill] sm:$0xff] %v3767_v14  ;;  %v3769_v41 = vpop.f32.mrf.mxu1  ;;  %v1572_v28 = vadd.f32 %v2291_v56, %v3717_v17  ;;  %v1712_v32 = vadd.f32 %v2368_v15, %v1567_v30  ;;  %v2294_v29 = vadd.f32 %v3990_v58, %v3989_v62  ;;  %v3991_v17 = vld [vmem:[#allocation18_spill] sm:$0xff]  ;;  %v1597_v40 = vadd.f32 %v2306_v54, %v3993_v0 }
 0x1a7   :  { %v3771_v19 = vpop.f32.mrf.mxu0  ;;  %v1562_v43 = vadd.f32 %v2285_v8, %v3713_v9  ;;  %v3992_v8 = vld [vmem:[#allocation19_spill] sm:$0xff]  ;;  %v1727_v23 = vadd.f32 %v2377_v38, %v1582_v37  ;;  %v1592_v36 = vadd.f32 %v2303_v39, %v3997_v7  ;;  %v3999_v12 = vld [vmem:[#allocation21_spill] sm:$0xff] }
 0x1a8   :  { %v3773_v53 = vpop.f32.mrf.mxu1  ;;  %v2383_v42 = vadd.f32 %v3992_v8, %v3991_v17  ;;  %v2309_v52 = vadd.f32 %v3999_v12, %v3998_v2  ;;  %v1742_v57 = vadd.f32 %v2386_v6, %v1597_v40 }
 0x1a9   :  { %v3775_v48 = vpop.f32.mrf.mxu0  ;;  %v1707_v18 = vadd.f32 %v2365_v4, %v1562_v43  ;;  %v3994_v26 = vld [vmem:[#allocation22_spill] sm:$0xff]  ;;  %v2371_v4 = vadd.f32 %v4001_v10, %v4000_v24  ;;  %v2392_v56 = vadd.f32 %v3773_v53, %v3769_v41 }
 0x1aa   :  { %v3778_v14 = vpop.f32.mrf.mxu1  ;;  %v2312_v20 = vadd.f32 %v2311_v3, %v3994_v26  ;;  %v1737_v41 = vadd.f32 %v2383_v42, %v1592_v36  ;;  %v4004_v30 = vld [vmem:[#allocation23_spill] sm:$0xff]  ;;  %v1602_v37 = vadd.f32 %v2309_v52, %v4006_v59 }
 0x1ab   :  { %v3782_v35 = vpop.f32.mrf.mxu0 }
 0x1ac   :  { %v3785_v27 = vpop.f32.mrf.mxu1  ;;  %v4005_v13 = vld [vmem:[#allocation24_spill] sm:$0xff]  ;;  %v2318_v54 = vadd.f32 %v3782_v35, %v3775_v48 }
 0x1ad   :  { %v2465_v11 = vpop.f32.mrf.mxu0  ;;  %v2389_v38 = vadd.f32 %v4005_v13, %v4004_v30 }
 0x1ae   :  { %v2396_v63 = vpop.f32.mrf.mxu1  ;;  %v3788_v44 = vadd.f32 %v2465_v11, %v1692_v49  ;;  %v1577_v11 = vadd.f32 %v2294_v29, %v4002_v51 }
 0x1af   :  { %v1831_v31 = vpop.f32.mrf.mxu0  ;;  %v1747_v40 = vadd.f32 %v2389_v38, %v1602_v37 }
 0x1b0   :  { %1911 = vst [vmem:[%s3965_s3 + $0x8] sm:$0xff] %v3788_v44  ;;  %v2397_v9 = vpop.f32.mrf.mxu1  ;;  %v3797_v5 = vadd.f32 %v1831_v31, %v1687_v1  ;;  %v1722_v35 = vadd.f32 %v2374_v60, %v1577_v11 }
 0x1b1   :  { %v2468_v50 = vpop.f32.mrf.mxu0  ;;  %v2398_v62 = vadd.f32 %v2397_v9, %v2396_v63  ;;  %v1717_v63 = vadd.f32 %v2371_v4, %v1572_v28  ;;  %v4008_v9 = vld [vmem:[#allocation11_spill] sm:$0xff] }
 0x1b2   :  { %1910 = vst [vmem:[%s3965_s3] sm:$0xff] %v3797_v5  ;;  %v1930_v21 = vadd.f32 %v3788_v44, %v3797_v5  ;;  %v3810_v22 = vadd.f32 %v2468_v50, %v1702_v25  ;;  %v2477_v16 = vpop.f32.mrf.mxu1  ;;  %v4003_v25 = vld [vmem:[#allocation9_spill] sm:$0xff]  ;;  %v1617_v42 = vadd.f32 %v2318_v54, %v4008_v9 }
 0x1b3   :  { %v3814_v55 = vadd.f32 %v2477_v16, %v1732_v61  ;;  %v1841_v33 = vpop.f32.mrf.mxu0  ;;  %v4007_v61 = vld [vmem:[#allocation25_spill] sm:$0xff] }
 0x1b4   :  { %1913 = vst [vmem:[%s3965_s3 + $0x18] sm:$0xff] %v3810_v22  ;;  %v3825_v46 = vadd.f32 %v1841_v33, %v1697_v45  ;;  %v1871_v3 = vpop.f32.mrf.mxu1  ;;  %v1607_v45 = vadd.f32 %v2312_v20, %v4003_v25  ;;  %v4009_v33 = vld [vmem:[#allocation10_spill] sm:$0xff] }
 0x1b5   :  { %1919 = vst [vmem:[%s3965_s3 + $0x48] sm:$0xff] %v3814_v55  ;;  %v3835_v49 = vadd.f32 %v1871_v3, %v1727_v23  ;;  %v2471_v15 = vpop.f32.mrf.mxu0  ;;  %v1762_v23 = vadd.f32 %v2398_v62, %v1617_v42 }
 0x1b6   :  { %1912 = vst [vmem:[%s3965_s3 + $0x10] sm:$0xff] %v3825_v46  ;;  %v1931_v1 = vadd.f32 %v1930_v21, %v3825_v46  ;;  %v3843_v43 = vadd.f32 %v2471_v15, %v1712_v32  ;;  %v2480_v53 = vpop.f32.mrf.mxu1  ;;  %v2315_v32 = vadd.f32 %v3771_v19, %v4007_v61  ;;  %v1752_v17 = vadd.f32 %v2392_v56, %v1607_v45 }
 0x1b7   :  { %1918 = vst [vmem:[%s3965_s3 + $0x40] sm:$0xff] %v3835_v49  ;;  %v3854_v31 = vadd.f32 %v2480_v53, %v1742_v57  ;;  %v1851_v39 = vpop.f32.mrf.mxu0  ;;  %v2395_v21 = vadd.f32 %v3785_v27, %v3778_v14 }
 0x1b8   :  { %1915 = vst [vmem:[%s3965_s3 + $0x28] sm:$0xff] %v3843_v43  ;;  %v3861_v6 = vadd.f32 %v1851_v39, %v1707_v18  ;;  %v1932_v50 = vadd.f32 %v1931_v1, %v3810_v22  ;;  %v1881_v48 = vpop.f32.mrf.mxu1  ;;  %v1612_v14 = vadd.f32 %v2315_v32, %v4009_v33 }
 0x1b9   :  { %1921 = vst [vmem:[%s3965_s3 + $0x58] sm:$0xff] %v3854_v31  ;;  %v3870_v58 = vadd.f32 %v1881_v48, %v1737_v41  ;;  %v2474_v29 = vpop.f32.mrf.mxu0 }
 0x1ba   :  { %1914 = vst [vmem:[%s3965_s3 + $0x20] sm:$0xff] %v3861_v6  ;;  %v1933_v18 = vadd.f32 %v1932_v50, %v3861_v6  ;;  %v3877_v8 = vadd.f32 %v2474_v29, %v1722_v35  ;;  %v2483_v19 = vpop.f32.mrf.mxu1  ;;  %v1757_v7 = vadd.f32 %v2395_v21, %v1612_v14 }
 0x1bb   :  { %1920 = vst [vmem:[%s3965_s3 + $0x50] sm:$0xff] %v3870_v58  ;;  %v3886_v16 = vadd.f32 %v2483_v19, %v1752_v17  ;;  %v1861_v0 = vpop.f32.mrf.mxu0 }
 0x1bc   :  { %1917 = vst [vmem:[%s3965_s3 + $0x38] sm:$0xff] %v3877_v8  ;;  %v1862_v28 = vadd.f32 %v1861_v0, %v1717_v63  ;;  %v1934_v26 = vadd.f32 %v1933_v18, %v3843_v43  ;;  %v1891_v20 = vpop.f32.mrf.mxu1 }
 0x1bd   :  { %1923 = vst [vmem:[%s3965_s3 + $0x68] sm:$0xff] %v3886_v16  ;;  %v3898_v27 = vadd.f32 %v1891_v20, %v1747_v40 }
 0x1be   :  { %1916 = vst [vmem:[%s3965_s3 + $0x30] sm:$0xff] %v1862_v28  ;;  %v1935_v47 = vadd.f32 %v1934_v26, %v1862_v28  ;;  %v2486_v34 = vpop.f32.mrf.mxu1 }
 0x1bf   :  { %1922 = vst [vmem:[%s3965_s3 + $0x60] sm:$0xff] %v3898_v27  ;;  %v3907_v60 = vadd.f32 %v2486_v34, %v1762_v23 }
 0x1c0   :  { %v1936_v36 = vadd.f32 %v1935_v47, %v3877_v8  ;;  %v1901_v2 = vpop.f32.mrf.mxu1 }
 0x1c1   :  { %1925 = vst [vmem:[%s3965_s3 + $0x78] sm:$0xff] %v3907_v60  ;;  %v3914_v12 = vadd.f32 %v1901_v2, %v1757_v7 }
 0x1c2   :  { %v1937_v52 = vadd.f32 %v1936_v36, %v3835_v49 }
 0x1c3   :  { %1924 = vst [vmem:[%s3965_s3 + $0x70] sm:$0xff] %v3914_v12 }
 0x1c4   :  { %v1938_v3 = vadd.f32 %v1937_v52, %v3814_v55 }
 0x1c6   :  { %v1939_v24 = vadd.f32 %v1938_v3, %v3870_v58 }
 0x1c8   :  { %v1940_v10 = vadd.f32 %v1939_v24, %v3854_v31 }
 0x1ca   :  { %v1941_v4 = vadd.f32 %v1940_v10, %v3898_v27 }
 0x1cc   :  { %v1942_v56 = vadd.f32 %v1941_v4, %v3886_v16 }
 0x1ce   :  { %v1943_v15 = vadd.f32 %v1942_v56, %v3914_v12 }
 0x1d0   :  { %v1944_v57 = vadd.f32 %v1943_v15, %v3907_v60 }
 0x1d2   :  { %v1945_v51 = vrot.slane %v1944_v57, 4 }
 0x1d4   :  { %v1946_v11 = vadd.f32 %v1945_v51, %v1944_v57 }
 0x1d6   :  { %v1947_v1 = vrot.slane %v1946_v11, 2 }
 0x1d8   :  { %v1948_v53 = vadd.f32 %v1947_v1, %v1946_v11 }
 0x1da   :  { %v1949_v41 = vrot.slane %v1948_v53, 1 }
 0x1dc   :  { %v1950_v25 = vadd.f32 %v1949_v41, %v1948_v53 }
 0x1de   :  { %v1951_v45 = vmul.f32 0.0078125, %v1950_v25 }
 0x1e0   :  { %1952 = vst [vmem:[%s3964_s4 + $0x2] sm:$0x1] %v1951_v45 }
 0x1e7   :  { %v2078_v30 = vld [vmem:[%s3964_s4 + $0x2] ss:$0 sm:$0xff] }
 0x1e8   :  { %v1958_v13 = vsub.f32 %v3797_v5, %v2078_v30  ;;  %v1959_v38 = vsub.f32 %v3788_v44, %v2078_v30  ;;  %v1960_v54 = vsub.f32 %v3825_v46, %v2078_v30  ;;  %v1961_v50 = vsub.f32 %v3810_v22, %v2078_v30 }
 0x1e9   :  { %v1962_v35 = vsub.f32 %v3861_v6, %v2078_v30  ;;  %v1963_v29 = vsub.f32 %v3843_v43, %v2078_v30  ;;  %v1964_v19 = vsub.f32 %v1862_v28, %v2078_v30  ;;  %v1965_v9 = vsub.f32 %v3877_v8, %v2078_v30 }
 0x1ea   :  { %v1975_v39 = vadd.f32 %v1959_v38, %v1958_v13  ;;  %v1999_v59 = vmul.f32 %v1958_v13, %v1958_v13  ;;  %v2000_v37 = vmul.f32 %v1959_v38, %v1959_v38  ;;  %v2001_v32 = vmul.f32 %v1960_v54, %v1960_v54 }
 0x1eb   :  { %v2002_v18 = vmul.f32 %v1961_v50, %v1961_v50  ;;  %v2003_v63 = vmul.f32 %v1962_v35, %v1962_v35  ;;  %v2004_v21 = vmul.f32 %v1963_v29, %v1963_v29  ;;  %v1966_v0 = vsub.f32 %v3835_v49, %v2078_v30 }
 0x1ec   :  { %v1976_v48 = vadd.f32 %v1975_v39, %v1960_v54  ;;  %v2015_v62 = vadd.f32 %v2000_v37, %v1999_v59  ;;  %v2005_v40 = vmul.f32 %v1964_v19, %v1964_v19  ;;  %v1967_v20 = vsub.f32 %v3814_v55, %v2078_v30 }
 0x1ed   :  { %v2006_v33 = vmul.f32 %v1965_v9, %v1965_v9  ;;  %v1968_v28 = vsub.f32 %v3870_v58, %v2078_v30  ;;  %v2007_v47 = vmul.f32 %v1966_v0, %v1966_v0  ;;  %v1969_v8 = vsub.f32 %v3854_v31, %v2078_v30 }
 0x1ee   :  { %v1977_v61 = vadd.f32 %v1976_v48, %v1961_v50  ;;  %v2016_v5 = vadd.f32 %v2015_v62, %v2001_v32  ;;  %v2008_v36 = vmul.f32 %v1967_v20, %v1967_v20  ;;  %v1970_v49 = vsub.f32 %v3898_v27, %v2078_v30  ;;  %v1998_v62 = vld [vmem:[%s3964_s4 + $0x1] sm:$0x1] }
 0x1ef   :  { %v2009_v3 = vmul.f32 %v1968_v28, %v1968_v28  ;;  %v1971_v55 = vsub.f32 %v3886_v16, %v2078_v30  ;;  %v2010_v4 = vmul.f32 %v1969_v8, %v1969_v8  ;;  %v1972_v58 = vsub.f32 %v3914_v12, %v2078_v30 }
 0x1f0   :  { %v1978_v17 = vadd.f32 %v1977_v61, %v1962_v35  ;;  %v2017_v46 = vadd.f32 %v2016_v5, %v2002_v18  ;;  %v2011_v57 = vmul.f32 %v1970_v49, %v1970_v49  ;;  %v1973_v31 = vsub.f32 %v3907_v60, %v2078_v30  ;;  %v1974_v60 = vld [vmem:[%s3964_s4] sm:$0x1] }
 0x1f1   :  { %v2012_v1 = vmul.f32 %v1971_v55, %v1971_v55  ;;  %v2013_v27 = vmul.f32 %v1972_v58, %v1972_v58 }
 0x1f2   :  { %v1979_v44 = vadd.f32 %v1978_v17, %v1963_v29  ;;  %v2018_v22 = vadd.f32 %v2017_v46, %v2003_v63  ;;  %v2014_v13 = vmul.f32 %v1973_v31, %v1973_v31 }
 0x1f4   :  { %v1980_v42 = vadd.f32 %v1979_v44, %v1964_v19  ;;  %v2019_v26 = vadd.f32 %v2018_v22, %v2004_v21 }
 0x1f6   :  { %v1981_v6 = vadd.f32 %v1980_v42, %v1965_v9  ;;  %v2020_v14 = vadd.f32 %v2019_v26, %v2005_v40 }
 0x1f8   :  { %v1982_v43 = vadd.f32 %v1981_v6, %v1966_v0  ;;  %v2021_v34 = vadd.f32 %v2020_v14, %v2006_v33 }
 0x1fa   :  { %v1983_v23 = vadd.f32 %v1982_v43, %v1967_v20  ;;  %v2022_v2 = vadd.f32 %v2021_v34, %v2007_v47 }
 0x1fc   :  { %v1984_v7 = vadd.f32 %v1983_v23, %v1968_v28  ;;  %v2023_v24 = vadd.f32 %v2022_v2, %v2008_v36 }
 0x1fe   :  { %v1985_v52 = vadd.f32 %v1984_v7, %v1969_v8  ;;  %v2024_v56 = vadd.f32 %v2023_v24, %v2009_v3 }
 0x200   :  { %v1986_v10 = vadd.f32 %v1985_v52, %v1970_v49  ;;  %v2025_v51 = vadd.f32 %v2024_v56, %v2010_v4 }
 0x202   :  { %v1987_v15 = vadd.f32 %v1986_v10, %v1971_v55  ;;  %v2026_v53 = vadd.f32 %v2025_v51, %v2011_v57 }
 0x204   :  { %v1988_v11 = vadd.f32 %v1987_v15, %v1972_v58  ;;  %v2027_v25 = vadd.f32 %v2026_v53, %v2012_v1 }
 0x206   :  { %v1989_v41 = vadd.f32 %v1988_v11, %v1973_v31  ;;  %v2028_v38 = vadd.f32 %v2027_v25, %v2013_v27 }
 0x208   :  { %v1990_v45 = vrot.slane %v1989_v41, 4  ;;  %v2029_v54 = vadd.f32 %v2028_v38, %v2014_v13 }
 0x20a   :  { %v1991_v16 = vadd.f32 %v1990_v45, %v1989_v41  ;;  %v2030_v59 = vrot.slane %v2029_v54, 4 }
 0x20c   :  { %v1992_v39 = vrot.slane %v1991_v16, 2  ;;  %v2031_v12 = vadd.f32 %v2030_v59, %v2029_v54 }
 0x20e   :  { %v1993_v37 = vadd.f32 %v1992_v39, %v1991_v16  ;;  %v2032_v48 = vrot.slane %v2031_v12, 2 }
 0x210   :  { %v1994_v50 = vrot.slane %v1993_v37, 1  ;;  %v2033_v35 = vadd.f32 %v2032_v48, %v2031_v12 }
 0x212   :  { %v1995_v30 = vadd.f32 %v1994_v50, %v1993_v37  ;;  %v2034_v32 = vrot.slane %v2033_v35, 1 }
 0x214   :  { %v1996_v61 = vadd.f32 %v1995_v30, %v1974_v60  ;;  %v2035_v29 = vadd.f32 %v2034_v32, %v2033_v35 }
 0x216   :  { %1997 = vst [vmem:[%s3964_s4] sm:$0x1] %v1996_v61  ;;  %v2036_v17 = vadd.f32 %v2035_v29, %v1998_v62 }
 0x218   :  { %2037 = vst [vmem:[%s3964_s4 + $0x1] sm:$0x1] %v2036_v17 }

</bundles_post_ra>
